<compile_context>
chip_gen: v7x
topology: tpu7x:2x2x1
jax: 0.10.0
libtpu: 0.0.40
codegen_flags: <defaults>
</compile_context>

<pallas_src>
import functools

import jax
import jax.numpy as jnp
from jax.experimental import pallas as pl
from jax.experimental.pallas import tpu as pltpu

N_CONV_LAYERS = 7
KSIZE = 8
PAD_L, PAD_R = 3, 4          # nn.ZeroPad2d((3, 4, 0, 0)) pads the length axis by (3, 4)
CIN0 = 2                     # input channels
CCH = 64                     # conv channels
L0 = 128                     # required input length (7 pool-by-2 stages -> L == 1)
N_LOGITS = 11
OUT_LANES = 128              # merged output slab: [feat 64 | logits 11 | zero fill 53]
SELU_ALPHA = 1.6732632423543772
SELU_SCALE = 1.0507009873554805
SCR_ROWS = ((PAD_L + L0 // 2 + PAD_R) + 7) // 8 * 8   # 72 padded rows (layers 1..6)


def vgg2_kernel(x0_ref,
                w0, b0, w1, b1, w2, b2, w3, b3, w4, b4, w5, b5, w6, b6,
                fw1_ref, fb1_ref, fw2_ref, fb2_ref,
                out_ref, pad_scr):
    """One grid step = `nb` samples, fully VMEM-resident.

      x0_ref  : (nb, 128, 16) bf16   layer-0 im2col of the zero-padded input
      w_i     : (K*Cin_i, 64) bf16   conv weights (tap-major, channel-minor rows)
      b_i     : (1, 64)       f32    conv biases
      fw1/fb1 : (64, 32) bf16 / (1, 32) f32
      fw2/fb2 : (32, 11) bf16 / (1, 11) f32
      out_ref : (nb, 1, 128)  f32    [feat | logits | zeros] lane-dense slab
      pad_scr : (nb, 72, 64)  f32    zero-padded activation scratch for layers 1..6
    """
    conv_w = (w0, w1, w2, w3, w4, w5, w6)      # refs; loaded right before use
    conv_b = (b0, b1, b2, b3, b4, b5, b6)

    nb = x0_ref.shape[0]
    zeros_lpad = jnp.zeros((nb, PAD_L, CCH), jnp.float32)
    zeros_rpad = jnp.zeros((nb, PAD_R, CCH), jnp.float32)

    # Left-pad rows of the scratch are written once and stay zero for every layer
    # (all interior stores start at row PAD_L).
    pad_scr[:, :PAD_L, :] = zeros_lpad

    # ---- conv layer 0: im2col was prepared in the wrapper -> single MXU matmul.
    L = L0
    cols = x0_ref[...].reshape(nb * L, KSIZE * CIN0)                  # (nb*128, 16)
    acc = jnp.dot(cols, conv_w[0][...],
                  preferred_element_type=jnp.float32)                 # (nb*128, 64)
    acc = jnp.maximum(acc + conv_b[0][...], 0.0)                      # bias + ReLU
    # MaxPool1d(2, 2): pairs of adjacent rows never cross samples (L is even).
    # reshape+max kept (instead of stride-2 slices) for robust Mosaic lowering.
    h = jnp.max(acc.reshape(nb * L // 2, 2, CCH), axis=1)             # (nb*64, 64) f32
    L = L // 2

    # ---- conv layers 1..6: pre-zeroed padded scratch + im2col -> one matmul each.
    for li in range(1, N_CONV_LAYERS):
        pad_scr[:, PAD_L:PAD_L + L, :] = h.reshape(nb, L, CCH)        # interior rows
        pad_scr[:, PAD_L + L:PAD_L + L + PAD_R, :] = zeros_rpad       # right-pad rows
        hp = pad_scr[:, :L + PAD_L + PAD_R, :].astype(jnp.bfloat16)   # (nb, L+7, 64)
        cols = jnp.concatenate([hp[:, t:t + L, :] for t in range(KSIZE)],
                               axis=-1)                               # (nb, L, 512)
        acc = jnp.dot(cols.reshape(nb * L, KSIZE * CCH), conv_w[li][...],
                      preferred_element_type=jnp.float32)             # (nb*L, 64)
        acc = jnp.maximum(acc + conv_b[li][...], 0.0)                 # bias + ReLU
        h = jnp.max(acc.reshape(nb * L // 2, 2, CCH), axis=1)         # MaxPool(2,2)
        L = L // 2

    # ---- after 7 halvings L == 1: PyTorch's .view(B, -1) == the channel row.
    feat = h                                                          # (nb, 64) f32
    z = jnp.dot(feat.astype(jnp.bfloat16), fw1_ref[...],
                preferred_element_type=jnp.float32) + fb1_ref[...]    # (nb, 32)
    z = SELU_SCALE * jnp.where(z > 0.0, z, SELU_ALPHA * (jnp.exp(z) - 1.0))   # SELU
    # Dropout(0.2): identity (eval mode).
    logits = jnp.dot(z.astype(jnp.bfloat16), fw2_ref[...],
                     preferred_element_type=jnp.float32) + fb2_ref[...]       # (nb, 11)

    # Single lane-dense 128-wide writeback: [feat | logits | zero fill].
    slab = jnp.concatenate(
        [feat, logits,
         jnp.zeros((nb, OUT_LANES - CCH - N_LOGITS), jnp.float32)], axis=-1)
    out_ref[...] = slab.reshape(nb, 1, OUT_LANES)


def init_params(key):
    """Deterministic synthetic weights mirroring the module's init scheme/shapes."""
    params = {"conv": [], "fc": []}
    cin = CIN0
    for _ in range(N_CONV_LAYERS):
        key, kw, kb = jax.random.split(key, 3)
        fan_in = cin * KSIZE
        # kaiming_normal_ (fan_in, relu gain) on PyTorch-layout (Cout, Cin, K) weights.
        w = jax.random.normal(kw, (CCH, cin, KSIZE), jnp.float32) * jnp.sqrt(2.0 / fan_in)
        bound = 1.0 / jnp.sqrt(float(fan_in))
        b = jax.random.uniform(kb, (CCH,), jnp.float32, -bound, bound)
        params["conv"].append((w, b))
        cin = CCH
    for fin, fout in [(CCH, 32), (32, N_LOGITS)]:
        key, kw, kb = jax.random.split(key, 3)
        # xavier_normal_ on PyTorch-layout (out, in) weights.
        w = jax.random.normal(kw, (fout, fin), jnp.float32) * jnp.sqrt(2.0 / (fin + fout))
        bound = 1.0 / jnp.sqrt(float(fin))
        b = jax.random.uniform(kb, (fout,), jnp.float32, -bound, bound)
        params["fc"].append((w, b))
    return params


def _pick_sub_batch(n):
    """Largest power-of-two divisor of n, capped at 16, leaving >= 2 grid steps
    whenever n > 1 (so megacore / the v7x second TensorCore gets work)."""
    cap = min(16, n // 2) if n > 1 else 1
    sb = 1
    while sb * 2 <= cap and n % (sb * 2) == 0:
        sb *= 2
    return sb


@functools.partial(jax.jit, static_argnames=("sub_batch",))
def _vgg2_forward_impl(x_ncl, params, sub_batch):
    n = x_ncl.shape[0]

    # Layer-0 im2col (pure layout: NCL->NLC, zero-pad (3,4), stack the 8 taps) so the
    # kernel's first conv is a single (nb*128, 16) @ (16, 64) MXU matmul.
    x_nlc = jnp.transpose(x_ncl, (0, 2, 1)).astype(jnp.float32)       # (N, 128, 2)
    x_pad = jnp.pad(x_nlc, ((0, 0), (PAD_L, PAD_R), (0, 0)))          # (N, 135, 2)
    x_col = jnp.concatenate([x_pad[:, t:t + L0, :] for t in range(KSIZE)],
                            axis=-1).astype(jnp.bfloat16)             # (N, 128, 16)

    args = [x_col]
    in_specs = [pl.BlockSpec((sub_batch, L0, KSIZE * CIN0), lambda i: (i, 0, 0))]
    for w, b in params["conv"]:
        k_cin = KSIZE * w.shape[1]
        # (Cout, Cin, K) -> (K, Cin, Cout) -> (K*Cin, Cout), bf16; matches im2col layout.
        w_flat = jnp.transpose(w, (2, 1, 0)).reshape(k_cin, CCH).astype(jnp.bfloat16)
        args += [w_flat, b.reshape(1, CCH).astype(jnp.float32)]
        in_specs += [pl.BlockSpec((k_cin, CCH), lambda i: (0, 0)),
                     pl.BlockSpec((1, CCH), lambda i: (0, 0))]
    for w, b in params["fc"]:
        fout, fin = w.shape
        args += [jnp.transpose(w).astype(jnp.bfloat16),
                 b.reshape(1, fout).astype(jnp.float32)]
        in_specs += [pl.BlockSpec((fin, fout), lambda i: (0, 0)),
                     pl.BlockSpec((1, fout), lambda i: (0, 0))]

    slab = pl.pallas_call(
        vgg2_kernel,
        out_shape=jax.ShapeDtypeStruct((n, 1, OUT_LANES), jnp.float32),
        grid_spec=pltpu.PrefetchScalarGridSpec(
            num_scalar_prefetch=0,
            grid=(n // sub_batch,),
            in_specs=in_specs,
            out_specs=pl.BlockSpec((sub_batch, 1, OUT_LANES), lambda i: (i, 0, 0)),
            scratch_shapes=[pltpu.VMEM((sub_batch, SCR_ROWS, CCH), jnp.float32)],
        ),
        compiler_params=pltpu.CompilerParams(
            dimension_semantics=("parallel",)),
    )(*args)

    slab = slab.reshape(n, OUT_LANES)
    feat = slab[:, :CCH]
    logits = slab[:, CCH:CCH + N_LOGITS]
    return logits, feat


def vgg2_forward(x_ncl, params, sub_batch=None):
    """x_ncl: (N, 2, 128) in PyTorch NCL layout. Returns (logits (N, 11), features (N, 64))."""
    n, cin, length = x_ncl.shape
    assert cin == CIN0 and length == L0, (
        "Vgg2 requires (N, 2, 128) inputs so 7 pool-by-2 stages leave L == 1")
    if sub_batch is None:
        sub_batch = _pick_sub_batch(n)
    assert n % sub_batch == 0, "batch must be divisible by sub_batch"
    return _vgg2_forward_impl(x_ncl, params, sub_batch)


if __name__ == "__main__":
    key = jax.random.PRNGKey(0)
    kp, kx = jax.random.split(key)
    params = init_params(kp)
    # Input length must be 128 so that 7 maxpool-by-2 stages leave L == 1
    # (flatten -> 64 features, matching nn.Linear(in_features=64, ...)).
    x = jax.random.normal(kx, (2, 2, 128), jnp.float32)

    logits, feat = vgg2_forward(x, params)
    jax.block_until_ready((logits, feat))
    assert logits.shape == (2, 11) and logits.dtype == jnp.float32
    assert feat.shape == (2, 64) and feat.dtype == jnp.float32
    print("KERNEL_OK")
</pallas_src>

<mosaic_0001>
module attributes {stable_mosaic.version = 11 : i64} {
  func.func @vgg2_kernel(%arg0: i32, %arg1: memref<1x128x16xbf16, #tpu.memory_space<vmem>>, %arg2: memref<16x64xbf16, #tpu.memory_space<vmem>>, %arg3: memref<1x64xf32, #tpu.memory_space<vmem>>, %arg4: memref<512x64xbf16, #tpu.memory_space<vmem>>, %arg5: memref<1x64xf32, #tpu.memory_space<vmem>>, %arg6: memref<512x64xbf16, #tpu.memory_space<vmem>>, %arg7: memref<1x64xf32, #tpu.memory_space<vmem>>, %arg8: memref<512x64xbf16, #tpu.memory_space<vmem>>, %arg9: memref<1x64xf32, #tpu.memory_space<vmem>>, %arg10: memref<512x64xbf16, #tpu.memory_space<vmem>>, %arg11: memref<1x64xf32, #tpu.memory_space<vmem>>, %arg12: memref<512x64xbf16, #tpu.memory_space<vmem>>, %arg13: memref<1x64xf32, #tpu.memory_space<vmem>>, %arg14: memref<512x64xbf16, #tpu.memory_space<vmem>>, %arg15: memref<1x64xf32, #tpu.memory_space<vmem>>, %arg16: memref<64x32xbf16, #tpu.memory_space<vmem>>, %arg17: memref<1x32xf32, #tpu.memory_space<vmem>>, %arg18: memref<32x11xbf16, #tpu.memory_space<vmem>>, %arg19: memref<1x11xf32, #tpu.memory_space<vmem>>, %arg20: memref<1x1x128xf32, #tpu.memory_space<vmem>>, %arg21: memref<1x72x64xf32, #tpu.memory_space<vmem>>) attributes {dimension_semantics = [#tpu.dimension_semantics<parallel>], iteration_bounds = array<i64: 2>, scalar_prefetch = 0 : i64, scratch_operands = 1 : i64, tpu.core_type = #tpu.core_type<tc>, window_params = [{transform_indices = @transform_0, window_bounds = array<i64: 1, 128, 16>}, {pipeline_mode = #tpu.pipeline_mode<synchronous>, transform_indices = @transform_1, window_bounds = array<i64: 16, 64>}, {pipeline_mode = #tpu.pipeline_mode<synchronous>, transform_indices = @transform_2, window_bounds = array<i64: 1, 64>}, {pipeline_mode = #tpu.pipeline_mode<synchronous>, transform_indices = @transform_3, window_bounds = array<i64: 512, 64>}, {pipeline_mode = #tpu.pipeline_mode<synchronous>, transform_indices = @transform_4, window_bounds = array<i64: 1, 64>}, {pipeline_mode = #tpu.pipeline_mode<synchronous>, transform_indices = @transform_5, window_bounds = array<i64: 512, 64>}, {pipeline_mode = #tpu.pipeline_mode<synchronous>, transform_indices = @transform_6, window_bounds = array<i64: 1, 64>}, {pipeline_mode = #tpu.pipeline_mode<synchronous>, transform_indices = @transform_7, window_bounds = array<i64: 512, 64>}, {pipeline_mode = #tpu.pipeline_mode<synchronous>, transform_indices = @transform_8, window_bounds = array<i64: 1, 64>}, {pipeline_mode = #tpu.pipeline_mode<synchronous>, transform_indices = @transform_9, window_bounds = array<i64: 512, 64>}, {pipeline_mode = #tpu.pipeline_mode<synchronous>, transform_indices = @transform_10, window_bounds = array<i64: 1, 64>}, {pipeline_mode = #tpu.pipeline_mode<synchronous>, transform_indices = @transform_11, window_bounds = array<i64: 512, 64>}, {pipeline_mode = #tpu.pipeline_mode<synchronous>, transform_indices = @transform_12, window_bounds = array<i64: 1, 64>}, {pipeline_mode = #tpu.pipeline_mode<synchronous>, transform_indices = @transform_13, window_bounds = array<i64: 512, 64>}, {pipeline_mode = #tpu.pipeline_mode<synchronous>, transform_indices = @transform_14, window_bounds = array<i64: 1, 64>}, {pipeline_mode = #tpu.pipeline_mode<synchronous>, transform_indices = @transform_15, window_bounds = array<i64: 64, 32>}, {pipeline_mode = #tpu.pipeline_mode<synchronous>, transform_indices = @transform_16, window_bounds = array<i64: 1, 32>}, {pipeline_mode = #tpu.pipeline_mode<synchronous>, transform_indices = @transform_17, window_bounds = array<i64: 32, 11>}, {pipeline_mode = #tpu.pipeline_mode<synchronous>, transform_indices = @transform_18, window_bounds = array<i64: 1, 11>}, {transform_indices = @transform_19, window_bounds = array<i64: 1, 1, 128>}]} {
    %cst = arith.constant 0.000000e+00 : f32
    %0 = vector.broadcast %cst : f32 to vector<1x3x64xf32>
    %cst_0 = arith.constant 0.000000e+00 : f32
    %1 = vector.broadcast %cst_0 : f32 to vector<1x4x64xf32>
    %c0 = arith.constant 0 : index
    %c0_1 = arith.constant 0 : index
    %c0_2 = arith.constant 0 : index
    %2 = vector.load %arg21[%c0, %c0_1, %c0_2] : memref<1x72x64xf32, #tpu.memory_space<vmem>>, vector<1x3x64xf32>
    tpu.vector_store %arg21[%c0, %c0_1, %c0_2], %0 {strides = array<i32>} : memref<1x72x64xf32, #tpu.memory_space<vmem>>, vector<1x3x64xf32>,
    %c0_3 = arith.constant 0 : index
    %c0_4 = arith.constant 0 : index
    %c0_5 = arith.constant 0 : index
    %3 = vector.load %arg1[%c0_3, %c0_4, %c0_5] : memref<1x128x16xbf16, #tpu.memory_space<vmem>>, vector<1x128x16xbf16>
    %4 = vector.shape_cast %3 : vector<1x128x16xbf16> to vector<128x16xbf16>
    %c0_6 = arith.constant 0 : index
    %c0_7 = arith.constant 0 : index
    %5 = vector.load %arg2[%c0_6, %c0_7] : memref<16x64xbf16, #tpu.memory_space<vmem>>, vector<16x64xbf16>
    %cst_8 = arith.constant dense<0.000000e+00> : vector<128x64xf32>
    %6 = tpu.matmul %4, %5, %cst_8 {dimension_numbers = #tpu.dot_dimension_numbers<[1], [0], [0], [1], [0, 0, 1, 1], [], []>} : vector<128x16xbf16>, vector<16x64xbf16>, vector<128x64xf32> -> vector<128x64xf32>
    %c0_9 = arith.constant 0 : index
    %c0_10 = arith.constant 0 : index
    %7 = vector.load %arg3[%c0_9, %c0_10] : memref<1x64xf32, #tpu.memory_space<vmem>>, vector<1x64xf32>
    %8 = vector.broadcast %7 : vector<1x64xf32> to vector<128x64xf32>
    %9 = arith.addf %6, %8 : vector<128x64xf32>
    %cst_11 = arith.constant 0.000000e+00 : f32
    %10 = vector.broadcast %cst_11 : f32 to vector<128x64xf32>
    %11 = arith.maximumf %9, %10 : vector<128x64xf32>
    %12 = vector.shape_cast %11 : vector<128x64xf32> to vector<64x2x64xf32>
    %cst_12 = arith.constant dense<0xFF800000> : vector<64x64xf32>
    %13 = vector.multi_reduction <maximumf>, %12, %cst_12 [1] : vector<64x2x64xf32> to vector<64x64xf32>
    %14 = vector.shape_cast %13 : vector<64x64xf32> to vector<1x64x64xf32>
    %c0_13 = arith.constant 0 : index
    %c3 = arith.constant 3 : index
    %c0_14 = arith.constant 0 : index
    %15 = vector.load %arg21[%c0_13, %c3, %c0_14] : memref<1x72x64xf32, #tpu.memory_space<vmem>>, vector<1x64x64xf32>
    tpu.vector_store %arg21[%c0_13, %c3, %c0_14], %14 {strides = array<i32>} : memref<1x72x64xf32, #tpu.memory_space<vmem>>, vector<1x64x64xf32>,
    %c0_15 = arith.constant 0 : index
    %c67 = arith.constant 67 : index
    %c0_16 = arith.constant 0 : index
    %16 = vector.load %arg21[%c0_15, %c67, %c0_16] : memref<1x72x64xf32, #tpu.memory_space<vmem>>, vector<1x4x64xf32>
    tpu.vector_store %arg21[%c0_15, %c67, %c0_16], %1 {strides = array<i32>} : memref<1x72x64xf32, #tpu.memory_space<vmem>>, vector<1x4x64xf32>,
    %c0_17 = arith.constant 0 : index
    %c0_18 = arith.constant 0 : index
    %c0_19 = arith.constant 0 : index
    %17 = vector.load %arg21[%c0_17, %c0_18, %c0_19] : memref<1x72x64xf32, #tpu.memory_space<vmem>>, vector<1x71x64xf32>
    %18 = arith.truncf %17 : vector<1x71x64xf32> to vector<1x71x64xbf16>
    %19 = vector.extract_strided_slice %18 {offsets = [0, 0, 0], sizes = [1, 64, 64], strides = [1, 1, 1]} : vector<1x71x64xbf16> to vector<1x64x64xbf16>
    %20 = vector.extract_strided_slice %18 {offsets = [0, 1, 0], sizes = [1, 64, 64], strides = [1, 1, 1]} : vector<1x71x64xbf16> to vector<1x64x64xbf16>
    %21 = vector.extract_strided_slice %18 {offsets = [0, 2, 0], sizes = [1, 64, 64], strides = [1, 1, 1]} : vector<1x71x64xbf16> to vector<1x64x64xbf16>
    %22 = vector.extract_strided_slice %18 {offsets = [0, 3, 0], sizes = [1, 64, 64], strides = [1, 1, 1]} : vector<1x71x64xbf16> to vector<1x64x64xbf16>
    %23 = vector.extract_strided_slice %18 {offsets = [0, 4, 0], sizes = [1, 64, 64], strides = [1, 1, 1]} : vector<1x71x64xbf16> to vector<1x64x64xbf16>
    %24 = vector.extract_strided_slice %18 {offsets = [0, 5, 0], sizes = [1, 64, 64], strides = [1, 1, 1]} : vector<1x71x64xbf16> to vector<1x64x64xbf16>
    %25 = vector.extract_strided_slice %18 {offsets = [0, 6, 0], sizes = [1, 64, 64], strides = [1, 1, 1]} : vector<1x71x64xbf16> to vector<1x64x64xbf16>
    %26 = vector.extract_strided_slice %18 {offsets = [0, 7, 0], sizes = [1, 64, 64], strides = [1, 1, 1]} : vector<1x71x64xbf16> to vector<1x64x64xbf16>
    %27 = tpu.concatenate %19, %20, %21, %22, %23, %24, %25, %26 in 2 : vector<1x64x64xbf16>, vector<1x64x64xbf16>, vector<1x64x64xbf16>, vector<1x64x64xbf16>, vector<1x64x64xbf16>, vector<1x64x64xbf16>, vector<1x64x64xbf16>, vector<1x64x64xbf16> -> vector<1x64x512xbf16>
    %28 = vector.shape_cast %27 : vector<1x64x512xbf16> to vector<64x512xbf16>
    %c0_20 = arith.constant 0 : index
    %c0_21 = arith.constant 0 : index
    %29 = vector.load %arg4[%c0_20, %c0_21] : memref<512x64xbf16, #tpu.memory_space<vmem>>, vector<512x64xbf16>
    %cst_22 = arith.constant dense<0.000000e+00> : vector<64x64xf32>
    %30 = tpu.matmul %28, %29, %cst_22 {dimension_numbers = #tpu.dot_dimension_numbers<[1], [0], [0], [1], [0, 0, 1, 1], [], []>} : vector<64x512xbf16>, vector<512x64xbf16>, vector<64x64xf32> -> vector<64x64xf32>
    %c0_23 = arith.constant 0 : index
    %c0_24 = arith.constant 0 : index
    %31 = vector.load %arg5[%c0_23, %c0_24] : memref<1x64xf32, #tpu.memory_space<vmem>>, vector<1x64xf32>
    %32 = vector.broadcast %31 : vector<1x64xf32> to vector<64x64xf32>
    %33 = arith.addf %30, %32 : vector<64x64xf32>
    %cst_25 = arith.constant 0.000000e+00 : f32
    %34 = vector.broadcast %cst_25 : f32 to vector<64x64xf32>
    %35 = arith.maximumf %33, %34 : vector<64x64xf32>
    %36 = vector.shape_cast %35 : vector<64x64xf32> to vector<32x2x64xf32>
    %cst_26 = arith.constant dense<0xFF800000> : vector<32x64xf32>
    %37 = vector.multi_reduction <maximumf>, %36, %cst_26 [1] : vector<32x2x64xf32> to vector<32x64xf32>
    %38 = vector.shape_cast %37 : vector<32x64xf32> to vector<1x32x64xf32>
    %c0_27 = arith.constant 0 : index
    %c3_28 = arith.constant 3 : index
    %c0_29 = arith.constant 0 : index
    %39 = vector.load %arg21[%c0_27, %c3_28, %c0_29] : memref<1x72x64xf32, #tpu.memory_space<vmem>>, vector<1x32x64xf32>
    tpu.vector_store %arg21[%c0_27, %c3_28, %c0_29], %38 {strides = array<i32>} : memref<1x72x64xf32, #tpu.memory_space<vmem>>, vector<1x32x64xf32>,
    %c0_30 = arith.constant 0 : index
    %c35 = arith.constant 35 : index
    %c0_31 = arith.constant 0 : index
    %40 = vector.load %arg21[%c0_30, %c35, %c0_31] : memref<1x72x64xf32, #tpu.memory_space<vmem>>, vector<1x4x64xf32>
    tpu.vector_store %arg21[%c0_30, %c35, %c0_31], %1 {strides = array<i32>} : memref<1x72x64xf32, #tpu.memory_space<vmem>>, vector<1x4x64xf32>,
    %c0_32 = arith.constant 0 : index
    %c0_33 = arith.constant 0 : index
    %c0_34 = arith.constant 0 : index
    %41 = vector.load %arg21[%c0_32, %c0_33, %c0_34] : memref<1x72x64xf32, #tpu.memory_space<vmem>>, vector<1x39x64xf32>
    %42 = arith.truncf %41 : vector<1x39x64xf32> to vector<1x39x64xbf16>
    %43 = vector.extract_strided_slice %42 {offsets = [0, 0, 0], sizes = [1, 32, 64], strides = [1, 1, 1]} : vector<1x39x64xbf16> to vector<1x32x64xbf16>
    %44 = vector.extract_strided_slice %42 {offsets = [0, 1, 0], sizes = [1, 32, 64], strides = [1, 1, 1]} : vector<1x39x64xbf16> to vector<1x32x64xbf16>
    %45 = vector.extract_strided_slice %42 {offsets = [0, 2, 0], sizes = [1, 32, 64], strides = [1, 1, 1]} : vector<1x39x64xbf16> to vector<1x32x64xbf16>
    %46 = vector.extract_strided_slice %42 {offsets = [0, 3, 0], sizes = [1, 32, 64], strides = [1, 1, 1]} : vector<1x39x64xbf16> to vector<1x32x64xbf16>
    %47 = vector.extract_strided_slice %42 {offsets = [0, 4, 0], sizes = [1, 32, 64], strides = [1, 1, 1]} : vector<1x39x64xbf16> to vector<1x32x64xbf16>
    %48 = vector.extract_strided_slice %42 {offsets = [0, 5, 0], sizes = [1, 32, 64], strides = [1, 1, 1]} : vector<1x39x64xbf16> to vector<1x32x64xbf16>
    %49 = vector.extract_strided_slice %42 {offsets = [0, 6, 0], sizes = [1, 32, 64], strides = [1, 1, 1]} : vector<1x39x64xbf16> to vector<1x32x64xbf16>
    %50 = vector.extract_strided_slice %42 {offsets = [0, 7, 0], sizes = [1, 32, 64], strides = [1, 1, 1]} : vector<1x39x64xbf16> to vector<1x32x64xbf16>
    %51 = tpu.concatenate %43, %44, %45, %46, %47, %48, %49, %50 in 2 : vector<1x32x64xbf16>, vector<1x32x64xbf16>, vector<1x32x64xbf16>, vector<1x32x64xbf16>, vector<1x32x64xbf16>, vector<1x32x64xbf16>, vector<1x32x64xbf16>, vector<1x32x64xbf16> -> vector<1x32x512xbf16>
    %52 = vector.shape_cast %51 : vector<1x32x512xbf16> to vector<32x512xbf16>
    %c0_35 = arith.constant 0 : index
    %c0_36 = arith.constant 0 : index
    %53 = vector.load %arg6[%c0_35, %c0_36] : memref<512x64xbf16, #tpu.memory_space<vmem>>, vector<512x64xbf16>
    %cst_37 = arith.constant dense<0.000000e+00> : vector<32x64xf32>
    %54 = tpu.matmul %52, %53, %cst_37 {dimension_numbers = #tpu.dot_dimension_numbers<[1], [0], [0], [1], [0, 0, 1, 1], [], []>} : vector<32x512xbf16>, vector<512x64xbf16>, vector<32x64xf32> -> vector<32x64xf32>
    %c0_38 = arith.constant 0 : index
    %c0_39 = arith.constant 0 : index
    %55 = vector.load %arg7[%c0_38, %c0_39] : memref<1x64xf32, #tpu.memory_space<vmem>>, vector<1x64xf32>
    %56 = vector.broadcast %55 : vector<1x64xf32> to vector<32x64xf32>
    %57 = arith.addf %54, %56 : vector<32x64xf32>
    %cst_40 = arith.constant 0.000000e+00 : f32
    %58 = vector.broadcast %cst_40 : f32 to vector<32x64xf32>
    %59 = arith.maximumf %57, %58 : vector<32x64xf32>
    %60 = vector.shape_cast %59 : vector<32x64xf32> to vector<16x2x64xf32>
    %cst_41 = arith.constant dense<0xFF800000> : vector<16x64xf32>
    %61 = vector.multi_reduction <maximumf>, %60, %cst_41 [1] : vector<16x2x64xf32> to vector<16x64xf32>
    %62 = vector.shape_cast %61 : vector<16x64xf32> to vector<1x16x64xf32>
    %c0_42 = arith.constant 0 : index
    %c3_43 = arith.constant 3 : index
    %c0_44 = arith.constant 0 : index
    %63 = vector.load %arg21[%c0_42, %c3_43, %c0_44] : memref<1x72x64xf32, #tpu.memory_space<vmem>>, vector<1x16x64xf32>
    tpu.vector_store %arg21[%c0_42, %c3_43, %c0_44], %62 {strides = array<i32>} : memref<1x72x64xf32, #tpu.memory_space<vmem>>, vector<1x16x64xf32>,
    %c0_45 = arith.constant 0 : index
    %c19 = arith.constant 19 : index
    %c0_46 = arith.constant 0 : index
    %64 = vector.load %arg21[%c0_45, %c19, %c0_46] : memref<1x72x64xf32, #tpu.memory_space<vmem>>, vector<1x4x64xf32>
    tpu.vector_store %arg21[%c0_45, %c19, %c0_46], %1 {strides = array<i32>} : memref<1x72x64xf32, #tpu.memory_space<vmem>>, vector<1x4x64xf32>,
    %c0_47 = arith.constant 0 : index
    %c0_48 = arith.constant 0 : index
    %c0_49 = arith.constant 0 : index
    %65 = vector.load %arg21[%c0_47, %c0_48, %c0_49] : memref<1x72x64xf32, #tpu.memory_space<vmem>>, vector<1x23x64xf32>
    %66 = arith.truncf %65 : vector<1x23x64xf32> to vector<1x23x64xbf16>
    %67 = vector.extract_strided_slice %66 {offsets = [0, 0, 0], sizes = [1, 16, 64], strides = [1, 1, 1]} : vector<1x23x64xbf16> to vector<1x16x64xbf16>
    %68 = vector.extract_strided_slice %66 {offsets = [0, 1, 0], sizes = [1, 16, 64], strides = [1, 1, 1]} : vector<1x23x64xbf16> to vector<1x16x64xbf16>
    %69 = vector.extract_strided_slice %66 {offsets = [0, 2, 0], sizes = [1, 16, 64], strides = [1, 1, 1]} : vector<1x23x64xbf16> to vector<1x16x64xbf16>
    %70 = vector.extract_strided_slice %66 {offsets = [0, 3, 0], sizes = [1, 16, 64], strides = [1, 1, 1]} : vector<1x23x64xbf16> to vector<1x16x64xbf16>
    %71 = vector.extract_strided_slice %66 {offsets = [0, 4, 0], sizes = [1, 16, 64], strides = [1, 1, 1]} : vector<1x23x64xbf16> to vector<1x16x64xbf16>
    %72 = vector.extract_strided_slice %66 {offsets = [0, 5, 0], sizes = [1, 16, 64], strides = [1, 1, 1]} : vector<1x23x64xbf16> to vector<1x16x64xbf16>
    %73 = vector.extract_strided_slice %66 {offsets = [0, 6, 0], sizes = [1, 16, 64], strides = [1, 1, 1]} : vector<1x23x64xbf16> to vector<1x16x64xbf16>
    %74 = vector.extract_strided_slice %66 {offsets = [0, 7, 0], sizes = [1, 16, 64], strides = [1, 1, 1]} : vector<1x23x64xbf16> to vector<1x16x64xbf16>
    %75 = tpu.concatenate %67, %68, %69, %70, %71, %72, %73, %74 in 2 : vector<1x16x64xbf16>, vector<1x16x64xbf16>, vector<1x16x64xbf16>, vector<1x16x64xbf16>, vector<1x16x64xbf16>, vector<1x16x64xbf16>, vector<1x16x64xbf16>, vector<1x16x64xbf16> -> vector<1x16x512xbf16>
    %76 = vector.shape_cast %75 : vector<1x16x512xbf16> to vector<16x512xbf16>
    %c0_50 = arith.constant 0 : index
    %c0_51 = arith.constant 0 : index
    %77 = vector.load %arg8[%c0_50, %c0_51] : memref<512x64xbf16, #tpu.memory_space<vmem>>, vector<512x64xbf16>
    %cst_52 = arith.constant dense<0.000000e+00> : vector<16x64xf32>
    %78 = tpu.matmul %76, %77, %cst_52 {dimension_numbers = #tpu.dot_dimension_numbers<[1], [0], [0], [1], [0, 0, 1, 1], [], []>} : vector<16x512xbf16>, vector<512x64xbf16>, vector<16x64xf32> -> vector<16x64xf32>
    %c0_53 = arith.constant 0 : index
    %c0_54 = arith.constant 0 : index
    %79 = vector.load %arg9[%c0_53, %c0_54] : memref<1x64xf32, #tpu.memory_space<vmem>>, vector<1x64xf32>
    %80 = vector.broadcast %79 : vector<1x64xf32> to vector<16x64xf32>
    %81 = arith.addf %78, %80 : vector<16x64xf32>
    %cst_55 = arith.constant 0.000000e+00 : f32
    %82 = vector.broadcast %cst_55 : f32 to vector<16x64xf32>
    %83 = arith.maximumf %81, %82 : vector<16x64xf32>
    %84 = vector.shape_cast %83 : vector<16x64xf32> to vector<8x2x64xf32>
    %cst_56 = arith.constant dense<0xFF800000> : vector<8x64xf32>
    %85 = vector.multi_reduction <maximumf>, %84, %cst_56 [1] : vector<8x2x64xf32> to vector<8x64xf32>
    %86 = vector.shape_cast %85 : vector<8x64xf32> to vector<1x8x64xf32>
    %c0_57 = arith.constant 0 : index
    %c3_58 = arith.constant 3 : index
    %c0_59 = arith.constant 0 : index
    %87 = vector.load %arg21[%c0_57, %c3_58, %c0_59] : memref<1x72x64xf32, #tpu.memory_space<vmem>>, vector<1x8x64xf32>
    tpu.vector_store %arg21[%c0_57, %c3_58, %c0_59], %86 {strides = array<i32>} : memref<1x72x64xf32, #tpu.memory_space<vmem>>, vector<1x8x64xf32>,
    %c0_60 = arith.constant 0 : index
    %c11 = arith.constant 11 : index
    %c0_61 = arith.constant 0 : index
    %88 = vector.load %arg21[%c0_60, %c11, %c0_61] : memref<1x72x64xf32, #tpu.memory_space<vmem>>, vector<1x4x64xf32>
    tpu.vector_store %arg21[%c0_60, %c11, %c0_61], %1 {strides = array<i32>} : memref<1x72x64xf32, #tpu.memory_space<vmem>>, vector<1x4x64xf32>,
    %c0_62 = arith.constant 0 : index
    %c0_63 = arith.constant 0 : index
    %c0_64 = arith.constant 0 : index
    %89 = vector.load %arg21[%c0_62, %c0_63, %c0_64] : memref<1x72x64xf32, #tpu.memory_space<vmem>>, vector<1x15x64xf32>
    %90 = arith.truncf %89 : vector<1x15x64xf32> to vector<1x15x64xbf16>
    %91 = vector.extract_strided_slice %90 {offsets = [0, 0, 0], sizes = [1, 8, 64], strides = [1, 1, 1]} : vector<1x15x64xbf16> to vector<1x8x64xbf16>
    %92 = vector.extract_strided_slice %90 {offsets = [0, 1, 0], sizes = [1, 8, 64], strides = [1, 1, 1]} : vector<1x15x64xbf16> to vector<1x8x64xbf16>
    %93 = vector.extract_strided_slice %90 {offsets = [0, 2, 0], sizes = [1, 8, 64], strides = [1, 1, 1]} : vector<1x15x64xbf16> to vector<1x8x64xbf16>
    %94 = vector.extract_strided_slice %90 {offsets = [0, 3, 0], sizes = [1, 8, 64], strides = [1, 1, 1]} : vector<1x15x64xbf16> to vector<1x8x64xbf16>
    %95 = vector.extract_strided_slice %90 {offsets = [0, 4, 0], sizes = [1, 8, 64], strides = [1, 1, 1]} : vector<1x15x64xbf16> to vector<1x8x64xbf16>
    %96 = vector.extract_strided_slice %90 {offsets = [0, 5, 0], sizes = [1, 8, 64], strides = [1, 1, 1]} : vector<1x15x64xbf16> to vector<1x8x64xbf16>
    %97 = vector.extract_strided_slice %90 {offsets = [0, 6, 0], sizes = [1, 8, 64], strides = [1, 1, 1]} : vector<1x15x64xbf16> to vector<1x8x64xbf16>
    %98 = vector.extract_strided_slice %90 {offsets = [0, 7, 0], sizes = [1, 8, 64], strides = [1, 1, 1]} : vector<1x15x64xbf16> to vector<1x8x64xbf16>
    %99 = tpu.concatenate %91, %92, %93, %94, %95, %96, %97, %98 in 2 : vector<1x8x64xbf16>, vector<1x8x64xbf16>, vector<1x8x64xbf16>, vector<1x8x64xbf16>, vector<1x8x64xbf16>, vector<1x8x64xbf16>, vector<1x8x64xbf16>, vector<1x8x64xbf16> -> vector<1x8x512xbf16>
    %100 = vector.shape_cast %99 : vector<1x8x512xbf16> to vector<8x512xbf16>
    %c0_65 = arith.constant 0 : index
    %c0_66 = arith.constant 0 : index
    %101 = vector.load %arg10[%c0_65, %c0_66] : memref<512x64xbf16, #tpu.memory_space<vmem>>, vector<512x64xbf16>
    %cst_67 = arith.constant dense<0.000000e+00> : vector<8x64xf32>
    %102 = tpu.matmul %100, %101, %cst_67 {dimension_numbers = #tpu.dot_dimension_numbers<[1], [0], [0], [1], [0, 0, 1, 1], [], []>} : vector<8x512xbf16>, vector<512x64xbf16>, vector<8x64xf32> -> vector<8x64xf32>
    %c0_68 = arith.constant 0 : index
    %c0_69 = arith.constant 0 : index
    %103 = vector.load %arg11[%c0_68, %c0_69] : memref<1x64xf32, #tpu.memory_space<vmem>>, vector<1x64xf32>
    %104 = vector.broadcast %103 : vector<1x64xf32> to vector<8x64xf32>
    %105 = arith.addf %102, %104 : vector<8x64xf32>
    %cst_70 = arith.constant 0.000000e+00 : f32
    %106 = vector.broadcast %cst_70 : f32 to vector<8x64xf32>
    %107 = arith.maximumf %105, %106 : vector<8x64xf32>
    %108 = vector.shape_cast %107 : vector<8x64xf32> to vector<4x2x64xf32>
    %cst_71 = arith.constant dense<0xFF800000> : vector<4x64xf32>
    %109 = vector.multi_reduction <maximumf>, %108, %cst_71 [1] : vector<4x2x64xf32> to vector<4x64xf32>
    %110 = vector.shape_cast %109 : vector<4x64xf32> to vector<1x4x64xf32>
    %c0_72 = arith.constant 0 : index
    %c3_73 = arith.constant 3 : index
    %c0_74 = arith.constant 0 : index
    %111 = vector.load %arg21[%c0_72, %c3_73, %c0_74] : memref<1x72x64xf32, #tpu.memory_space<vmem>>, vector<1x4x64xf32>
    tpu.vector_store %arg21[%c0_72, %c3_73, %c0_74], %110 {strides = array<i32>} : memref<1x72x64xf32, #tpu.memory_space<vmem>>, vector<1x4x64xf32>,
    %c0_75 = arith.constant 0 : index
    %c7 = arith.constant 7 : index
    %c0_76 = arith.constant 0 : index
    %112 = vector.load %arg21[%c0_75, %c7, %c0_76] : memref<1x72x64xf32, #tpu.memory_space<vmem>>, vector<1x4x64xf32>
    tpu.vector_store %arg21[%c0_75, %c7, %c0_76], %1 {strides = array<i32>} : memref<1x72x64xf32, #tpu.memory_space<vmem>>, vector<1x4x64xf32>,
    %c0_77 = arith.constant 0 : index
    %c0_78 = arith.constant 0 : index
    %c0_79 = arith.constant 0 : index
    %113 = vector.load %arg21[%c0_77, %c0_78, %c0_79] : memref<1x72x64xf32, #tpu.memory_space<vmem>>, vector<1x11x64xf32>
    %114 = arith.truncf %113 : vector<1x11x64xf32> to vector<1x11x64xbf16>
    %115 = vector.extract_strided_slice %114 {offsets = [0, 0, 0], sizes = [1, 4, 64], strides = [1, 1, 1]} : vector<1x11x64xbf16> to vector<1x4x64xbf16>
    %116 = vector.extract_strided_slice %114 {offsets = [0, 1, 0], sizes = [1, 4, 64], strides = [1, 1, 1]} : vector<1x11x64xbf16> to vector<1x4x64xbf16>
    %117 = vector.extract_strided_slice %114 {offsets = [0, 2, 0], sizes = [1, 4, 64], strides = [1, 1, 1]} : vector<1x11x64xbf16> to vector<1x4x64xbf16>
    %118 = vector.extract_strided_slice %114 {offsets = [0, 3, 0], sizes = [1, 4, 64], strides = [1, 1, 1]} : vector<1x11x64xbf16> to vector<1x4x64xbf16>
    %119 = vector.extract_strided_slice %114 {offsets = [0, 4, 0], sizes = [1, 4, 64], strides = [1, 1, 1]} : vector<1x11x64xbf16> to vector<1x4x64xbf16>
    %120 = vector.extract_strided_slice %114 {offsets = [0, 5, 0], sizes = [1, 4, 64], strides = [1, 1, 1]} : vector<1x11x64xbf16> to vector<1x4x64xbf16>
    %121 = vector.extract_strided_slice %114 {offsets = [0, 6, 0], sizes = [1, 4, 64], strides = [1, 1, 1]} : vector<1x11x64xbf16> to vector<1x4x64xbf16>
    %122 = vector.extract_strided_slice %114 {offsets = [0, 7, 0], sizes = [1, 4, 64], strides = [1, 1, 1]} : vector<1x11x64xbf16> to vector<1x4x64xbf16>
    %123 = tpu.concatenate %115, %116, %117, %118, %119, %120, %121, %122 in 2 : vector<1x4x64xbf16>, vector<1x4x64xbf16>, vector<1x4x64xbf16>, vector<1x4x64xbf16>, vector<1x4x64xbf16>, vector<1x4x64xbf16>, vector<1x4x64xbf16>, vector<1x4x64xbf16> -> vector<1x4x512xbf16>
    %124 = vector.shape_cast %123 : vector<1x4x512xbf16> to vector<4x512xbf16>
    %c0_80 = arith.constant 0 : index
    %c0_81 = arith.constant 0 : index
    %125 = vector.load %arg12[%c0_80, %c0_81] : memref<512x64xbf16, #tpu.memory_space<vmem>>, vector<512x64xbf16>
    %cst_82 = arith.constant dense<0.000000e+00> : vector<4x64xf32>
    %126 = tpu.matmul %124, %125, %cst_82 {dimension_numbers = #tpu.dot_dimension_numbers<[1], [0], [0], [1], [0, 0, 1, 1], [], []>} : vector<4x512xbf16>, vector<512x64xbf16>, vector<4x64xf32> -> vector<4x64xf32>
    %c0_83 = arith.constant 0 : index
    %c0_84 = arith.constant 0 : index
    %127 = vector.load %arg13[%c0_83, %c0_84] : memref<1x64xf32, #tpu.memory_space<vmem>>, vector<1x64xf32>
    %128 = vector.broadcast %127 : vector<1x64xf32> to vector<4x64xf32>
    %129 = arith.addf %126, %128 : vector<4x64xf32>
    %cst_85 = arith.constant 0.000000e+00 : f32
    %130 = vector.broadcast %cst_85 : f32 to vector<4x64xf32>
    %131 = arith.maximumf %129, %130 : vector<4x64xf32>
    %132 = vector.shape_cast %131 : vector<4x64xf32> to vector<2x2x64xf32>
    %cst_86 = arith.constant dense<0xFF800000> : vector<2x64xf32>
    %133 = vector.multi_reduction <maximumf>, %132, %cst_86 [1] : vector<2x2x64xf32> to vector<2x64xf32>
    %134 = vector.shape_cast %133 : vector<2x64xf32> to vector<1x2x64xf32>
    %c0_87 = arith.constant 0 : index
    %c3_88 = arith.constant 3 : index
    %c0_89 = arith.constant 0 : index
    %135 = vector.load %arg21[%c0_87, %c3_88, %c0_89] : memref<1x72x64xf32, #tpu.memory_space<vmem>>, vector<1x2x64xf32>
    tpu.vector_store %arg21[%c0_87, %c3_88, %c0_89], %134 {strides = array<i32>} : memref<1x72x64xf32, #tpu.memory_space<vmem>>, vector<1x2x64xf32>,
    %c0_90 = arith.constant 0 : index
    %c5 = arith.constant 5 : index
    %c0_91 = arith.constant 0 : index
    %136 = vector.load %arg21[%c0_90, %c5, %c0_91] : memref<1x72x64xf32, #tpu.memory_space<vmem>>, vector<1x4x64xf32>
    tpu.vector_store %arg21[%c0_90, %c5, %c0_91], %1 {strides = array<i32>} : memref<1x72x64xf32, #tpu.memory_space<vmem>>, vector<1x4x64xf32>,
    %c0_92 = arith.constant 0 : index
    %c0_93 = arith.constant 0 : index
    %c0_94 = arith.constant 0 : index
    %137 = vector.load %arg21[%c0_92, %c0_93, %c0_94] : memref<1x72x64xf32, #tpu.memory_space<vmem>>, vector<1x9x64xf32>
    %138 = arith.truncf %137 : vector<1x9x64xf32> to vector<1x9x64xbf16>
    %139 = vector.extract_strided_slice %138 {offsets = [0, 0, 0], sizes = [1, 2, 64], strides = [1, 1, 1]} : vector<1x9x64xbf16> to vector<1x2x64xbf16>
    %140 = vector.extract_strided_slice %138 {offsets = [0, 1, 0], sizes = [1, 2, 64], strides = [1, 1, 1]} : vector<1x9x64xbf16> to vector<1x2x64xbf16>
    %141 = vector.extract_strided_slice %138 {offsets = [0, 2, 0], sizes = [1, 2, 64], strides = [1, 1, 1]} : vector<1x9x64xbf16> to vector<1x2x64xbf16>
    %142 = vector.extract_strided_slice %138 {offsets = [0, 3, 0], sizes = [1, 2, 64], strides = [1, 1, 1]} : vector<1x9x64xbf16> to vector<1x2x64xbf16>
    %143 = vector.extract_strided_slice %138 {offsets = [0, 4, 0], sizes = [1, 2, 64], strides = [1, 1, 1]} : vector<1x9x64xbf16> to vector<1x2x64xbf16>
    %144 = vector.extract_strided_slice %138 {offsets = [0, 5, 0], sizes = [1, 2, 64], strides = [1, 1, 1]} : vector<1x9x64xbf16> to vector<1x2x64xbf16>
    %145 = vector.extract_strided_slice %138 {offsets = [0, 6, 0], sizes = [1, 2, 64], strides = [1, 1, 1]} : vector<1x9x64xbf16> to vector<1x2x64xbf16>
    %146 = vector.extract_strided_slice %138 {offsets = [0, 7, 0], sizes = [1, 2, 64], strides = [1, 1, 1]} : vector<1x9x64xbf16> to vector<1x2x64xbf16>
    %147 = tpu.concatenate %139, %140, %141, %142, %143, %144, %145, %146 in 2 : vector<1x2x64xbf16>, vector<1x2x64xbf16>, vector<1x2x64xbf16>, vector<1x2x64xbf16>, vector<1x2x64xbf16>, vector<1x2x64xbf16>, vector<1x2x64xbf16>, vector<1x2x64xbf16> -> vector<1x2x512xbf16>
    %148 = vector.shape_cast %147 : vector<1x2x512xbf16> to vector<2x512xbf16>
    %c0_95 = arith.constant 0 : index
    %c0_96 = arith.constant 0 : index
    %149 = vector.load %arg14[%c0_95, %c0_96] : memref<512x64xbf16, #tpu.memory_space<vmem>>, vector<512x64xbf16>
    %cst_97 = arith.constant dense<0.000000e+00> : vector<2x64xf32>
    %150 = tpu.matmul %148, %149, %cst_97 {dimension_numbers = #tpu.dot_dimension_numbers<[1], [0], [0], [1], [0, 0, 1, 1], [], []>} : vector<2x512xbf16>, vector<512x64xbf16>, vector<2x64xf32> -> vector<2x64xf32>
    %c0_98 = arith.constant 0 : index
    %c0_99 = arith.constant 0 : index
    %151 = vector.load %arg15[%c0_98, %c0_99] : memref<1x64xf32, #tpu.memory_space<vmem>>, vector<1x64xf32>
    %152 = vector.broadcast %151 : vector<1x64xf32> to vector<2x64xf32>
    %153 = arith.addf %150, %152 : vector<2x64xf32>
    %cst_100 = arith.constant 0.000000e+00 : f32
    %154 = vector.broadcast %cst_100 : f32 to vector<2x64xf32>
    %155 = arith.maximumf %153, %154 : vector<2x64xf32>
    %156 = vector.shape_cast %155 : vector<2x64xf32> to vector<1x2x64xf32>
    %cst_101 = arith.constant dense<0xFF800000> : vector<1x64xf32>
    %157 = vector.multi_reduction <maximumf>, %156, %cst_101 [1] : vector<1x2x64xf32> to vector<1x64xf32>
    %158 = arith.truncf %157 : vector<1x64xf32> to vector<1x64xbf16>
    %c0_102 = arith.constant 0 : index
    %c0_103 = arith.constant 0 : index
    %159 = vector.load %arg16[%c0_102, %c0_103] : memref<64x32xbf16, #tpu.memory_space<vmem>>, vector<64x32xbf16>
    %cst_104 = arith.constant dense<0.000000e+00> : vector<1x32xf32>
    %160 = tpu.matmul %158, %159, %cst_104 {dimension_numbers = #tpu.dot_dimension_numbers<[1], [0], [0], [1], [0, 0, 1, 1], [], []>} : vector<1x64xbf16>, vector<64x32xbf16>, vector<1x32xf32> -> vector<1x32xf32>
    %c0_105 = arith.constant 0 : index
    %c0_106 = arith.constant 0 : index
    %161 = vector.load %arg17[%c0_105, %c0_106] : memref<1x32xf32, #tpu.memory_space<vmem>>, vector<1x32xf32>
    %162 = arith.addf %160, %161 : vector<1x32xf32>
    %cst_107 = arith.constant 0.000000e+00 : f32
    %163 = vector.broadcast %cst_107 : f32 to vector<1x32xf32>
    %164 = arith.cmpf ogt, %162, %163 : vector<1x32xf32>
    %165 = math.exp %162 : vector<1x32xf32>
    %cst_108 = arith.constant 1.000000e+00 : f32
    %166 = vector.broadcast %cst_108 : f32 to vector<1x32xf32>
    %167 = arith.subf %165, %166 : vector<1x32xf32>
    %cst_109 = arith.constant 1.67326319 : f32
    %168 = vector.broadcast %cst_109 : f32 to vector<1x32xf32>
    %169 = arith.mulf %168, %167 : vector<1x32xf32>
    %170 = arith.select %164, %162, %169 : vector<1x32xi1>, vector<1x32xf32>
    %cst_110 = arith.constant 1.05070102 : f32
    %171 = vector.broadcast %cst_110 : f32 to vector<1x32xf32>
    %172 = arith.mulf %171, %170 : vector<1x32xf32>
    %173 = arith.truncf %172 : vector<1x32xf32> to vector<1x32xbf16>
    %c0_111 = arith.constant 0 : index
    %c0_112 = arith.constant 0 : index
    %174 = vector.load %arg18[%c0_111, %c0_112] : memref<32x11xbf16, #tpu.memory_space<vmem>>, vector<32x11xbf16>
    %cst_113 = arith.constant dense<0.000000e+00> : vector<1x11xf32>
    %175 = tpu.matmul %173, %174, %cst_113 {dimension_numbers = #tpu.dot_dimension_numbers<[1], [0], [0], [1], [0, 0, 1, 1], [], []>} : vector<1x32xbf16>, vector<32x11xbf16>, vector<1x11xf32> -> vector<1x11xf32>
    %c0_114 = arith.constant 0 : index
    %c0_115 = arith.constant 0 : index
    %176 = vector.load %arg19[%c0_114, %c0_115] : memref<1x11xf32, #tpu.memory_space<vmem>>, vector<1x11xf32>
    %177 = arith.addf %175, %176 : vector<1x11xf32>
    %cst_116 = arith.constant 0.000000e+00 : f32
    %178 = vector.broadcast %cst_116 : f32 to vector<1x53xf32>
    %179 = tpu.concatenate %157, %177, %178 in 1 : vector<1x64xf32>, vector<1x11xf32>, vector<1x53xf32> -> vector<1x128xf32>
    %180 = vector.shape_cast %179 : vector<1x128xf32> to vector<1x1x128xf32>
    %c0_117 = arith.constant 0 : index
    %c0_118 = arith.constant 0 : index
    %c0_119 = arith.constant 0 : index
    %181 = vector.load %arg20[%c0_117, %c0_118, %c0_119] : memref<1x1x128xf32, #tpu.memory_space<vmem>>, vector<1x1x128xf32>
    tpu.vector_store %arg20[%c0_117, %c0_118, %c0_119], %180 {strides = array<i32>} : memref<1x1x128xf32, #tpu.memory_space<vmem>>, vector<1x1x128xf32>,
    return
  }
  func.func @transform_0(%arg0: i32) -> (i32, i32, i32) {
    %c0_i32 = arith.constant 0 : i32
    %c0_i32_0 = arith.constant 0 : i32
    %c0_i32_1 = arith.constant 0 : i32
    return %arg0, %c0_i32, %c0_i32_0 : i32, i32, i32
  }
  func.func @transform_1(%arg0: i32) -> (i32, i32) {
    %c0_i32 = arith.constant 0 : i32
    %c0_i32_0 = arith.constant 0 : i32
    %c0_i32_1 = arith.constant 0 : i32
    return %c0_i32, %c0_i32_0 : i32, i32
  }
  func.func @transform_2(%arg0: i32) -> (i32, i32) {
    %c0_i32 = arith.constant 0 : i32
    %c0_i32_0 = arith.constant 0 : i32
    %c0_i32_1 = arith.constant 0 : i32
    return %c0_i32, %c0_i32_0 : i32, i32
  }
  func.func @transform_3(%arg0: i32) -> (i32, i32) {
    %c0_i32 = arith.constant 0 : i32
    %c0_i32_0 = arith.constant 0 : i32
    %c0_i32_1 = arith.constant 0 : i32
    return %c0_i32, %c0_i32_0 : i32, i32
  }
  func.func @transform_4(%arg0: i32) -> (i32, i32) {
    %c0_i32 = arith.constant 0 : i32
    %c0_i32_0 = arith.constant 0 : i32
    %c0_i32_1 = arith.constant 0 : i32
    return %c0_i32, %c0_i32_0 : i32, i32
  }
  func.func @transform_5(%arg0: i32) -> (i32, i32) {
    %c0_i32 = arith.constant 0 : i32
    %c0_i32_0 = arith.constant 0 : i32
    %c0_i32_1 = arith.constant 0 : i32
    return %c0_i32, %c0_i32_0 : i32, i32
  }
  func.func @transform_6(%arg0: i32) -> (i32, i32) {
    %c0_i32 = arith.constant 0 : i32
    %c0_i32_0 = arith.constant 0 : i32
    %c0_i32_1 = arith.constant 0 : i32
    return %c0_i32, %c0_i32_0 : i32, i32
  }
  func.func @transform_7(%arg0: i32) -> (i32, i32) {
    %c0_i32 = arith.constant 0 : i32
    %c0_i32_0 = arith.constant 0 : i32
    %c0_i32_1 = arith.constant 0 : i32
    return %c0_i32, %c0_i32_0 : i32, i32
  }
  func.func @transform_8(%arg0: i32) -> (i32, i32) {
    %c0_i32 = arith.constant 0 : i32
    %c0_i32_0 = arith.constant 0 : i32
    %c0_i32_1 = arith.constant 0 : i32
    return %c0_i32, %c0_i32_0 : i32, i32
  }
  func.func @transform_9(%arg0: i32) -> (i32, i32) {
    %c0_i32 = arith.constant 0 : i32
    %c0_i32_0 = arith.constant 0 : i32
    %c0_i32_1 = arith.constant 0 : i32
    return %c0_i32, %c0_i32_0 : i32, i32
  }
  func.func @transform_10(%arg0: i32) -> (i32, i32) {
    %c0_i32 = arith.constant 0 : i32
    %c0_i32_0 = arith.constant 0 : i32
    %c0_i32_1 = arith.constant 0 : i32
    return %c0_i32, %c0_i32_0 : i32, i32
  }
  func.func @transform_11(%arg0: i32) -> (i32, i32) {
    %c0_i32 = arith.constant 0 : i32
    %c0_i32_0 = arith.constant 0 : i32
    %c0_i32_1 = arith.constant 0 : i32
    return %c0_i32, %c0_i32_0 : i32, i32
  }
  func.func @transform_12(%arg0: i32) -> (i32, i32) {
    %c0_i32 = arith.constant 0 : i32
    %c0_i32_0 = arith.constant 0 : i32
    %c0_i32_1 = arith.constant 0 : i32
    return %c0_i32, %c0_i32_0 : i32, i32
  }
  func.func @transform_13(%arg0: i32) -> (i32, i32) {
    %c0_i32 = arith.constant 0 : i32
    %c0_i32_0 = arith.constant 0 : i32
    %c0_i32_1 = arith.constant 0 : i32
    return %c0_i32, %c0_i32_0 : i32, i32
  }
  func.func @transform_14(%arg0: i32) -> (i32, i32) {
    %c0_i32 = arith.constant 0 : i32
    %c0_i32_0 = arith.constant 0 : i32
    %c0_i32_1 = arith.constant 0 : i32
    return %c0_i32, %c0_i32_0 : i32, i32
  }
  func.func @transform_15(%arg0: i32) -> (i32, i32) {
    %c0_i32 = arith.constant 0 : i32
    %c0_i32_0 = arith.constant 0 : i32
    %c0_i32_1 = arith.constant 0 : i32
    return %c0_i32, %c0_i32_0 : i32, i32
  }
  func.func @transform_16(%arg0: i32) -> (i32, i32) {
    %c0_i32 = arith.constant 0 : i32
    %c0_i32_0 = arith.constant 0 : i32
    %c0_i32_1 = arith.constant 0 : i32
    return %c0_i32, %c0_i32_0 : i32, i32
  }
  func.func @transform_17(%arg0: i32) -> (i32, i32) {
    %c0_i32 = arith.constant 0 : i32
    %c0_i32_0 = arith.constant 0 : i32
    %c0_i32_1 = arith.constant 0 : i32
    return %c0_i32, %c0_i32_0 : i32, i32
  }
  func.func @transform_18(%arg0: i32) -> (i32, i32) {
    %c0_i32 = arith.constant 0 : i32
    %c0_i32_0 = arith.constant 0 : i32
    %c0_i32_1 = arith.constant 0 : i32
    return %c0_i32, %c0_i32_0 : i32, i32
  }
  func.func @transform_19(%arg0: i32) -> (i32, i32, i32) {
    %c0_i32 = arith.constant 0 : i32
    %c0_i32_0 = arith.constant 0 : i32
    %c0_i32_1 = arith.constant 0 : i32
    return %arg0, %c0_i32, %c0_i32_0 : i32, i32, i32
  }
}

</mosaic_0001>

<bundles_post_ra>
// kernel: _vgg2_forward_impl.1
= control target key start
LH: loop header
LB: loop body
LE: loop exit
PB: predicated region body
PF: predicated region fallthrough
CT: control target
= control target key end

     0   :  { %s7929_s0 = inlined_call_operand.vmem [shape: bf16[2,128,16], index: 0, kind: input, shape index: {}]   ;;  %s7930_s1 = inlined_call_operand.vmem [shape: bf16[16,64], index: 1, kind: input, shape index: {}]   ;;  %s7931_s2 = inlined_call_operand.vmem [shape: f32[1,64], index: 2, kind: input, shape index: {}]   ;;  %s7932_s3 = inlined_call_operand.vmem [shape: bf16[512,64], index: 3, kind: input, shape index: {}]   ;;  %s7933_s4 = inlined_call_operand.vmem [shape: f32[1,64], index: 4, kind: input, shape index: {}]   ;;  %s7934_s5 = inlined_call_operand.vmem [shape: bf16[512,64], index: 5, kind: input, shape index: {}]   ;;  %s7935_s6 = inlined_call_operand.vmem [shape: f32[1,64], index: 6, kind: input, shape index: {}]   ;;  %s7936_s7 = inlined_call_operand.vmem [shape: bf16[512,64], index: 7, kind: input, shape index: {}]   ;;  %s7937_s8 = inlined_call_operand.vmem [shape: f32[1,64], index: 8, kind: input, shape index: {}]   ;;  %s7938_s9 = inlined_call_operand.vmem [shape: bf16[512,64], index: 9, kind: input, shape index: {}]   ;;  %s7939_s10 = inlined_call_operand.vmem [shape: f32[1,64], index: 10, kind: input, shape index: {}]   ;;  %s7940_s11 = inlined_call_operand.vmem [shape: bf16[512,64], index: 11, kind: input, shape index: {}]   ;;  %s7941_s12 = inlined_call_operand.vmem [shape: f32[1,64], index: 12, kind: input, shape index: {}]   ;;  %s7942_s13 = inlined_call_operand.vmem [shape: bf16[512,64], index: 13, kind: input, shape index: {}]   ;;  %s7943_s14 = inlined_call_operand.vmem [shape: f32[1,64], index: 14, kind: input, shape index: {}]   ;;  %s7944_s15 = inlined_call_operand.vmem [shape: bf16[64,32], index: 15, kind: input, shape index: {}]   ;;  %s7945_s16 = inlined_call_operand.vmem [shape: f32[1,32], index: 16, kind: input, shape index: {}]   ;;  %s7946_s17 = inlined_call_operand.vmem [shape: bf16[32,11], index: 17, kind: input, shape index: {}]   ;;  %s7947_s18 = inlined_call_operand.vmem [shape: f32[1,11], index: 18, kind: input, shape index: {}]   ;;  %s7948_s19 = inlined_call_operand.vmem [shape: f32[2,1,128], index: 19, kind: output, shape index: {}]  }
   0x1   :  { %7955 = sst [smem:[#allocation3_spill]] %s7929_s0  ;;  %s6539_s0 = smov 0  }
   0x2   :  { %7956 = sst [smem:[#allocation4_spill]] %s7930_s1 }
   0x3   :  { %7957 = sst [smem:[#allocation5_spill]] %s7931_s2 }
   0x4   :  { %7958 = sst [smem:[#allocation6_spill]] %s7932_s3 }
   0x5   :  { %7959 = sst [smem:[#allocation7_spill]] %s7933_s4 }
   0x6 LB: > { %s5603_s30 = sadd.s32 4294967295, %s6433_s0   ;;  %p5607_p0 = scmp.ge.s32.totalorder %s6433_s0, 1  ;;  %s6433_s0 = sphi %s6539_s0, %s29_s0  }
   0x7   : > { %p537_p1 = scmp.lt.s32.totalorder %s6433_s0, 3 }
   0x9   : > { %p538_p2 = pnand %p5607_p0, %p537_p1 }
   0xa   : > { %s7960_s1 = sld [smem:[#allocation4_spill]] (!%p538_p2)  ;;  %p591_p3 = scmp.lt.s32.totalorder (!%p538_p2), %s5603_s30, 1  ;;  %vm673_vm0 = vcmask (!%p538_p2), 130048   ;;  %v6435_v9 = vmov (!%p538_p2), 1983009808   ;;  %v831_v11 = vlaneseq (!%p538_p2)  ;;  %vm7952_vm1 = vcmask (!%p538_p2), 519168  }
   0xb   : > { %541 = sbr.rel (%p538_p2) target bundleno = 3308 (0xcec), region = 96  ;;  %s7961_s24 = sld [smem:[#allocation3_spill]] (!%p538_p2)  ;;  %v829_v10 = vunpack.c.l.s4 (!%p538_p2), %v6435_v9  ;;  %v6436_v24 = vmov (!%p538_p2), 0.0   ;;  %vm1163_vm2 = vcmask (!%p538_p2), 517120   ;;  %vm1676_vm3 = vcmask (!%p538_p2), 1041409  }
   0xc   : > { %v832_v13 = vshrl.u32 (!%p538_p2), %v831_v11, 7  ;;  %s7962_s27 = sld [smem:[#allocation5_spill]] (!%p538_p2)  ;;  %1757 = vst.msk [vmem:[#allocation2 + $0x43] sm:$0xf] (!%p538_p2), %vm7952_vm1, %v6436_v24  ;;  %vm1678_vm4 = vcmask (!%p538_p2), 1042434   ;;  %vm1680_vm5 = vcmask (!%p538_p2), 1043459  }
   0xd   : > { %v830_v12 = vunpack.c.0.s8 (!%p538_p2), %v829_v10  ;;  %vm1682_vm6 = vcmask (!%p538_p2), 1044484   ;;  %vm1684_vm7 = vcmask (!%p538_p2), 1045509   ;;  %vm1686_vm8 = vcmask (!%p538_p2), 1046534   ;;  %s7963_s20 = sld [smem:[#allocation6_spill]] (!%p538_p2)  ;;  %s7953_s28 = smov (!%p538_p2), 64  }
   0xe   : > { %vm1688_vm9 = vcmask (!%p538_p2), 1047559   ;;  %vm1747_vm10 = vcmask (!%p538_p2), 523264   ;;  %vm600_vm11 = vcmask (!%p538_p2), 518144   ;;  %vm7951_vm12 = vsmask.f32 (!%p538_p2), 4352  ;;  %s7964_s4 = sld [smem:[#allocation7_spill]] (!%p538_p2) }
   0xf   : > { %v6570_v17 = vsub.s32 (!%p538_p2), %v830_v12, %v832_v13  ;;  %601 = vst.msk [vmem:[#allocation2] sm:$0x7] (!%p538_p2), %vm600_vm11, %v6436_v24  ;;  %vm1832_vm13 = vsmask.f32 (!%p538_p2), 6400  ;;  %vm1872_vm14 = vsmask.f32 (!%p538_p2), 5376 }
  0x10   : > { %v6217_v0 = vld [vmem:[%s7960_s1] sm:$0xff] (!%p538_p2)   ;;  %vm1772_vm15 = vsmask.f32 (!%p538_p2), 7424  ;;  %vm1900_vm11 = vcmask (!%p538_p2), 1044480  }
  0x11   : > { %6167 = vmatprep.subr.bf16.mxu0 (!%p538_p2), %v6217_v0 }
  0x12   : > { %s7973_s30 = smov (!%p591_p3, %s5603_s30), 1  ;;  %6168 = vmatpush3.bf16.msra.mxu0 %v6217_v0  ;;  %v6567_v14 = vld [vmem:[%s7962_s27] ss:$0 sm:$0xff] }
  0x13   : > { %s5837_s22 = sshll.u32 %s7973_s30, 6  ;;  %s598_s2 = scalar_lea.vmem %s7948_s19, %s7973_s30 }
  0x14   : > { %s595_s25 = scalar_lea.vmem %s7961_s24, %s5837_s22  ;;  %s7967_s24 = smov 64  }
  0x15   : > { %v6218_v1 = vld [vmem:[%s595_s25] sm:$0xff]   ;;  %v6219_v2 = vld [vmem:[%s595_s25 + $0x8] sm:$0xff]   ;;  %v6220_v3 = vld [vmem:[%s595_s25 + $0x10] sm:$0xff]  }
  0x16   : > { %6169 = vmatprep.mubr.msk.bf16.mxu0 %vm673_vm0, %v6218_v1  ;;  %v6221_v4 = vld [vmem:[%s595_s25 + $0x18] sm:$0xff]   ;;  %v6222_v5 = vld [vmem:[%s595_s25 + $0x20] sm:$0xff]   ;;  %v6223_v6 = vld [vmem:[%s595_s25 + $0x28] sm:$0xff]  }
  0x17   : > { %6170 = vmatmul.mubr.msk.bf16.vlgmr.msra.gmra.mrb[0].mxu0 %vm673_vm0, %v6219_v2  ;;  %v6224_v7 = vld [vmem:[%s595_s25 + $0x30] sm:$0xff]   ;;  %v6225_v8 = vld [vmem:[%s595_s25 + $0x38] sm:$0xff]  }
  0x18   : > { %6173 = vmatprep.mubr.msk.bf16.mxu0 %vm673_vm0, %v6220_v3 }
  0x1f   : > { %6174 = vmatmul.mubr.msk.bf16.gmra.mrb[4].mxu0 %vm673_vm0, %v6221_v4 }
  0x20   : > { %6177 = vmatprep.mubr.msk.bf16.mxu0 %vm673_vm0, %v6222_v5 }
  0x27   : > { %6178 = vmatmul.mubr.msk.bf16.gmra.mrb[8].mxu0 %vm673_vm0, %v6223_v6 }
  0x28   : > { %6181 = vmatprep.mubr.msk.bf16.mxu0 %vm673_vm0, %v6224_v7 }
  0x2f   : > { %6182 = vmatmul.mubr.msk.bf16.gmra.mrb[12].mxu0 %vm673_vm0, %v6225_v8  ;;  %vm1822_vm0 = vcmask 1046528  }
  0xea   : > { %v6171_v15 = vpop.f32.mrb[0].mxu0 }
  0xeb   : > { %v741_v16 = vadd.f32 %v6171_v15, %v6567_v14  ;;  %v732_v18 = vpop.f32.mrb[1].mxu0 }
  0xec   : > { %v733_v19 = vadd.f32 %v6567_v14, %v732_v18  ;;  %v6172_v20 = vpop.f32.mrb[2].mxu0 }
  0xed   : > { %v797_v21 = vmax.f32 %v741_v16, 0.0  ;;  %v744_v22 = vadd.f32 %v6172_v20, %v6567_v14  ;;  %v735_v23 = vpop.f32.mrb[3].mxu0 }
  0xee   : > { %v795_v25 = vmax.f32 %v733_v19, 0.0  ;;  %v736_v26 = vadd.f32 %v6567_v14, %v735_v23 }
  0xef   : > { %v861_v27 = vcombine.high %v797_v21, %v797_v21  ;;  %v868_v28 = vrot.slane %v797_v21, %v6570_v17  ;;  %v6578_v29 = vmax.f32 %v744_v22, 0.0 }
  0xf0   : > { %v827_v30 = vcombine.high %v795_v25, %v795_v25  ;;  %v834_v31 = vrot.slane %v795_v25, %v6570_v17  ;;  %v6581_v32 = vmax.f32 %v736_v26, 0.0 }
  0xf1   : > { %v875_v33 = vrot.slane %v861_v27, %v6570_v17  ;;  %v876_v34 = vcombine.high %v868_v28, %v868_v28  ;;  %v1220_v35 = vsel %vm1163_vm2, %v868_v28, -inf  ;;  %v878_v36 = vcombine.high %v6578_v29, %v6578_v29 }
  0xf2   : > { %v1221_v37 = vrot.slane %v1220_v35, 4  ;;  %v841_v38 = vrot.slane %v827_v30, %v6570_v17  ;;  %v842_v39 = vcombine.high %v834_v31, %v834_v31  ;;  %v1164_v40 = vsel %vm1163_vm2, %v834_v31, -inf  ;;  %v6589_v41 = vpop.f32.mrb[4].mxu0 }
  0xf3   : > { %v877_v42 = vcombine.high %v875_v33, %v875_v33  ;;  %v1227_v43 = vsel %vm1163_vm2, %v876_v34, -inf  ;;  %v1234_v44 = vsel %vm1163_vm2, %v875_v33, -inf  ;;  %v1165_v45 = vrot.slane %v1164_v40, 4  ;;  %v6593_v46 = vpop.f32.mrb[5].mxu0 }
  0xf4   : > { %v1222_v47 = vmax.f32 %v1220_v35, %v1221_v37  ;;  %v1228_v48 = vrot.slane %v1227_v43, 4  ;;  %v1235_v49 = vrot.slane %v1234_v44, 4  ;;  %v843_v50 = vcombine.high %v841_v38, %v841_v38  ;;  %v6595_v51 = vpop.f32.mrb[6].mxu0 }
  0xf5   : > { %v1241_v52 = vsel %vm1163_vm2, %v877_v42, -inf  ;;  %v1166_v53 = vmax.f32 %v1164_v40, %v1165_v45  ;;  %v1171_v54 = vsel %vm1163_vm2, %v842_v39, -inf  ;;  %v1178_v55 = vsel %vm1163_vm2, %v841_v38, -inf  ;;  %v6600_v56 = vpop.f32.mrb[7].mxu0 }
  0xf6   : > { %v1223_v57 = vrot.slane %v1222_v47, 2  ;;  %v1229_v58 = vmax.f32 %v1227_v43, %v1228_v48  ;;  %v1236_v59 = vmax.f32 %v1234_v44, %v1235_v49  ;;  %v1242_v60 = vrot.slane %v1241_v52, 4 }
  0xf7   : > { %v1167_v61 = vrot.slane %v1166_v53, 2  ;;  %v1172_v62 = vrot.slane %v1171_v54, 4  ;;  %v1179_v63 = vrot.slane %v1178_v55, 4  ;;  %v1185_v0 = vsel %vm1163_vm2, %v843_v50, -inf }
  0xf8   : > { %v1224_v1 = vmax.f32 %v1222_v47, %v1223_v57  ;;  %v1230_v2 = vrot.slane %v1229_v58, 2  ;;  %v1237_v3 = vrot.slane %v1236_v59, 2  ;;  %v1243_v4 = vmax.f32 %v1241_v52, %v1242_v60 }
  0xf9   : > { %v1168_v5 = vmax.f32 %v1166_v53, %v1167_v61  ;;  %v1173_v6 = vmax.f32 %v1171_v54, %v1172_v62  ;;  %v1180_v7 = vmax.f32 %v1178_v55, %v1179_v63  ;;  %v1186_v8 = vrot.slane %v1185_v0, 4 }
  0xfa   : > { %v1225_v9 = vrot.slane %v1224_v1, 1  ;;  %v1231_v10 = vmax.f32 %v1229_v58, %v1230_v2  ;;  %v1238_v11 = vmax.f32 %v1236_v59, %v1237_v3  ;;  %v1244_v12 = vrot.slane %v1243_v4, 2  ;;  %v6603_v13 = vpop.f32.mrb[8].mxu0 }
  0xfb   : > { %v1169_v15 = vrot.slane %v1168_v5, 1  ;;  %v1174_v16 = vrot.slane %v1173_v6, 2  ;;  %v1181_v18 = vrot.slane %v1180_v7, 2  ;;  %v1187_v19 = vmax.f32 %v1185_v0, %v1186_v8  ;;  %v6605_v20 = vpop.f32.mrb[9].mxu0 }
  0xfc   : > { %v1226_v21 = vmax.f32 %v1224_v1, %v1225_v9  ;;  %v1232_v22 = vrot.slane %v1231_v10, 1  ;;  %v1239_v23 = vrot.slane %v1238_v11, 1  ;;  %v1245_v25 = vmax.f32 %v1243_v4, %v1244_v12  ;;  %v6607_v26 = vpop.f32.mrb[10].mxu0 }
  0xfd   : > { %v1170_v27 = vmax.f32 %v1168_v5, %v1169_v15  ;;  %v1175_v28 = vmax.f32 %v1173_v6, %v1174_v16  ;;  %v1182_v30 = vmax.f32 %v1180_v7, %v1181_v18  ;;  %v1188_v31 = vrot.slane %v1187_v19, 2  ;;  %v6609_v33 = vpop.f32.mrb[11].mxu0 }
  0xfe   : > { %v1233_v34 = vmax.f32 %v1231_v10, %v1232_v22  ;;  %v1240_v35 = vmax.f32 %v1238_v11, %v1239_v23  ;;  %v1246_v37 = vrot.slane %v1245_v25, 1  ;;  %v885_v38 = vrot.slane %v6578_v29, %v6570_v17 }
  0xff   : > { %v1176_v39 = vrot.slane %v1175_v28, 1  ;;  %v1183_v40 = vrot.slane %v1182_v30, 1  ;;  %v1189_v42 = vmax.f32 %v1187_v19, %v1188_v31  ;;  %v892_v43 = vrot.slane %v878_v36, %v6570_v17 }
 0x100   : > { %v1247_v44 = vmax.f32 %v1245_v25, %v1246_v37  ;;  %v1690_v45 = vsel %vm1676_vm3, %v1233_v34, %v1226_v21  ;;  %v893_v47 = vcombine.high %v885_v38, %v885_v38  ;;  %v1248_v48 = vsel %vm1163_vm2, %v885_v38, -inf }
 0x101   : > { %v1691_v49 = vsel %vm1678_vm4, %v1240_v35, %v1690_v45  ;;  %v1177_v50 = vmax.f32 %v1175_v28, %v1176_v39  ;;  %v1184_v52 = vmax.f32 %v1182_v30, %v1183_v40  ;;  %v1190_v53 = vrot.slane %v1189_v42, 1 }
 0x102   : > { %v894_v54 = vcombine.high %v892_v43, %v892_v43  ;;  %v1249_v55 = vrot.slane %v1248_v48, 4  ;;  %v1255_v57 = vsel %vm1163_vm2, %v893_v47, -inf  ;;  %v1262_v58 = vsel %vm1163_vm2, %v892_v43, -inf  ;;  %v6622_v59 = vpop.f32.mrb[12].mxu0 }
 0x103   : > { %v1191_v29 = vmax.f32 %v1189_v42, %v1190_v53  ;;  %v1677_v36 = vsel %vm1676_vm3, %v1177_v50, %v1170_v27  ;;  %v1256_v60 = vrot.slane %v1255_v57, 4  ;;  %v1263_v61 = vrot.slane %v1262_v58, 4  ;;  %v6625_v62 = vpop.f32.mrb[13].mxu0 }
 0x104   : > { %v1679_v63 = vsel %vm1678_vm4, %v1184_v52, %v1677_v36  ;;  %v1250_v0 = vmax.f32 %v1248_v48, %v1249_v55  ;;  %v1269_v1 = vsel %vm1163_vm2, %v894_v54, -inf  ;;  %v1692_v2 = vsel %vm1680_vm5, %v1247_v44, %v1691_v49  ;;  %v6630_v3 = vpop.f32.mrb[14].mxu0 }
 0x105   : > { %v1257_v4 = vmax.f32 %v1255_v57, %v1256_v60  ;;  %v1264_v5 = vmax.f32 %v1262_v58, %v1263_v61  ;;  %v1270_v6 = vrot.slane %v1269_v1, 4  ;;  %v844_v7 = vcombine.high %v6581_v32, %v6581_v32  ;;  %v6634_v8 = vpop.f32.mrb[15].mxu0 }
 0x106   : > { %v1251_v9 = vrot.slane %v1250_v0, 2  ;;  %v851_v10 = vrot.slane %v6581_v32, %v6570_v17  ;;  %v6639_v11 = vsel %vm1680_vm5, %v1191_v29, %v1679_v63  ;;  %v757_v12 = vadd.f32 %v6589_v41, %v6567_v14 }
 0x107   : > { %v1258_v15 = vrot.slane %v1257_v4, 2  ;;  %v1265_v16 = vrot.slane %v1264_v5, 2  ;;  %v1271_v18 = vmax.f32 %v1269_v1, %v1270_v6  ;;  %v858_v19 = vrot.slane %v844_v7, %v6570_v17 }
 0x108   : > { %v1252_v21 = vmax.f32 %v1250_v0, %v1251_v9  ;;  %v859_v22 = vcombine.high %v851_v10, %v851_v10  ;;  %v1192_v23 = vsel %vm1163_vm2, %v851_v10, -inf  ;;  %v801_v25 = vmax.f32 %v757_v12, 0.0 }
 0x109   : > { %v1259_v27 = vmax.f32 %v1257_v4, %v1258_v15  ;;  %v1266_v28 = vmax.f32 %v1264_v5, %v1265_v16  ;;  %v1272_v32 = vrot.slane %v1271_v18, 2  ;;  %v860_v30 = vcombine.high %v858_v19, %v858_v19 }
 0x10a   : > { %v1253_v31 = vrot.slane %v1252_v21, 1  ;;  %v1193_v34 = vrot.slane %v1192_v23, 4  ;;  %v1199_v35 = vsel %vm1163_vm2, %v859_v22, -inf  ;;  %v1206_v41 = vsel %vm1163_vm2, %v858_v19, -inf }
 0x10b   : > { %v1260_v37 = vrot.slane %v1259_v27, 1  ;;  %v1267_v38 = vrot.slane %v1266_v28, 1  ;;  %v1273_v39 = vmax.f32 %v1271_v18, %v1272_v32  ;;  %v1200_v40 = vrot.slane %v1199_v35, 4 }
 0x10c   : > { %v1254_v42 = vmax.f32 %v1252_v21, %v1253_v31  ;;  %v1194_v43 = vmax.f32 %v1192_v23, %v1193_v34  ;;  %v1207_v44 = vrot.slane %v1206_v41, 4  ;;  %v1213_v45 = vsel %vm1163_vm2, %v860_v30, -inf }
 0x10d   : > { %v1261_v47 = vmax.f32 %v1259_v27, %v1260_v37  ;;  %v1268_v48 = vmax.f32 %v1266_v28, %v1267_v38  ;;  %v1274_v49 = vrot.slane %v1273_v39, 1  ;;  %v1201_v50 = vmax.f32 %v1199_v35, %v1200_v40 }
 0x10e   : > { %v1693_v52 = vsel %vm1682_vm6, %v1254_v42, %v1692_v2  ;;  %v1195_v53 = vrot.slane %v1194_v43, 2  ;;  %v1208_v54 = vmax.f32 %v1206_v41, %v1207_v44  ;;  %v1214_v55 = vrot.slane %v1213_v45, 4 }
 0x10f   : > { %v1275_v57 = vmax.f32 %v1273_v39, %v1274_v49  ;;  %v1694_v58 = vsel %vm1684_vm7, %v1261_v47, %v1693_v52  ;;  %v1202_v29 = vrot.slane %v1201_v50, 2  ;;  %v929_v36 = vcombine.high %v801_v25, %v801_v25 }
 0x110   : > { %v1695_v60 = vsel %vm1686_vm8, %v1268_v48, %v1694_v58  ;;  %v1196_v61 = vmax.f32 %v1194_v43, %v1195_v53  ;;  %v1209_v63 = vrot.slane %v1208_v54, 2  ;;  %v1215_v0 = vmax.f32 %v1213_v45, %v1214_v55 }
 0x111   : > { %v1696_v1 = vsel %vm1688_vm9, %v1275_v57, %v1695_v60  ;;  %v1203_v4 = vmax.f32 %v1201_v50, %v1202_v29  ;;  %v936_v5 = vrot.slane %v801_v25, %v6570_v17  ;;  %v943_v2 = vrot.slane %v929_v36, %v6570_v17 }
 0x112   : > { %1749 = vst.msk [vmem:[#allocation2 + $0xb] sm:$0xff] %vm1747_vm10, %v1696_v1  ;;  %v1197_v6 = vrot.slane %v1196_v61, 1  ;;  %v1210_v7 = vmax.f32 %v1208_v54, %v1209_v63  ;;  %v1216_v9 = vrot.slane %v1215_v0, 2  ;;  %v749_v10 = vadd.f32 %v6567_v14, %v6593_v46 }
 0x113   : > { %v1204_v12 = vrot.slane %v1203_v4, 1  ;;  %v944_v15 = vcombine.high %v936_v5, %v936_v5  ;;  %v945_v16 = vcombine.high %v943_v2, %v943_v2  ;;  %v1332_v18 = vsel %vm1163_vm2, %v936_v5, -inf }
 0x114   : > { %v1198_v19 = vmax.f32 %v1196_v61, %v1197_v6  ;;  %v1211_v21 = vrot.slane %v1210_v7, 1  ;;  %v1217_v22 = vmax.f32 %v1215_v0, %v1216_v9  ;;  %v1333_v23 = vrot.slane %v1332_v18, 4 }
 0x115   : > { %v1205_v25 = vmax.f32 %v1203_v4, %v1204_v12  ;;  %v1339_v27 = vsel %vm1163_vm2, %v944_v15, -inf  ;;  %v1346_v28 = vsel %vm1163_vm2, %v943_v2, -inf  ;;  %v1353_v32 = vsel %vm1163_vm2, %v945_v16, -inf }
 0x116   : > { %v1212_v30 = vmax.f32 %v1210_v7, %v1211_v21  ;;  %v1218_v31 = vrot.slane %v1217_v22, 1  ;;  %v1683_v46 = vsel %vm1682_vm6, %v1198_v19, %v6639_v11  ;;  %v1334_v34 = vmax.f32 %v1332_v18, %v1333_v23 }
 0x117   : > { %v1685_v35 = vsel %vm1684_vm7, %v1205_v25, %v1683_v46  ;;  %v1340_v41 = vrot.slane %v1339_v27, 4  ;;  %v1347_v37 = vrot.slane %v1346_v28, 4  ;;  %v1354_v38 = vrot.slane %v1353_v32, 4 }
 0x118   : > { %v1219_v39 = vmax.f32 %v1217_v22, %v1218_v31  ;;  %v1687_v40 = vsel %vm1686_vm8, %v1212_v30, %v1685_v35  ;;  %v1335_v42 = vrot.slane %v1334_v34, 2  ;;  %v799_v43 = vmax.f32 %v749_v10, 0.0 }
 0x119   : > { %v1341_v44 = vmax.f32 %v1339_v27, %v1340_v41  ;;  %v1348_v45 = vmax.f32 %v1346_v28, %v1347_v37  ;;  %v1355_v47 = vmax.f32 %v1353_v32, %v1354_v38  ;;  %v760_v48 = vadd.f32 %v6595_v51, %v6567_v14 }
 0x11a   : > { %v1689_v49 = vsel %vm1688_vm9, %v1219_v39, %v1687_v40  ;;  %v1336_v11 = vmax.f32 %v1334_v34, %v1335_v42  ;;  %v895_v50 = vcombine.high %v799_v43, %v799_v43  ;;  %v902_v52 = vrot.slane %v799_v43, %v6570_v17 }
 0x11b   : > { %1748 = vst.msk [vmem:[#allocation2 + $0x3] sm:$0xff] %vm1747_vm10, %v1689_v49  ;;  %v1342_v53 = vrot.slane %v1341_v44, 2  ;;  %v1349_v54 = vrot.slane %v1348_v45, 2  ;;  %v1356_v55 = vrot.slane %v1355_v47, 2  ;;  %v802_v57 = vmax.f32 %v760_v48, 0.0 }
 0x11c   : > { %v1337_v58 = vrot.slane %v1336_v11, 1  ;;  %v909_v29 = vrot.slane %v895_v50, %v6570_v17  ;;  %v910_v36 = vcombine.high %v902_v52, %v902_v52  ;;  %v1276_v60 = vsel %vm1163_vm2, %v902_v52, -inf }
 0x11d   : > { %v1343_v61 = vmax.f32 %v1341_v44, %v1342_v53  ;;  %v1350_v51 = vmax.f32 %v1348_v45, %v1349_v54  ;;  %v1357_v63 = vmax.f32 %v1355_v47, %v1356_v55  ;;  %v1277_v0 = vrot.slane %v1276_v60, 4 }
 0x11e   : > { %v1338_v1 = vmax.f32 %v1336_v11, %v1337_v58  ;;  %v911_v4 = vcombine.high %v909_v29, %v909_v29  ;;  %v1283_v5 = vsel %vm1163_vm2, %v910_v36, -inf  ;;  %v1290_v2 = vsel %vm1163_vm2, %v909_v29, -inf }
 0x11f   : > { %v1344_v6 = vrot.slane %v1343_v61, 1  ;;  %v1351_v7 = vrot.slane %v1350_v51, 1  ;;  %v1358_v9 = vrot.slane %v1357_v63, 1  ;;  %v1278_v10 = vmax.f32 %v1276_v60, %v1277_v0 }
 0x120   : > { %v1284_v12 = vrot.slane %v1283_v5, 4  ;;  %v1291_v15 = vrot.slane %v1290_v2, 4  ;;  %v1297_v16 = vsel %vm1163_vm2, %v911_v4, -inf  ;;  %v946_v18 = vcombine.high %v802_v57, %v802_v57 }
 0x121   : > { %v1345_v19 = vmax.f32 %v1343_v61, %v1344_v6  ;;  %v1352_v21 = vmax.f32 %v1350_v51, %v1351_v7  ;;  %v1359_v22 = vmax.f32 %v1357_v63, %v1358_v9  ;;  %v1279_v23 = vrot.slane %v1278_v10, 2 }
 0x122   : > { %v1285_v25 = vmax.f32 %v1283_v5, %v1284_v12  ;;  %v1292_v27 = vmax.f32 %v1290_v2, %v1291_v15  ;;  %v1298_v28 = vrot.slane %v1297_v16, 4  ;;  %v953_v32 = vrot.slane %v802_v57, %v6570_v17 }
 0x123   : > { %v1704_v30 = vsel %vm1676_vm3, %v1345_v19, %v1338_v1  ;;  %v1280_v31 = vmax.f32 %v1278_v10, %v1279_v23  ;;  %v960_v46 = vrot.slane %v946_v18, %v6570_v17  ;;  %v752_v34 = vadd.f32 %v6567_v14, %v6600_v56 }
 0x124   : > { %v1705_v35 = vsel %vm1678_vm4, %v1352_v21, %v1704_v30  ;;  %v1286_v41 = vrot.slane %v1285_v25, 2  ;;  %v1293_v37 = vrot.slane %v1292_v27, 2  ;;  %v1299_v38 = vmax.f32 %v1297_v16, %v1298_v28 }
 0x125   : > { %v1281_v39 = vrot.slane %v1280_v31, 1  ;;  %v961_v40 = vcombine.high %v953_v32, %v953_v32  ;;  %v962_v42 = vcombine.high %v960_v46, %v960_v46  ;;  %v1360_v43 = vsel %vm1163_vm2, %v953_v32, -inf }
 0x126   : > { %v1287_v44 = vmax.f32 %v1285_v25, %v1286_v41  ;;  %v1294_v45 = vmax.f32 %v1292_v27, %v1293_v37  ;;  %v1300_v47 = vrot.slane %v1299_v38, 2  ;;  %v1361_v48 = vrot.slane %v1360_v43, 4  ;;  %v6226_v37 = vld [vmem:[%s7963_s20 + $0x40] sm:$0xff]  }
 0x127   : > { %v1282_v49 = vmax.f32 %v1280_v31, %v1281_v39  ;;  %v1367_v11 = vsel %vm1163_vm2, %v961_v40, -inf  ;;  %v1374_v50 = vsel %vm1163_vm2, %v960_v46, -inf  ;;  %v1381_v56 = vsel %vm1163_vm2, %v962_v42, -inf  ;;  %5847 = vmatprep.subr.bf16.mxu1 %v6226_v37 }
 0x128   : > { %v1288_v52 = vrot.slane %v1287_v44, 1  ;;  %v1295_v53 = vrot.slane %v1294_v45, 1  ;;  %v1301_v54 = vmax.f32 %v1299_v38, %v1300_v47  ;;  %v1362_v55 = vmax.f32 %v1360_v43, %v1361_v48  ;;  %v6227_v38 = vld [vmem:[%s7963_s20 + $0xc0] sm:$0xff]   ;;  %v6230_v47 = vld [vmem:[%s7963_s20 + $0x48] sm:$0xff]  }
 0x129   : > { %v1368_v57 = vrot.slane %v1367_v11, 4  ;;  %v1375_v58 = vrot.slane %v1374_v50, 4  ;;  %v1382_v29 = vrot.slane %v1381_v56, 4  ;;  %v1706_v36 = vsel %vm1680_vm5, %v1359_v22, %v1705_v35  ;;  %5887 = vmatprep.subr.bf16.mxu0 %v6227_v38 }
 0x12a   : > { %v1289_v60 = vmax.f32 %v1287_v44, %v1288_v52  ;;  %v1296_v61 = vmax.f32 %v1294_v45, %v1295_v53  ;;  %v1302_v51 = vrot.slane %v1301_v54, 1  ;;  %v1363_v63 = vrot.slane %v1362_v55, 2  ;;  %v6228_v44 = vld [vmem:[%s7963_s20] sm:$0xff]  }
 0x12b   : > { %v1369_v0 = vmax.f32 %v1367_v11, %v1368_v57  ;;  %v1376_v1 = vmax.f32 %v1374_v50, %v1375_v58  ;;  %v1383_v4 = vmax.f32 %v1381_v56, %v1382_v29  ;;  %v800_v5 = vmax.f32 %v752_v34, 0.0  ;;  %v6229_v45 = vld [vmem:[%s7963_s20 + $0x80] sm:$0xff]   ;;  %v6231_v56 = vld [vmem:[%s7963_s20 + $0xc8] sm:$0xff]   ;;  %5848 = vmatpush3.bf16.msra.mxu1 %v6228_v44 }
 0x12c   : > { %v1303_v2 = vmax.f32 %v1301_v54, %v1302_v51  ;;  %v1697_v6 = vsel %vm1676_vm3, %v1289_v60, %v1282_v49  ;;  %v1364_v7 = vmax.f32 %v1362_v55, %v1363_v63  ;;  %v773_v9 = vadd.f32 %v6603_v13, %v6567_v14  ;;  %v6232_v57 = vld [vmem:[%s7963_s20 + $0x8] sm:$0xff]   ;;  %5888 = vmatpush3.bf16.msra.mxu0 %v6229_v45  ;;  %v6234_v51 = vld [vmem:[%s7963_s20 + $0x50] sm:$0xff]  }
 0x12d   : > { %v1698_v10 = vsel %vm1678_vm4, %v1296_v61, %v1697_v6  ;;  %v1370_v12 = vrot.slane %v1369_v0, 2  ;;  %v1377_v15 = vrot.slane %v1376_v1, 2  ;;  %v1384_v16 = vrot.slane %v1383_v4, 2  ;;  %5849 = vmatprep.subr.bf16.mxu1 %v6230_v47  ;;  %v6233_v61 = vld [vmem:[%s7963_s20 + $0x88] sm:$0xff]   ;;  %5889 = vmatprep.subr.bf16.mxu0 %v6231_v56 }
 0x12e   : > { %v1365_v18 = vrot.slane %v1364_v7, 1  ;;  %v912_v19 = vcombine.high %v800_v5, %v800_v5  ;;  %v919_v21 = vrot.slane %v800_v5, %v6570_v17  ;;  %v6692_v22 = vsel %vm1680_vm5, %v1303_v2, %v1698_v10  ;;  %v6235_v5 = vld [vmem:[%s7963_s20 + $0xd0] sm:$0xff]  }
 0x12f   : > { %v1371_v23 = vmax.f32 %v1369_v0, %v1370_v12  ;;  %v1378_v25 = vmax.f32 %v1376_v1, %v1377_v15  ;;  %v1385_v27 = vmax.f32 %v1383_v4, %v1384_v16  ;;  %v805_v28 = vmax.f32 %v773_v9, 0.0  ;;  %5850 = vmatpush3.bf16.msra.mxu1 %v6232_v57 }
 0x130   : > { %v1366_v32 = vmax.f32 %v1364_v7, %v1365_v18  ;;  %v926_v30 = vrot.slane %v912_v19, %v6570_v17  ;;  %v927_v13 = vcombine.high %v919_v21, %v919_v21  ;;  %v1304_v31 = vsel %vm1163_vm2, %v919_v21, -inf  ;;  %v6236_v18 = vld [vmem:[%s7963_s20 + $0x10] sm:$0xff]   ;;  %5890 = vmatpush3.bf16.msra.mxu0 %v6233_v61  ;;  %5851 = vmatprep.subr.bf16.mxu1 %v6234_v51  ;;  %v6244_v51 = vld [vmem:[%s7963_s20 + $0x20] sm:$0xff]  }
 0x131   : > { %v1372_v46 = vrot.slane %v1371_v23, 1  ;;  %v1379_v34 = vrot.slane %v1378_v25, 1  ;;  %v1386_v35 = vrot.slane %v1385_v27, 1  ;;  %v1305_v41 = vrot.slane %v1304_v31, 4  ;;  %5891 = vmatprep.subr.bf16.mxu0 %v6235_v5 }
 0x132   : > { %v1707_v39 = vsel %vm1682_vm6, %v1366_v32, %v1706_v36  ;;  %v928_v40 = vcombine.high %v926_v30, %v926_v30  ;;  %v1311_v42 = vsel %vm1163_vm2, %v927_v13, -inf  ;;  %v1318_v43 = vsel %vm1163_vm2, %v926_v30, -inf }
 0x133   : > { %v1373_v48 = vmax.f32 %v1371_v23, %v1372_v46  ;;  %v1380_v49 = vmax.f32 %v1378_v25, %v1379_v34  ;;  %v1387_v11 = vmax.f32 %v1385_v27, %v1386_v35  ;;  %v1306_v50 = vmax.f32 %v1304_v31, %v1305_v41  ;;  %v6237_v27 = vld [vmem:[%s7963_s20 + $0x90] sm:$0xff]   ;;  %v6239_v46 = vld [vmem:[%s7963_s20 + $0xd8] sm:$0xff]   ;;  %5852 = vmatpush3.bf16.msra.mxu1 %v6236_v18 }
 0x134   : > { %v1312_v52 = vrot.slane %v1311_v42, 4  ;;  %v1319_v53 = vrot.slane %v1318_v43, 4  ;;  %v1325_v54 = vsel %vm1163_vm2, %v928_v40, -inf  ;;  %v997_v55 = vcombine.high %v805_v28, %v805_v28  ;;  %5892 = vmatpush3.bf16.msra.mxu0 %v6237_v27 }
 0x135   : > { %v1708_v58 = vsel %vm1684_vm7, %v1373_v48, %v1707_v39  ;;  %v1307_v29 = vrot.slane %v1306_v50, 2  ;;  %v1326_v36 = vrot.slane %v1325_v54, 4  ;;  %v1004_v60 = vrot.slane %v805_v28, %v6570_v17  ;;  %v6238_v28 = vld [vmem:[%s7963_s20 + $0x58] sm:$0xff]   ;;  %5893 = vmatprep.subr.bf16.mxu0 %v6239_v46 }
 0x136   : > { %v1709_v63 = vsel %vm1686_vm8, %v1380_v49, %v1708_v58  ;;  %v1313_v0 = vmax.f32 %v1311_v42, %v1312_v52  ;;  %v1320_v1 = vmax.f32 %v1318_v43, %v1319_v53  ;;  %v1011_v4 = vrot.slane %v997_v55, %v6570_v17  ;;  %v6240_v43 = vld [vmem:[%s7963_s20 + $0x18] sm:$0xff]   ;;  %5853 = vmatprep.subr.bf16.mxu1 %v6238_v28 }
 0x137   : > { %v1710_v2 = vsel %vm1688_vm9, %v1387_v11, %v1709_v63  ;;  %v1308_v6 = vmax.f32 %v1306_v50, %v1307_v29  ;;  %v1327_v7 = vmax.f32 %v1325_v54, %v1326_v36  ;;  %v1012_v9 = vcombine.high %v1004_v60, %v1004_v60  ;;  %v6241_v49 = vld [vmem:[%s7963_s20 + $0x98] sm:$0xff]   ;;  %v6242_v11 = vld [vmem:[%s7963_s20 + $0x60] sm:$0xff]   ;;  %5854 = vmatpush3.bf16.msra.mxu1 %v6240_v43 }
 0x138   : > { %1751 = vst.msk [vmem:[#allocation2 + $0x1b] sm:$0xff] %vm1747_vm10, %v1710_v2  ;;  %v1314_v10 = vrot.slane %v1313_v0, 2  ;;  %v1321_v12 = vrot.slane %v1320_v1, 2  ;;  %v1013_v15 = vcombine.high %v1011_v4, %v1011_v4  ;;  %v1444_v16 = vsel %vm1163_vm2, %v1004_v60, -inf  ;;  %5894 = vmatpush3.bf16.msra.mxu0 %v6241_v49  ;;  %5855 = vmatprep.subr.bf16.mxu1 %v6242_v11 }
 0x139   : > { %v1309_v19 = vrot.slane %v1308_v6, 1  ;;  %v1328_v21 = vrot.slane %v1327_v7, 2  ;;  %v1445_v23 = vrot.slane %v1444_v16, 4  ;;  %v1451_v25 = vsel %vm1163_vm2, %v1012_v9, -inf  ;;  %v6247_v9 = vld [vmem:[%s7963_s20 + $0xe8] sm:$0xff]  }
 0x13a   : > { %v1315_v32 = vmax.f32 %v1313_v0, %v1314_v10  ;;  %v1322_v30 = vmax.f32 %v1320_v1, %v1321_v12  ;;  %v1452_v13 = vrot.slane %v1451_v25, 4  ;;  %v1458_v31 = vsel %vm1163_vm2, %v1011_v4, -inf }
 0x13b   : > { %v1310_v34 = vmax.f32 %v1308_v6, %v1309_v19  ;;  %v1329_v35 = vmax.f32 %v1327_v7, %v1328_v21  ;;  %v1446_v41 = vmax.f32 %v1444_v16, %v1445_v23  ;;  %v1459_v37 = vrot.slane %v1458_v31, 4  ;;  %5856 = vmatpush3.bf16.msra.mxu1 %v6244_v51 }
 0x13c   : > { %v1316_v38 = vrot.slane %v1315_v32, 1  ;;  %v1323_v39 = vrot.slane %v1322_v30, 1  ;;  %v1453_v40 = vmax.f32 %v1451_v25, %v1452_v13  ;;  %v1465_v42 = vsel %vm1163_vm2, %v1013_v15, -inf  ;;  %v6248_v25 = vld [vmem:[%s7963_s20 + $0x28] sm:$0xff]  }
 0x13d   : > { %v1330_v44 = vrot.slane %v1329_v35, 1  ;;  %v1700_v45 = vsel %vm1682_vm6, %v1310_v34, %v6692_v22  ;;  %v1447_v47 = vrot.slane %v1446_v41, 2  ;;  %v1460_v48 = vmax.f32 %v1458_v31, %v1459_v37  ;;  %v6243_v22 = vld [vmem:[%s7963_s20 + $0xe0] sm:$0xff]   ;;  %v6249_v13 = vld [vmem:[%s7963_s20 + $0xa8] sm:$0xff]   ;;  %v6250_v31 = vld [vmem:[%s7963_s20 + $0x70] sm:$0xff]  }
 0x13e   : > { %v1317_v50 = vmax.f32 %v1315_v32, %v1316_v38  ;;  %v1324_v56 = vmax.f32 %v1322_v30, %v1323_v39  ;;  %v1454_v52 = vrot.slane %v1453_v40, 2  ;;  %v1466_v53 = vrot.slane %v1465_v42, 4  ;;  %5895 = vmatprep.subr.bf16.mxu0 %v6243_v22  ;;  %v6251_v37 = vld [vmem:[%s7963_s20 + $0xf0] sm:$0xff]  }
 0x13f   : > { %v1331_v54 = vmax.f32 %v1329_v35, %v1330_v44  ;;  %v1448_v55 = vmax.f32 %v1446_v41, %v1447_v47  ;;  %v1461_v57 = vrot.slane %v1460_v48, 2  ;;  %v765_v58 = vadd.f32 %v6567_v14, %v6605_v20  ;;  %v6245_v20 = vld [vmem:[%s7963_s20 + $0xa0] sm:$0xff]  }
 0x140   : > { %v1701_v29 = vsel %vm1684_vm7, %v1317_v50, %v1700_v45  ;;  %v1455_v36 = vmax.f32 %v1453_v40, %v1454_v52  ;;  %v1467_v60 = vmax.f32 %v1465_v42, %v1466_v53  ;;  %v776_v61 = vadd.f32 %v6607_v26, %v6567_v14  ;;  %v6246_v26 = vld [vmem:[%s7963_s20 + $0x68] sm:$0xff]   ;;  %5896 = vmatpush3.bf16.msra.mxu0 %v6245_v20  ;;  %v6253_v52 = vld [vmem:[%s7963_s20 + $0xb0] sm:$0xff]  }
 0x141   : > { %v1702_v63 = vsel %vm1686_vm8, %v1324_v56, %v1701_v29  ;;  %v1449_v0 = vrot.slane %v1448_v55, 1  ;;  %v1462_v1 = vmax.f32 %v1460_v48, %v1461_v57  ;;  %v803_v4 = vmax.f32 %v765_v58, 0.0  ;;  %5857 = vmatprep.subr.bf16.mxu1 %v6246_v26  ;;  %5897 = vmatprep.subr.bf16.mxu0 %v6247_v9  ;;  %v6252_v48 = vld [vmem:[%s7963_s20 + $0x30] sm:$0xff]  }
 0x142   : > { %v1703_v5 = vsel %vm1688_vm9, %v1331_v54, %v1702_v63  ;;  %v1456_v2 = vrot.slane %v1455_v36, 1  ;;  %v1468_v6 = vrot.slane %v1467_v60, 2  ;;  %v806_v7 = vmax.f32 %v776_v61, 0.0  ;;  %5858 = vmatpush3.bf16.msra.mxu1 %v6248_v25 }
 0x143   : > { %1750 = vst.msk [vmem:[#allocation2 + $0x13] sm:$0xff] %vm1747_vm10, %v1703_v5  ;;  %v1450_v10 = vmax.f32 %v1448_v55, %v1449_v0  ;;  %v1463_v12 = vrot.slane %v1462_v1, 1  ;;  %v963_v15 = vcombine.high %v803_v4, %v803_v4  ;;  %v970_v16 = vrot.slane %v803_v4, %v6570_v17  ;;  %5859 = vmatprep.subr.bf16.mxu1 %v6250_v31 }
 0x144   : > { %v1457_v18 = vmax.f32 %v1455_v36, %v1456_v2  ;;  %v1469_v19 = vmax.f32 %v1467_v60, %v1468_v6  ;;  %v1014_v21 = vcombine.high %v806_v7, %v806_v7  ;;  %v1021_v23 = vrot.slane %v806_v7, %v6570_v17  ;;  %5898 = vmatpush3.bf16.msra.mxu0 %v6249_v13 }
 0x145   : > { %v1464_v27 = vmax.f32 %v1462_v1, %v1463_v12  ;;  %v977_v28 = vrot.slane %v963_v15, %v6570_v17  ;;  %v978_v32 = vcombine.high %v970_v16, %v970_v16  ;;  %v1388_v30 = vsel %vm1163_vm2, %v970_v16, -inf  ;;  %5899 = vmatprep.subr.bf16.mxu0 %v6251_v37 }
 0x146   : > { %v1470_v46 = vrot.slane %v1469_v19, 1  ;;  %v1718_v34 = vsel %vm1676_vm3, %v1457_v18, %v1450_v10  ;;  %v1389_v35 = vrot.slane %v1388_v30, 4  ;;  %v1028_v41 = vrot.slane %v1014_v21, %v6570_v17  ;;  %5860 = vmatpush3.bf16.msra.mxu1 %v6252_v48 }
 0x147   : > { %v1719_v38 = vsel %vm1678_vm4, %v1464_v27, %v1718_v34  ;;  %v979_v39 = vcombine.high %v977_v28, %v977_v28  ;;  %v1395_v40 = vsel %vm1163_vm2, %v978_v32, -inf  ;;  %v1402_v42 = vsel %vm1163_vm2, %v977_v28, -inf }
 0x148   : > { %v1471_v43 = vmax.f32 %v1469_v19, %v1470_v46  ;;  %v1390_v44 = vmax.f32 %v1388_v30, %v1389_v35  ;;  %v1396_v45 = vrot.slane %v1395_v40, 4  ;;  %v1403_v47 = vrot.slane %v1402_v42, 4  ;;  %5900 = vmatpush3.bf16.msra.mxu0 %v6253_v52 }
 0x149   : > { %v1409_v49 = vsel %vm1163_vm2, %v979_v39, -inf  ;;  %v1029_v11 = vcombine.high %v1021_v23, %v1021_v23  ;;  %v1030_v50 = vcombine.high %v1028_v41, %v1028_v41  ;;  %v1472_v56 = vsel %vm1163_vm2, %v1021_v23, -inf }
 0x14a   : > { %v1391_v53 = vrot.slane %v1390_v44, 2  ;;  %v1397_v22 = vmax.f32 %v1395_v40, %v1396_v45  ;;  %v1404_v54 = vmax.f32 %v1402_v42, %v1403_v47  ;;  %v1410_v55 = vrot.slane %v1409_v49, 4 }
 0x14b   : > { %v1473_v57 = vrot.slane %v1472_v56, 4  ;;  %v1479_v58 = vsel %vm1163_vm2, %v1029_v11, -inf  ;;  %v1486_v29 = vsel %vm1163_vm2, %v1028_v41, -inf  ;;  %v1493_v36 = vsel %vm1163_vm2, %v1030_v50, -inf }
 0x14c   : > { %v1392_v60 = vmax.f32 %v1390_v44, %v1391_v53  ;;  %v1398_v61 = vrot.slane %v1397_v22, 2  ;;  %v1405_v51 = vrot.slane %v1404_v54, 2  ;;  %v1411_v63 = vmax.f32 %v1409_v49, %v1410_v55 }
 0x14d   : > { %v1474_v0 = vmax.f32 %v1472_v56, %v1473_v57  ;;  %v1480_v1 = vrot.slane %v1479_v58, 4  ;;  %v1487_v4 = vrot.slane %v1486_v29, 4  ;;  %v1494_v20 = vrot.slane %v1493_v36, 4 }
 0x14e   : > { %v1393_v26 = vrot.slane %v1392_v60, 1  ;;  %v1399_v5 = vmax.f32 %v1397_v22, %v1398_v61  ;;  %v1406_v2 = vmax.f32 %v1404_v54, %v1405_v51  ;;  %v1412_v6 = vrot.slane %v1411_v63, 2 }
 0x14f   : > { %v1475_v7 = vrot.slane %v1474_v0, 2  ;;  %v1481_v9 = vmax.f32 %v1479_v58, %v1480_v1  ;;  %v1488_v10 = vmax.f32 %v1486_v29, %v1487_v4  ;;  %v1495_v12 = vmax.f32 %v1493_v36, %v1494_v20 }
 0x150   : > { %v1394_v15 = vmax.f32 %v1392_v60, %v1393_v26  ;;  %v1400_v16 = vrot.slane %v1399_v5, 1  ;;  %v1407_v18 = vrot.slane %v1406_v2, 1  ;;  %v1413_v19 = vmax.f32 %v1411_v63, %v1412_v6 }
 0x151   : > { %v1476_v21 = vmax.f32 %v1474_v0, %v1475_v7  ;;  %v1482_v23 = vrot.slane %v1481_v9, 2  ;;  %v1489_v25 = vrot.slane %v1488_v10, 2  ;;  %v1496_v27 = vrot.slane %v1495_v12, 2 }
 0x152   : > { %v1401_v28 = vmax.f32 %v1399_v5, %v1400_v16  ;;  %v1408_v32 = vmax.f32 %v1406_v2, %v1407_v18  ;;  %v1414_v30 = vrot.slane %v1413_v19, 1  ;;  %v1720_v13 = vsel %vm1680_vm5, %v1471_v43, %v1719_v38 }
 0x153   : > { %v1477_v31 = vrot.slane %v1476_v21, 1  ;;  %v1483_v46 = vmax.f32 %v1481_v9, %v1482_v23  ;;  %v1490_v34 = vmax.f32 %v1488_v10, %v1489_v25  ;;  %v1497_v35 = vmax.f32 %v1495_v12, %v1496_v27 }
 0x154   : > { %v1415_v41 = vmax.f32 %v1413_v19, %v1414_v30  ;;  %v1711_v37 = vsel %vm1676_vm3, %v1401_v28, %v1394_v15  ;;  %v768_v39 = vadd.f32 %v6567_v14, %v6609_v33  ;;  %v789_v40 = vadd.f32 %v6622_v59, %v6567_v14  ;;  %v6832_v33 = vld [vmem:[%s7962_s27] ss:$0 sm:$0xff] }
 0x155   : > { %v1712_v42 = vsel %vm1678_vm4, %v1408_v32, %v1711_v37  ;;  %v1478_v44 = vmax.f32 %v1476_v21, %v1477_v31  ;;  %v1484_v45 = vrot.slane %v1483_v46, 1  ;;  %v1491_v47 = vrot.slane %v1490_v34, 1 }
 0x156   : > { %v1498_v48 = vrot.slane %v1497_v35, 1  ;;  %v804_v38 = vmax.f32 %v768_v39, 0.0  ;;  %v809_v43 = vmax.f32 %v789_v40, 0.0  ;;  %v6827_v50 = vsel %vm1680_vm5, %v1415_v41, %v1712_v42 }
 0x157   : > { %v1485_v49 = vmax.f32 %v1483_v46, %v1484_v45  ;;  %v1721_v11 = vsel %vm1682_vm6, %v1478_v44, %v1720_v13  ;;  %v781_v14 = vadd.f32 %v6832_v33, %v6625_v62  ;;  %v1492_v59 = vmax.f32 %v1490_v34, %v1491_v47 }
 0x158   : > { %v980_v56 = vcombine.high %v804_v38, %v804_v38  ;;  %v987_v52 = vrot.slane %v804_v38, %v6570_v17  ;;  %v1065_v53 = vcombine.high %v809_v43, %v809_v43  ;;  %v1499_v22 = vmax.f32 %v1497_v35, %v1498_v48 }
 0x159   : > { %v1722_v54 = vsel %vm1684_vm7, %v1485_v49, %v1721_v11  ;;  %v1072_v55 = vrot.slane %v809_v43, %v6570_v17  ;;  %v6839_v57 = vmax.f32 %v781_v14, 0.0 }
 0x15a   : > { %v1723_v58 = vsel %vm1686_vm8, %v1492_v59, %v1722_v54  ;;  %v994_v29 = vrot.slane %v980_v56, %v6570_v17  ;;  %v995_v36 = vcombine.high %v987_v52, %v987_v52  ;;  %v1416_v60 = vsel %vm1163_vm2, %v987_v52, -inf }
 0x15b   : > { %v1724_v62 = vsel %vm1688_vm9, %v1499_v22, %v1723_v58  ;;  %v1417_v61 = vrot.slane %v1416_v60, 4  ;;  %v1079_v51 = vrot.slane %v1065_v53, %v6570_v17  ;;  %v1080_v63 = vcombine.high %v1072_v55, %v1072_v55 }
 0x15c   : > { %1753 = vst.msk [vmem:[#allocation2 + $0x2b] sm:$0xff] %vm1747_vm10, %v1724_v62  ;;  %v996_v0 = vcombine.high %v994_v29, %v994_v29  ;;  %v1423_v1 = vsel %vm1163_vm2, %v995_v36, -inf  ;;  %v1430_v4 = vsel %vm1163_vm2, %v994_v29, -inf  ;;  %v1556_v20 = vsel %vm1163_vm2, %v1072_v55, -inf }
 0x15d   : > { %v1418_v26 = vmax.f32 %v1416_v60, %v1417_v61  ;;  %v1424_v5 = vrot.slane %v1423_v1, 4  ;;  %v1431_v2 = vrot.slane %v1430_v4, 4  ;;  %v1081_v6 = vcombine.high %v1079_v51, %v1079_v51 }
 0x15e   : > { %v1437_v7 = vsel %vm1163_vm2, %v996_v0, -inf  ;;  %v1557_v9 = vrot.slane %v1556_v20, 4  ;;  %v1563_v10 = vsel %vm1163_vm2, %v1080_v63, -inf  ;;  %v1570_v12 = vsel %vm1163_vm2, %v1079_v51, -inf }
 0x15f   : > { %v1419_v15 = vrot.slane %v1418_v26, 2  ;;  %v1425_v16 = vmax.f32 %v1423_v1, %v1424_v5  ;;  %v1432_v18 = vmax.f32 %v1430_v4, %v1431_v2  ;;  %v1438_v19 = vrot.slane %v1437_v7, 4 }
 0x160   : > { %v1558_v21 = vmax.f32 %v1556_v20, %v1557_v9  ;;  %v1564_v23 = vrot.slane %v1563_v10, 4  ;;  %v1571_v25 = vrot.slane %v1570_v12, 4  ;;  %v1577_v27 = vsel %vm1163_vm2, %v1081_v6, -inf }
 0x161   : > { %v1420_v28 = vmax.f32 %v1418_v26, %v1419_v15  ;;  %v1426_v32 = vrot.slane %v1425_v16, 2  ;;  %v1433_v30 = vrot.slane %v1432_v18, 2  ;;  %v1439_v13 = vmax.f32 %v1437_v7, %v1438_v19 }
 0x162   : > { %v1559_v31 = vrot.slane %v1558_v21, 2  ;;  %v1565_v46 = vmax.f32 %v1563_v10, %v1564_v23  ;;  %v1572_v34 = vmax.f32 %v1570_v12, %v1571_v25  ;;  %v1578_v35 = vrot.slane %v1577_v27, 4 }
 0x163   : > { %v1421_v41 = vrot.slane %v1420_v28, 1  ;;  %v1427_v37 = vmax.f32 %v1425_v16, %v1426_v32  ;;  %v1434_v39 = vmax.f32 %v1432_v18, %v1433_v30  ;;  %v1440_v40 = vrot.slane %v1439_v13, 2 }
 0x164   : > { %v1560_v42 = vmax.f32 %v1558_v21, %v1559_v31  ;;  %v1566_v44 = vrot.slane %v1565_v46, 2  ;;  %v1573_v45 = vrot.slane %v1572_v34, 2  ;;  %v1579_v47 = vmax.f32 %v1577_v27, %v1578_v35 }
 0x165   : > { %v1422_v48 = vmax.f32 %v1420_v28, %v1421_v41  ;;  %v1428_v38 = vrot.slane %v1427_v37, 1  ;;  %v1435_v43 = vrot.slane %v1434_v39, 1  ;;  %v1441_v49 = vmax.f32 %v1439_v13, %v1440_v40 }
 0x166   : > { %v1561_v11 = vrot.slane %v1560_v42, 1  ;;  %v1567_v14 = vmax.f32 %v1565_v46, %v1566_v44  ;;  %v1574_v59 = vmax.f32 %v1572_v34, %v1573_v45  ;;  %v1580_v56 = vrot.slane %v1579_v47, 2 }
 0x167   : > { %v1429_v52 = vmax.f32 %v1427_v37, %v1428_v38  ;;  %v1442_v53 = vrot.slane %v1441_v49, 1  ;;  %v1714_v22 = vsel %vm1682_vm6, %v1422_v48, %v6827_v50  ;;  %v792_v54 = vadd.f32 %v6832_v33, %v6630_v3 }
 0x168   : > { %v1436_v55 = vmax.f32 %v1434_v39, %v1435_v43  ;;  %v1568_v58 = vrot.slane %v1567_v14, 1  ;;  %v1575_v29 = vrot.slane %v1574_v59, 1  ;;  %v1581_v36 = vmax.f32 %v1579_v47, %v1580_v56 }
 0x169   : > { %v1443_v60 = vmax.f32 %v1441_v49, %v1442_v53  ;;  %v1715_v62 = vsel %vm1684_vm7, %v1429_v52, %v1714_v22  ;;  %v1031_v61 = vcombine.high %v6839_v57, %v6839_v57  ;;  %v1038_v51 = vrot.slane %v6839_v57, %v6570_v17 }
 0x16a   : > { %v1716_v63 = vsel %vm1686_vm8, %v1436_v55, %v1715_v62  ;;  %v1562_v0 = vmax.f32 %v1560_v42, %v1561_v11  ;;  %v1569_v50 = vmax.f32 %v1567_v14, %v1568_v58  ;;  %v1582_v1 = vrot.slane %v1581_v36, 1 }
 0x16b   : > { %v1717_v3 = vsel %vm1688_vm9, %v1443_v60, %v1716_v63  ;;  %v1045_v4 = vrot.slane %v1031_v61, %v6570_v17  ;;  %v1046_v20 = vcombine.high %v1038_v51, %v1038_v51  ;;  %v1500_v26 = vsel %vm1163_vm2, %v1038_v51, -inf }
 0x16c   : > { %1752 = vst.msk [vmem:[#allocation2 + $0x23] sm:$0xff] %vm1747_vm10, %v1717_v3  ;;  %v1576_v5 = vmax.f32 %v1574_v59, %v1575_v29  ;;  %v1501_v2 = vrot.slane %v1500_v26, 4  ;;  %v810_v6 = vmax.f32 %v792_v54, 0.0  ;;  %v1732_v7 = vsel %vm1676_vm3, %v1569_v50, %v1562_v0 }
 0x16d   : > { %v1047_v57 = vcombine.high %v1045_v4, %v1045_v4  ;;  %v1507_v9 = vsel %vm1163_vm2, %v1046_v20, -inf  ;;  %v1514_v10 = vsel %vm1163_vm2, %v1045_v4, -inf  ;;  %v1583_v19 = vmax.f32 %v1581_v36, %v1582_v1 }
 0x16e   : > { %v1502_v12 = vmax.f32 %v1500_v26, %v1501_v2  ;;  %v1508_v15 = vrot.slane %v1507_v9, 4  ;;  %v1515_v16 = vrot.slane %v1514_v10, 4  ;;  %v1082_v18 = vcombine.high %v810_v6, %v810_v6 }
 0x16f   : > { %v1521_v21 = vsel %vm1163_vm2, %v1047_v57, -inf  ;;  %v1089_v23 = vrot.slane %v810_v6, %v6570_v17  ;;  %v784_v25 = vadd.f32 %v6832_v33, %v6634_v8  ;;  %v1733_v13 = vsel %vm1678_vm4, %v1576_v5, %v1732_v7 }
 0x170   : > { %v1503_v27 = vrot.slane %v1502_v12, 2  ;;  %v1509_v28 = vmax.f32 %v1507_v9, %v1508_v15  ;;  %v1516_v32 = vmax.f32 %v1514_v10, %v1515_v16  ;;  %v1522_v30 = vrot.slane %v1521_v21, 4 }
 0x171   : > { %v1096_v31 = vrot.slane %v1082_v18, %v6570_v17  ;;  %v1097_v46 = vcombine.high %v1089_v23, %v1089_v23  ;;  %v1584_v34 = vsel %vm1163_vm2, %v1089_v23, -inf  ;;  %v808_v38 = vmax.f32 %v784_v25, 0.0 }
 0x172   : > { %v1504_v35 = vmax.f32 %v1502_v12, %v1503_v27  ;;  %v1510_v41 = vrot.slane %v1509_v28, 2  ;;  %v1517_v37 = vrot.slane %v1516_v32, 2  ;;  %v1523_v39 = vmax.f32 %v1521_v21, %v1522_v30 }
 0x173   : > { %v6878_v40 = vld [vmem:[#allocation2 + $0x20] sm:$0xff]  ;;  %v1098_v42 = vcombine.high %v1096_v31, %v1096_v31  ;;  %v1585_v44 = vrot.slane %v1584_v34, 4  ;;  %v1591_v8 = vsel %vm1163_vm2, %v1097_v46, -inf  ;;  %v1598_v33 = vsel %vm1163_vm2, %v1096_v31, -inf }
 0x174   : > { %2867 = vst.msk [vmem:[#allocation2 + $0x23] sm:$0xf] %vm7952_vm1, %v6436_v24  ;;  %v1505_v45 = vrot.slane %v1504_v35, 1  ;;  %v1511_v47 = vmax.f32 %v1509_v28, %v1510_v41  ;;  %v1518_v48 = vmax.f32 %v1516_v32, %v1517_v37  ;;  %v1524_v43 = vrot.slane %v1523_v39, 2  ;;  %v1760_v37 = vld [vmem:[#allocation2 + $0x10] sm:$0xff] }
 0x175   : > { %v1586_v49 = vmax.f32 %v1584_v34, %v1585_v44  ;;  %v1592_v11 = vrot.slane %v1591_v8, 4  ;;  %v1599_v14 = vrot.slane %v1598_v33, 4  ;;  %v1605_v52 = vsel %vm1163_vm2, %v1098_v42, -inf }
 0x176   : > { %v1512_v59 = vrot.slane %v1511_v47, 1  ;;  %v1519_v56 = vrot.slane %v1518_v48, 1  ;;  %v1525_v53 = vmax.f32 %v1523_v39, %v1524_v43  ;;  %v1606_v29 = vrot.slane %v1605_v52, 4  ;;  %v1761_v39 = vld [vmem:[#allocation2 + $0x18] sm:$0xff] }
 0x177   : > { %v1587_v22 = vrot.slane %v1586_v49, 2  ;;  %v1593_v54 = vmax.f32 %v1591_v8, %v1592_v11  ;;  %v1600_v55 = vmax.f32 %v1598_v33, %v1599_v14  ;;  %v1734_v36 = vsel %vm1680_vm5, %v1583_v19, %v1733_v13 }
 0x178   : > { %v1513_v58 = vmax.f32 %v1511_v47, %v1512_v59  ;;  %v1048_v60 = vcombine.high %v808_v38, %v808_v38  ;;  %v1506_v62 = vmax.f32 %v1504_v35, %v1505_v45  ;;  %v1520_v0 = vmax.f32 %v1518_v48, %v1519_v56 }
 0x179   : > { %v1588_v61 = vmax.f32 %v1586_v49, %v1587_v22  ;;  %v1594_v51 = vrot.slane %v1593_v54, 2  ;;  %v1601_v63 = vrot.slane %v1600_v55, 2  ;;  %v1607_v50 = vmax.f32 %v1605_v52, %v1606_v29  ;;  %v1763_v52 = vld [vmem:[#allocation2 + $0x28] sm:$0xff] }
 0x17a   : > { %v1055_v1 = vrot.slane %v808_v38, %v6570_v17  ;;  %v1062_v3 = vrot.slane %v1048_v60, %v6570_v17  ;;  %v1526_v4 = vrot.slane %v1525_v53, 1  ;;  %v1725_v20 = vsel %vm1676_vm3, %v1513_v58, %v1506_v62  ;;  %v6254_v60 = vld [vmem:[%s7963_s20 + $0x78] sm:$0xff]   ;;  %v1759_v62 = vld [vmem:[#allocation2 + $0x8] sm:$0xff] }
 0x17b   : > { %v1589_v26 = vrot.slane %v1588_v61, 1  ;;  %v1595_v5 = vmax.f32 %v1593_v54, %v1594_v51  ;;  %v1602_v2 = vmax.f32 %v1600_v55, %v1601_v63  ;;  %v1608_v6 = vrot.slane %v1607_v50, 2  ;;  %5861 = vmatprep.subr.bf16.mxu1 %v6254_v60 }
 0x17c   : > { %v1063_v7 = vcombine.high %v1055_v1, %v1055_v1  ;;  %v1064_v57 = vcombine.high %v1062_v3, %v1062_v3  ;;  %v1528_v12 = vsel %vm1163_vm2, %v1055_v1, -inf  ;;  %v1542_v15 = vsel %vm1163_vm2, %v1062_v3, -inf  ;;  %v6256_v1 = vld [vmem:[%s7963_s20 + $0x38] sm:$0xff]  }
 0x17d   : > { %v1590_v9 = vmax.f32 %v1588_v61, %v1589_v26  ;;  %v1596_v10 = vrot.slane %v1595_v5, 1  ;;  %v1603_v16 = vrot.slane %v1602_v2, 1  ;;  %v1609_v18 = vmax.f32 %v1607_v50, %v1608_v6  ;;  %v6255_v50 = vld [vmem:[%s7963_s20 + $0xf8] sm:$0xff]   ;;  %v1758_v6 = vld [vmem:[#allocation2] sm:$0xff]  ;;  %5862 = vmatpush3.bf16.msra.mxu1 %v6256_v1 }
 0x17e   : > { %v1529_v19 = vrot.slane %v1528_v12, 4  ;;  %v1535_v21 = vsel %vm1163_vm2, %v1063_v7, -inf  ;;  %v1543_v28 = vrot.slane %v1542_v15, 4  ;;  %v1549_v31 = vsel %vm1163_vm2, %v1064_v57, -inf  ;;  %v6257_v3 = vld [vmem:[%s7963_s20 + $0xb8] sm:$0xff]   ;;  %5901 = vmatprep.subr.bf16.mxu0 %v6255_v50 }
 0x17f   : > { %v1597_v23 = vmax.f32 %v1595_v5, %v1596_v10  ;;  %v1735_v25 = vsel %vm1682_vm6, %v1590_v9, %v1734_v36  ;;  %v1536_v27 = vrot.slane %v1535_v21, 4  ;;  %v1604_v32 = vmax.f32 %v1602_v2, %v1603_v16  ;;  %5902 = vmatpush3.bf16.msra.mxu0 %v6257_v3 }
 0x180   : > { %v1610_v30 = vrot.slane %v1609_v18, 1  ;;  %v1530_v13 = vmax.f32 %v1528_v12, %v1529_v19  ;;  %v1544_v35 = vmax.f32 %v1542_v15, %v1543_v28  ;;  %v1550_v41 = vrot.slane %v1549_v31, 4 }
 0x181   : > { %v1736_v46 = vsel %vm1684_vm7, %v1597_v23, %v1735_v25  ;;  %v1537_v34 = vmax.f32 %v1535_v21, %v1536_v27  ;;  %v1527_v42 = vmax.f32 %v1525_v53, %v1526_v4  ;;  %v1726_v38 = vsel %vm1678_vm4, %v1520_v0, %v1725_v20 }
 0x182   : > { %v1611_v44 = vmax.f32 %v1609_v18, %v1610_v30  ;;  %v1737_v8 = vsel %vm1686_vm8, %v1604_v32, %v1736_v46  ;;  %v1531_v33 = vrot.slane %v1530_v13, 2  ;;  %v1545_v47 = vrot.slane %v1544_v35, 2 }
 0x183   : > { %v1538_v45 = vrot.slane %v1537_v34, 2  ;;  %v1551_v48 = vmax.f32 %v1549_v31, %v1550_v41  ;;  %v6899_v11 = vpack.c.bf16 %v1761_v39, %v1760_v37  ;;  %v1727_v36 = vsel %vm1680_vm5, %v1527_v42, %v1726_v38 }
 0x184   : > { %v1738_v43 = vsel %vm1688_vm9, %v1611_v44, %v1737_v8  ;;  %v1532_v49 = vmax.f32 %v1530_v13, %v1531_v33  ;;  %v1546_v59 = vmax.f32 %v1544_v35, %v1545_v47  ;;  %v6913_v51 = vpack.c.bf16 %v1763_v52, %v6878_v40 }
 0x185   : > { %1755 = vst.msk [vmem:[#allocation2 + $0x3b] sm:$0xff] %vm1747_vm10, %v1738_v43  ;;  %v1539_v14 = vmax.f32 %v1537_v34, %v1538_v45  ;;  %v1552_v56 = vrot.slane %v1551_v48, 2  ;;  %v6903_v22 = vshll.u32 %v6899_v11, 16  ;;  %v6906_v54 = vshrl.u32 %v6899_v11, 16 }
 0x186   : > { %v1533_v53 = vrot.slane %v1532_v49, 1  ;;  %v1547_v58 = vrot.slane %v1546_v59, 1  ;;  %v6931_v10 = vpack.c.bf16 %v1759_v62, %v1758_v6  ;;  %v6935_v15 = vshll.u32 %v6913_v51, 16 }
 0x187   : > { %v1540_v55 = vrot.slane %v1539_v14, 1  ;;  %v1553_v29 = vmax.f32 %v1551_v48, %v1552_v56  ;;  %v1914_v40 = vrot.slane %v6906_v54, 3  ;;  %v1915_v26 = vrot.slane %v6903_v22, 4 }
 0x188   : > { %v1534_v61 = vmax.f32 %v1532_v49, %v1533_v53  ;;  %v1548_v4 = vmax.f32 %v1546_v59, %v1547_v58  ;;  %v1836_v7 = vrot.slane %v6906_v54, 1  ;;  %v1837_v57 = vrot.slane %v6903_v22, 2 }
 0x189   : > { %v1541_v63 = vmax.f32 %v1539_v14, %v1540_v55  ;;  %v1554_v0 = vrot.slane %v1553_v29, 1  ;;  %v6938_v16 = vshrl.u32 %v6913_v51, 16  ;;  %v1774_v18 = vshrl.u32 %v6931_v10, 16 }
 0x18a   : > { %v1728_v20 = vsel %vm1682_vm6, %v1534_v61, %v1727_v36  ;;  %v1776_v19 = vshll.u32 %v6931_v10, 16  ;;  %v1916_v21 = vor.u32 %v1915_v26, %v1914_v40  ;;  %v1838_v23 = vor.u32 %v1837_v57, %v1836_v7 }
 0x18b   : > { %v1555_v5 = vmax.f32 %v1553_v29, %v1554_v0  ;;  %v1729_v2 = vsel %vm1684_vm7, %v1541_v63, %v1728_v20  ;;  %v1876_v25 = vrot.slane %v6906_v54, 2  ;;  %v1877_v27 = vrot.slane %v6903_v22, 3 }
 0x18c   : > { %v1730_v9 = vsel %vm1686_vm8, %v1548_v4, %v1729_v2  ;;  %v1911_v28 = vrot.slane %v1774_v18, 3  ;;  %v1912_v32 = vrot.slane %v1776_v19, 4  ;;  %v1833_v30 = vrot.slane %v1774_v18, 1  ;;  %v1766_v36 = vld [vmem:[#allocation2 + $0x40] sm:$0x7f] }
 0x18d   : > { %v1731_v12 = vsel %vm1688_vm9, %v1555_v5, %v1730_v9  ;;  %v1834_v13 = vrot.slane %v1776_v19, 2  ;;  %v1873_v31 = vrot.slane %v1774_v18, 2  ;;  %v1840_v46 = vrot.slane %v6938_v16, 1 }
 0x18e   : > { %1754 = vst.msk [vmem:[#allocation2 + $0x33] sm:$0xff] %vm1747_vm10, %v1731_v12  ;;  %v1841_v34 = vrot.slane %v6935_v15, 2  ;;  %v1913_v35 = vor.u32 %v1912_v32, %v1911_v28  ;;  %v1874_v37 = vrot.slane %v1776_v19, 3  ;;  %v1778_v39 = vrot.slane %v1776_v19, 1 }
 0x18f   : > { %v1835_v41 = vor.u32 %v1834_v13, %v1833_v30  ;;  %v1878_v8 = vor.u32 %v1877_v27, %v1876_v25  ;;  %v1783_v33 = vrot.slane %v6903_v22, 1  ;;  %v1880_v45 = vrot.slane %v6938_v16, 2 }
 0x190   : > { %v1917_v42 = vsel %vm7951_vm12, %v1913_v35, %v1916_v21  ;;  %v1881_v47 = vrot.slane %v6935_v15, 3  ;;  %v1875_v43 = vor.u32 %v1874_v37, %v1873_v31  ;;  %v1779_v49 = vor.u32 %v1778_v39, %v1774_v18 }
 0x191   : > { %v1839_v44 = vsel %vm1832_vm13, %v1835_v41, %v1838_v23  ;;  %1930 = vrot.lane.b32.xlu1 %v1917_v42, %s7953_s28  ;;  %v1842_v14 = vor.u32 %v1841_v34, %v1840_v46  ;;  %v1791_v56 = vrot.slane %v6935_v15, 1  ;;  %v1918_v52 = vrot.slane %v6938_v16, 3 }
 0x192   : > { %1854 = vrot.lane.b32.xlu0 %v1839_v44, %s7953_s28  ;;  %v1919_v53 = vrot.slane %v6935_v15, 4  ;;  %v1879_v22 = vsel %vm1872_vm14, %v1875_v43, %v1878_v8  ;;  %v1784_v55 = vsel %vm1772_vm15, %v1779_v49, %v1783_v33  ;;  %v1787_v60 = vor.u32 %v6906_v54, %v1783_v33 }
 0x193   : > { %v1843_v62 = vsel %vm1832_vm13, %v1838_v23, %v1842_v14  ;;  %v1882_v61 = vor.u32 %v1881_v47, %v1880_v45  ;;  %v6967_v1 = vpack.c.bf16 %v1766_v36, %v1766_v36  ;;  %v1795_v9 = vor.u32 %v6938_v16, %v1791_v56 }
 0x194   : > { %v1920_v50 = vor.u32 %v1919_v53, %v1918_v52  ;;  %v1792_v3 = vsel %vm1772_vm15, %v1787_v60, %v1791_v56  ;;  %v1824_v44 = vrot.slane %v6899_v11, 1  ;;  %v1823_v33 = vrot.slane %v6931_v10, 1 }
 0x195   : > { %v1764_v48 = vld [vmem:[#allocation2 + $0x30] sm:$0xff]  ;;  %v1765_v38 = vld [vmem:[#allocation2 + $0x38] sm:$0xff]  ;;  %1892 = vrot.lane.b32.xlu1 %v1879_v22, %s7953_s28  ;;  %v1883_v4 = vsel %vm1872_vm14, %v1878_v8, %v1882_v61  ;;  %v1805_v26 = vshll.u32 %v6967_v1, 16  ;;  %v1848_v5 = vshrl.u32 %v6967_v1, 16  ;;  %v1902_v8 = vrot.slane %v6899_v11, 3 }
 0x196   : > { %v6954_v59 = vpack.c.bf16 %v1765_v38, %v1764_v48  ;;  %1809 = vrot.lane.b32.xlu0 %v1784_v55, %s7953_s28  ;;  %v1921_v40 = vsel %vm7951_vm12, %v1916_v21, %v1920_v50  ;;  %v1901_v45 = vrot.slane %v6931_v10, 3  ;;  %v1825_v38 = vsel %vm1822_vm0, %v1823_v33, %v1824_v44 }
 0x197   : > { %v1851_v15 = vrot.slane %v1805_v26, 2  ;;  %v1850_v23 = vrot.slane %v1848_v5, 1  ;;  %v1888_v25 = vrot.slane %v1848_v5, 2  ;;  %v1889_v27 = vrot.slane %v1805_v26, 3 }
 0x198   : > { %v1797_v58 = vshll.u32 %v6954_v59, 16  ;;  %v1801_v29 = vshrl.u32 %v6954_v59, 16  ;;  %v1926_v28 = vrot.slane %v1848_v5, 3  ;;  %v1927_v32 = vrot.slane %v1805_v26, 4 }
 0x199   : > { %1811 = vrot.lane.b32.xlu1 %v1792_v3, %s7953_s28  ;;  %v1852_v31 = vor.u32 %v1851_v15, %v1850_v23  ;;  %v1807_v46 = vrot.slane %v1805_v26, 1  ;;  %v1890_v41 = vor.u32 %v1889_v27, %v1888_v25  ;;  %v1903_v43 = vsel %vm1900_vm11, %v1901_v45, %v1902_v8 }
 0x19a   : > { %v1844_v63 = vrot.slane %v1801_v29, 1  ;;  %v1845_v0 = vrot.slane %v1797_v58, 2  ;;  %1856 = vrot.lane.b32.xlu0 %v1843_v62, %s7953_s28  ;;  %v1799_v54 = vrot.slane %v1797_v58, 1  ;;  %v1884_v2 = vrot.slane %v1801_v29, 2 }
 0x19b   : > { %v1885_v6 = vrot.slane %v1797_v58, 3  ;;  %v1922_v7 = vrot.slane %v1801_v29, 3  ;;  %v1923_v57 = vrot.slane %v1797_v58, 4  ;;  %v1928_v37 = vor.u32 %v1927_v32, %v1926_v28 }
 0x19c   : > { %v1846_v20 = vor.u32 %v1845_v0, %v1844_v63  ;;  %v1800_v18 = vsel %vm1772_vm15, %v1795_v9, %v1799_v54  ;;  %v1803_v13 = vor.u32 %v1801_v29, %v1799_v54  ;;  %v1864_v49 = vrot.slane %v6899_v11, 2 }
 0x19d   : > { %1894 = vrot.lane.b32.xlu1 %v1883_v4, %s7953_s28  ;;  %v1886_v19 = vor.u32 %v1885_v6, %v1884_v2  ;;  %v1924_v21 = vor.u32 %v1923_v57, %v1922_v7  ;;  %v1863_v52 = vrot.slane %v6931_v10, 2  ;;  %v1826_v58 = vrot.slane %v6913_v51, 1 }
 0x19e   : > { %1932 = vrot.lane.b32.xlu0 %v1921_v40, %s7953_s28  ;;  %v1847_v12 = vsel %vm1832_vm13, %v1842_v14, %v1846_v20  ;;  %v1808_v34 = vsel %vm1772_vm15, %v1803_v13, %v1807_v46  ;;  %v1853_v35 = vsel %vm1832_vm13, %v1846_v20, %v1852_v31  ;;  %v1904_v63 = vrot.slane %v6913_v51, 3 }
 0x19f   : > { %v1887_v30 = vsel %vm1872_vm14, %v1882_v61, %v1886_v19  ;;  %v1925_v16 = vsel %vm7951_vm12, %v1920_v50, %v1924_v21  ;;  %v1891_v39 = vsel %vm1872_vm14, %v1886_v19, %v1890_v41  ;;  %v1929_v42 = vsel %vm7951_vm12, %v1924_v21, %v1928_v37 }
 0x1a0   : > { %vm1862_vm12 = vcmask 1045504   ;;  %v1827_v61 = vsel %vm1822_vm0, %v1824_v44, %v1826_v58  ;;  %v1866_v0 = vrot.slane %v6913_v51, 2  ;;  %v1905_v20 = vsel %vm1900_vm11, %v1902_v8, %v1904_v63  ;;  %v7045_v44 = vld [vmem:[%s7964_s4] ss:$0 sm:$0xff] }
 0x1a1   : > { %1813 = vrot.lane.b32.xlu1 %v1800_v18, %s7953_s28  ;;  %v1865_v53 = vsel %vm1862_vm12, %v1863_v52, %v1864_v49  ;;  %v1906_v57 = vrot.slane %v6954_v59, 3  ;;  %v1868_v9 = vrot.slane %v6954_v59, 2  ;;  %v1830_v21 = vrot.slane %v6967_v1, 1 }
 0x1a2   : > { %1858 = vrot.lane.b32.xlu0 %v1847_v12, %s7953_s28  ;;  %v1867_v40 = vsel %vm1862_vm12, %v1864_v49, %v1866_v0  ;;  %v1870_v13 = vrot.slane %v6967_v1, 2  ;;  %v6258_v49 = vld [vmem:[%s7934_s5 + $0x40] sm:$0xff]  }
 0x1a3   : > { %v1907_v18 = vsel %vm1900_vm11, %v1904_v63, %v1906_v57  ;;  %v1869_v19 = vsel %vm1862_vm12, %v1866_v0, %v1868_v9  ;;  %5927 = vmatprep.subr.bf16.mxu1 %v6258_v49  ;;  %v6265_v63 = vld [vmem:[%s7934_s5 + $0x50] sm:$0xff]  }
 0x1a4   : > { %v6268_v0 = vld [vmem:[%s7934_s5 + $0xd0] sm:$0xff]  }
 0x1a5   : > { %1896 = vrot.lane.b32.xlu1 %v1887_v30, %s7953_s28 }
 0x1a6   : > { %1934 = vrot.lane.b32.xlu0 %v1925_v16, %s7953_s28  ;;  %v1908_v16 = vrot.slane %v6967_v1, 3 }
 0x1a9   : > { %1815 = vrot.lane.b32.xlu1 %v1808_v34, %s7953_s28  ;;  %v1909_v34 = vsel %vm1900_vm11, %v1906_v57, %v1908_v16  ;;  %v6270_v57 = vld [vmem:[%s7934_s5 + $0x90] sm:$0xff]  }
 0x1aa   : > { %1860 = vrot.lane.b32.xlu0 %v1853_v35, %s7953_s28  ;;  %v1871_v35 = vsel %vm1862_vm12, %v1868_v9, %v1870_v13 }
 0x1ad   : > { %1898 = vrot.lane.b32.xlu1 %v1891_v39, %s7953_s28 }
 0x1ae   : > { %1936 = vrot.lane.b32.xlu0 %v1929_v42, %s7953_s28 }
 0x203   : > { %v1931_v47 = vpop.permute.xlu1 %1930 }
 0x204   : > { %v1855_v48 = vpop.permute.xlu0 %1854  ;;  %v1984_v56 = vsel %vm1747_vm10, %v1903_v43, %v1931_v47 }
 0x205   : > { %v1952_v14 = vsel %vm1747_vm10, %v1825_v38, %v1855_v48  ;;  %2358 = vmatprep.mubr.bf16.mxu0 %v1984_v56  ;;  %v6260_v56 = vld [vmem:[%s7934_s5 + $0xc0] sm:$0xff]  }
 0x206   : > { %2293 = vmatprep.mubr.bf16.mxu1 %v1952_v14  ;;  %v6259_v14 = vld [vmem:[%s7934_s5] sm:$0xff]   ;;  %5955 = vmatprep.subr.bf16.mxu0 %v6260_v56 }
 0x207   : > { %v1893_v22 = vpop.permute.xlu1 %1892 }
 0x208   : > { %v1810_v55 = vpop.permute.xlu0 %1809  ;;  %v1968_v29 = vsel %vm1747_vm10, %v1865_v53, %v1893_v22 }
 0x209   : > { %v1939_v36 = vsel %vm1747_vm10, %v6931_v10, %v1810_v55  ;;  %2359 = vmatmul.mubr.bf16.vlgmr.msra.gmra.mrb[16].mxu0 %v1968_v29  ;;  %v1828_v10 = vrot.slane %v6954_v59, 1  ;;  %v6261_v55 = vld [vmem:[%s7934_s5 + $0x48] sm:$0xff]  }
 0x20a   : > { %2294 = vmatmul.mubr.bf16.vlgmr.msra.gmra.mrb[0].mxu1 %v1939_v36  ;;  %v6264_v29 = vld [vmem:[%s7934_s5 + $0xc8] sm:$0xff]  }
 0x20b   : > { %v1812_v60 = vpop.permute.xlu1 %1811  ;;  %v1829_v7 = vsel %vm1822_vm0, %v1826_v58, %v1828_v10  ;;  %v1831_v30 = vsel %vm1822_vm0, %v1828_v10, %v1830_v21  ;;  %v6262_v58 = vld [vmem:[%s7934_s5 + $0x80] sm:$0xff]   ;;  %5928 = vmatpush3.bf16.msra.mxu1 %v6259_v14 }
 0x20c   : > { %v1857_v62 = vpop.permute.xlu0 %1856  ;;  %v1942_v54 = vsel %vm1747_vm10, %v6899_v11, %v1812_v60  ;;  %5956 = vmatpush3.bf16.msra.mxu0 %v6262_v58  ;;  %5929 = vmatprep.subr.bf16.mxu1 %v6261_v55 }
 0x20d   : > { %v1956_v50 = vsel %vm1747_vm10, %v1827_v61, %v1857_v62  ;;  %v6263_v62 = vld [vmem:[%s7934_s5 + $0x8] sm:$0xff]   ;;  %5957 = vmatprep.subr.bf16.mxu0 %v6264_v29 }
 0x20e   : > { %2301 = vmatprep.mubr.bf16.mxu1 %v1956_v50  ;;  %v6266_v61 = vld [vmem:[%s7934_s5 + $0x88] sm:$0xff]  }
 0x20f   : > { %v1895_v3 = vpop.permute.xlu1 %1894  ;;  %5930 = vmatpush3.bf16.msra.mxu1 %v6263_v62 }
 0x210   : > { %v1933_v4 = vpop.permute.xlu0 %1932  ;;  %v1972_v5 = vsel %vm1747_vm10, %v1867_v40, %v1895_v3  ;;  %5958 = vmatpush3.bf16.msra.mxu0 %v6266_v61  ;;  %5931 = vmatprep.subr.bf16.mxu1 %v6265_v63 }
 0x211   : > { %v1988_v26 = vsel %vm1747_vm10, %v1905_v20, %v1933_v4  ;;  %5959 = vmatprep.subr.bf16.mxu0 %v6268_v0 }
 0x212   : > { %2302 = vmatmul.mubr.bf16.gmra.mrb[4].mxu1 %v1942_v54  ;;  %2366 = vmatprep.mubr.bf16.mxu0 %v1988_v26 }
 0x213   : > { %2367 = vmatmul.mubr.bf16.gmra.mrb[20].mxu0 %v1972_v5  ;;  %v1814_v2 = vpop.permute.xlu1 %1813 }
 0x214   : > { %v1859_v6 = vpop.permute.xlu0 %1858  ;;  %v1945_v23 = vsel %vm1747_vm10, %v6913_v51, %v1814_v2  ;;  %5960 = vmatpush3.bf16.msra.mxu0 %v6270_v57 }
 0x215   : > { %v1960_v12 = vsel %vm1747_vm10, %v1829_v7, %v1859_v6  ;;  %v6267_v7 = vld [vmem:[%s7934_s5 + $0x10] sm:$0xff]  }
 0x216   : > { %2309 = vmatprep.mubr.bf16.mxu1 %v1960_v12  ;;  %5932 = vmatpush3.bf16.msra.mxu1 %v6267_v7 }
 0x217   : > { %v1897_v15 = vpop.permute.xlu1 %1896 }
 0x218   : > { %v1935_v11 = vpop.permute.xlu0 %1934  ;;  %v1976_v27 = vsel %vm1747_vm10, %v1869_v19, %v1897_v15 }
 0x219   : > { %v1992_v25 = vsel %vm1747_vm10, %v1907_v18, %v1935_v11  ;;  %v6269_v11 = vld [vmem:[%s7934_s5 + $0x58] sm:$0xff]  }
 0x21a   : > { %2310 = vmatmul.mubr.bf16.gmra.mrb[8].mxu1 %v1945_v23  ;;  %2374 = vmatprep.mubr.bf16.mxu0 %v1992_v25  ;;  %v6272_v18 = vld [vmem:[%s7934_s5 + $0xd8] sm:$0xff]  }
 0x21b   : > { %2375 = vmatmul.mubr.bf16.gmra.mrb[24].mxu0 %v1976_v27  ;;  %v1816_v28 = vpop.permute.xlu1 %1815  ;;  %5933 = vmatprep.subr.bf16.mxu1 %v6269_v11 }
 0x21c   : > { %v1861_v32 = vpop.permute.xlu0 %1860  ;;  %v1948_v41 = vsel %vm1747_vm10, %v6954_v59, %v1816_v28  ;;  %5961 = vmatprep.subr.bf16.mxu0 %v6272_v18 }
 0x21d   : > { %v1964_v31 = vsel %vm1747_vm10, %v1831_v30, %v1861_v32 }
 0x21e   : > { %2317 = vmatprep.mubr.bf16.mxu1 %v1964_v31 }
 0x21f   : > { %v1899_v46 = vpop.permute.xlu1 %1898 }
 0x220   : > { %v1937_v51 = vpop.permute.xlu0 %1936  ;;  %v1980_v39 = vsel %vm1747_vm10, %v1871_v35, %v1899_v46  ;;  %v6274_v35 = vld [vmem:[%s7934_s5 + $0x98] sm:$0xff]  }
 0x221   : > { %v1996_v37 = vsel %vm1747_vm10, %v1909_v34, %v1937_v51  ;;  %v6271_v34 = vld [vmem:[%s7934_s5 + $0x18] sm:$0xff]   ;;  %5962 = vmatpush3.bf16.msra.mxu0 %v6274_v35 }
 0x222   : > { %2318 = vmatmul.mubr.bf16.gmra.mrb[12].mxu1 %v1948_v41  ;;  %2382 = vmatprep.mubr.bf16.mxu0 %v1996_v37 }
 0x223   : > { %2383 = vmatmul.mubr.bf16.gmra.mrb[28].mxu0 %v1980_v39  ;;  %5934 = vmatpush3.bf16.msra.mxu1 %v6271_v34 }
 0x2dc   : > { %v5903_v42 = vpop.f32.mrb[16].mxu0 }
 0x2dd   : > { %v5863_v1 = vpop.f32.mrb[0].mxu1  ;;  %v5904_v33 = vpop.f32.mrb[17].mxu0 }
 0x2de   : > { %v5864_v8 = vpop.f32.mrb[1].mxu1  ;;  %v5905_v47 = vadd.f32 %v5904_v33, %v5903_v42  ;;  %v5906_v59 = vpop.f32.mrb[18].mxu0  ;;  %v6273_v42 = vld [vmem:[%s7934_s5 + $0x60] sm:$0xff]  }
 0x2df   : > { %v5865_v45 = vadd.f32 %v5864_v8, %v5863_v1  ;;  %v5866_v48 = vpop.f32.mrb[2].mxu1  ;;  %v5907_v43 = vpop.f32.mrb[19].mxu0  ;;  %v6276_v8 = vld [vmem:[%s7934_s5 + $0xe0] sm:$0xff]   ;;  %5935 = vmatprep.subr.bf16.mxu1 %v6273_v42 }
 0x2e0   : > { %v5867_v38 = vpop.f32.mrb[3].mxu1  ;;  %v5908_v22 = vadd.f32 %v5907_v43, %v5906_v59  ;;  %5963 = vmatprep.subr.bf16.mxu0 %v6276_v8 }
 0x2e1   : > { %v2296_v52 = vadd.f32 %v5865_v45, %v7045_v44  ;;  %v5868_v53 = vadd.f32 %v5867_v38, %v5866_v48 }
 0x2e3   : > { %v2361_v36 = vadd.f32 %v5905_v47, %v2296_v52  ;;  %v2299_v60 = vadd.f32 %v5868_v53, %v7045_v44  ;;  %v6275_v53 = vld [vmem:[%s7934_s5 + $0x20] sm:$0xff]  }
 0x2e4   : > { %5936 = vmatpush3.bf16.msra.mxu1 %v6275_v53 }
 0x2e5   : > { %v2391_v50 = vmax.f32 %v2361_v36, 0.0  ;;  %v2364_v3 = vadd.f32 %v5908_v22, %v2299_v60  ;;  %v5869_v4 = vpop.f32.mrb[4].mxu1  ;;  %v6278_v22 = vld [vmem:[%s7934_s5 + $0xa0] sm:$0xff]  }
 0x2e6   : > { %v5870_v20 = vpop.f32.mrb[5].mxu1  ;;  %v5909_v40 = vpop.f32.mrb[20].mxu0  ;;  %5964 = vmatpush3.bf16.msra.mxu0 %v6278_v22  ;;  %v6283_v22 = vld [vmem:[%s7934_s5 + $0x30] sm:$0xff]  }
 0x2e7   : > { %v2407_v10 = vcombine.high %v2391_v50, %v2391_v50  ;;  %v2414_v54 = vrot.slane %v2391_v50, %v6570_v17  ;;  %v2392_v26 = vmax.f32 %v2364_v3, 0.0  ;;  %v5871_v5 = vadd.f32 %v5870_v20, %v5869_v4  ;;  %v5872_v2 = vpop.f32.mrb[6].mxu1  ;;  %v5910_v6 = vpop.f32.mrb[21].mxu0  ;;  %v6277_v20 = vld [vmem:[%s7934_s5 + $0x68] sm:$0xff]  }
 0x2e8   : > { %v7086_v9 = vadd.f32 %v5910_v6, %v5909_v40  ;;  %v5873_v12 = vpop.f32.mrb[7].mxu1  ;;  %v7088_v15 = vpop.f32.mrb[22].mxu0  ;;  %v6280_v40 = vld [vmem:[%s7934_s5 + $0xe8] sm:$0xff]   ;;  %5937 = vmatprep.subr.bf16.mxu1 %v6277_v20 }
 0x2e9   : > { %v2421_v19 = vrot.slane %v2407_v10, %v6570_v17  ;;  %v2422_v21 = vcombine.high %v2414_v54, %v2414_v54  ;;  %v2575_v23 = vsel %vm1163_vm2, %v2414_v54, -inf  ;;  %v2424_v25 = vcombine.high %v2392_v26, %v2392_v26  ;;  %v7098_v27 = vpop.f32.mrb[23].mxu0  ;;  %5965 = vmatprep.subr.bf16.mxu0 %v6280_v40 }
 0x2ea   : > { %v2576_v28 = vrot.slane %v2575_v23, 4  ;;  %v2431_v32 = vrot.slane %v2392_v26, %v6570_v17  ;;  %v7102_v30 = vadd.f32 %v5871_v5, %v7045_v44  ;;  %v7104_v16 = vadd.f32 %v5873_v12, %v5872_v2 }
 0x2eb   : > { %v2423_v13 = vcombine.high %v2421_v19, %v2421_v19  ;;  %v2582_v31 = vsel %vm1163_vm2, %v2422_v21, -inf  ;;  %v2589_v46 = vsel %vm1163_vm2, %v2421_v19, -inf  ;;  %v2438_v51 = vrot.slane %v2424_v25, %v6570_v17  ;;  %v6282_v25 = vld [vmem:[%s7934_s5 + $0xa8] sm:$0xff]  }
 0x2ec   : > { %v2577_v41 = vmax.f32 %v2575_v23, %v2576_v28  ;;  %v2583_v37 = vrot.slane %v2582_v31, 4  ;;  %v2590_v39 = vrot.slane %v2589_v46, 4  ;;  %v2439_v1 = vcombine.high %v2431_v32, %v2431_v32  ;;  %v6279_v23 = vld [vmem:[%s7934_s5 + $0x28] sm:$0xff]   ;;  %5966 = vmatpush3.bf16.msra.mxu0 %v6282_v25 }
 0x2ed   : > { %v2596_v33 = vsel %vm1163_vm2, %v2423_v13, -inf  ;;  %v2440_v45 = vcombine.high %v2438_v51, %v2438_v51  ;;  %v2603_v47 = vsel %vm1163_vm2, %v2431_v32, -inf  ;;  %v2617_v48 = vsel %vm1163_vm2, %v2438_v51, -inf  ;;  %v7124_v59 = vpop.f32.mrb[8].mxu1  ;;  %v6284_v51 = vld [vmem:[%s7934_s5 + $0xf0] sm:$0xff]   ;;  %5938 = vmatpush3.bf16.msra.mxu1 %v6279_v23 }
 0x2ee   : > { %v2578_v38 = vrot.slane %v2577_v41, 2  ;;  %v2584_v43 = vmax.f32 %v2582_v31, %v2583_v37  ;;  %v2591_v49 = vmax.f32 %v2589_v46, %v2590_v39  ;;  %v2597_v14 = vrot.slane %v2596_v33, 4  ;;  %v7126_v56 = vpop.f32.mrb[9].mxu1  ;;  %v7128_v52 = vpop.f32.mrb[24].mxu0  ;;  %v6281_v46 = vld [vmem:[%s7934_s5 + $0x70] sm:$0xff]   ;;  %5967 = vmatprep.subr.bf16.mxu0 %v6284_v51 }
 0x2ef   : > { %v2604_v55 = vrot.slane %v2603_v47, 4  ;;  %v2610_v58 = vsel %vm1163_vm2, %v2439_v1, -inf  ;;  %v2618_v29 = vrot.slane %v2617_v48, 4  ;;  %v2624_v36 = vsel %vm1163_vm2, %v2440_v45, -inf  ;;  %v7138_v60 = vpop.f32.mrb[10].mxu1  ;;  %v7140_v62 = vpop.f32.mrb[25].mxu0  ;;  %5939 = vmatprep.subr.bf16.mxu1 %v6281_v46 }
 0x2f0   : > { %v2579_v61 = vmax.f32 %v2577_v41, %v2578_v38  ;;  %v2585_v63 = vrot.slane %v2584_v43, 2  ;;  %v2592_v0 = vrot.slane %v2591_v49, 2  ;;  %v2598_v50 = vmax.f32 %v2596_v33, %v2597_v14  ;;  %v7142_v3 = vpop.f32.mrb[11].mxu1  ;;  %v7144_v4 = vpop.f32.mrb[26].mxu0 }
 0x2f1   : > { %v2605_v10 = vmax.f32 %v2603_v47, %v2604_v55  ;;  %v2611_v54 = vrot.slane %v2610_v58, 4  ;;  %v2619_v26 = vmax.f32 %v2617_v48, %v2618_v29  ;;  %v2625_v5 = vrot.slane %v2624_v36, 4  ;;  %v7152_v2 = vpop.f32.mrb[27].mxu0  ;;  %5940 = vmatpush3.bf16.msra.mxu1 %v6283_v22 }
 0x2f2   : > { %v2580_v6 = vrot.slane %v2579_v61, 1  ;;  %v2586_v7 = vmax.f32 %v2584_v43, %v2585_v63  ;;  %v2593_v57 = vmax.f32 %v2591_v49, %v2592_v0  ;;  %v2599_v12 = vrot.slane %v2598_v50, 2 }
 0x2f3   : > { %v2606_v11 = vrot.slane %v2605_v10, 2  ;;  %v2612_v18 = vmax.f32 %v2610_v58, %v2611_v54  ;;  %v2620_v19 = vrot.slane %v2619_v26, 2  ;;  %v2626_v21 = vmax.f32 %v2624_v36, %v2625_v5 }
 0x2f4   : > { %v2581_v28 = vmax.f32 %v2579_v61, %v2580_v6  ;;  %v2587_v32 = vrot.slane %v2586_v7, 1  ;;  %v2594_v13 = vrot.slane %v2593_v57, 1  ;;  %v2600_v31 = vmax.f32 %v2598_v50, %v2599_v12 }
 0x2f5   : > { %v2607_v34 = vmax.f32 %v2605_v10, %v2606_v11  ;;  %v2613_v35 = vrot.slane %v2612_v18, 2  ;;  %v2621_v41 = vmax.f32 %v2619_v26, %v2620_v19  ;;  %v2627_v37 = vrot.slane %v2626_v21, 2  ;;  %v7166_v39 = vpop.f32.mrb[12].mxu1 }
 0x2f6   : > { %v2588_v1 = vmax.f32 %v2586_v7, %v2587_v32  ;;  %v2595_v42 = vmax.f32 %v2593_v57, %v2594_v13  ;;  %v2601_v8 = vrot.slane %v2600_v31, 1  ;;  %v2369_v33 = vadd.f32 %v7086_v9, %v7102_v30  ;;  %v7170_v45 = vpop.f32.mrb[13].mxu1  ;;  %v7172_v47 = vpop.f32.mrb[28].mxu0 }
 0x2f7   : > { %v2608_v48 = vrot.slane %v2607_v34, 1  ;;  %v2614_v38 = vmax.f32 %v2612_v18, %v2613_v35  ;;  %v2622_v43 = vrot.slane %v2621_v41, 1  ;;  %v2628_v49 = vmax.f32 %v2626_v21, %v2627_v37  ;;  %v7174_v14 = vpop.f32.mrb[14].mxu1  ;;  %v7176_v53 = vpop.f32.mrb[29].mxu0 }
 0x2f8   : > { %v2602_v55 = vmax.f32 %v2600_v31, %v2601_v8  ;;  %v2831_v9 = vsel %vm1676_vm3, %v2588_v1, %v2581_v28  ;;  %v2393_v30 = vmax.f32 %v2369_v33, 0.0  ;;  %v2307_v58 = vadd.f32 %v7104_v16, %v7045_v44  ;;  %v7184_v29 = vpop.f32.mrb[15].mxu1  ;;  %v7186_v36 = vpop.f32.mrb[30].mxu0 }
 0x2f9   : > { %v2832_v61 = vsel %vm1678_vm4, %v2595_v42, %v2831_v9  ;;  %v2609_v63 = vmax.f32 %v2607_v34, %v2608_v48  ;;  %v2615_v0 = vrot.slane %v2614_v38, 1  ;;  %v2623_v50 = vmax.f32 %v2621_v41, %v2622_v43  ;;  %v7189_v20 = vpop.f32.mrb[31].mxu0 }
 0x2fa   : > { %v2629_v40 = vrot.slane %v2628_v49, 1  ;;  %v2833_v10 = vsel %vm1680_vm5, %v2602_v55, %v2832_v61  ;;  %v2441_v54 = vcombine.high %v2393_v30, %v2393_v30  ;;  %v2448_v26 = vrot.slane %v2393_v30, %v6570_v17 }
 0x2fb   : > { %v2616_v16 = vmax.f32 %v2614_v38, %v2615_v0  ;;  %v2834_v5 = vsel %vm1682_vm6, %v2609_v63, %v2833_v10  ;;  %v5914_v6 = vadd.f32 %v7098_v27, %v7088_v15  ;;  %v5877_v7 = vadd.f32 %v7126_v56, %v7124_v59 }
 0x2fc   : > { %v2630_v57 = vmax.f32 %v2628_v49, %v2629_v40  ;;  %v2455_v12 = vrot.slane %v2441_v54, %v6570_v17  ;;  %v2456_v11 = vcombine.high %v2448_v26, %v2448_v26  ;;  %v2631_v18 = vsel %vm1163_vm2, %v2448_v26, -inf }
 0x2fd   : > { %v2835_v19 = vsel %vm1684_vm7, %v2616_v16, %v2834_v5  ;;  %v2632_v21 = vrot.slane %v2631_v18, 4  ;;  %v2372_v23 = vadd.f32 %v5914_v6, %v2307_v58  ;;  %v2312_v25 = vadd.f32 %v5877_v7, %v7045_v44 }
 0x2fe   : > { %v2836_v28 = vsel %vm1686_vm8, %v2623_v50, %v2835_v19  ;;  %v2457_v32 = vcombine.high %v2455_v12, %v2455_v12  ;;  %v2638_v15 = vsel %vm1163_vm2, %v2456_v11, -inf  ;;  %v2645_v27 = vsel %vm1163_vm2, %v2455_v12, -inf }
 0x2ff   : > { %v2837_v59 = vsel %vm1688_vm9, %v2630_v57, %v2836_v28  ;;  %v2633_v56 = vmax.f32 %v2631_v18, %v2632_v21  ;;  %v2639_v13 = vrot.slane %v2638_v15, 4  ;;  %v2646_v31 = vrot.slane %v2645_v27, 4 }
 0x300   : > { %2863 = vst.msk [vmem:[#allocation2 + $0x3] sm:$0xff] %vm1747_vm10, %v2837_v59  ;;  %v2652_v46 = vsel %vm1163_vm2, %v2457_v32, -inf  ;;  %v2394_v51 = vmax.f32 %v2372_v23, 0.0  ;;  %v5917_v34 = vadd.f32 %v7140_v62, %v7128_v52  ;;  %v5880_v35 = vadd.f32 %v7142_v3, %v7138_v60 }
 0x301   : > { %v2634_v41 = vrot.slane %v2633_v56, 2  ;;  %v2640_v37 = vmax.f32 %v2638_v15, %v2639_v13  ;;  %v2647_v1 = vmax.f32 %v2645_v27, %v2646_v31  ;;  %v2653_v42 = vrot.slane %v2652_v46, 4 }
 0x302   : > { %v2458_v8 = vcombine.high %v2394_v51, %v2394_v51  ;;  %v2465_v33 = vrot.slane %v2394_v51, %v6570_v17  ;;  %v2377_v48 = vadd.f32 %v5917_v34, %v2312_v25  ;;  %v7214_v38 = vadd.f32 %v5880_v35, %v7045_v44 }
 0x303   : > { %v2635_v43 = vmax.f32 %v2633_v56, %v2634_v41  ;;  %v2641_v49 = vrot.slane %v2640_v37, 2  ;;  %v2648_v22 = vrot.slane %v2647_v1, 2  ;;  %v2654_v55 = vmax.f32 %v2652_v46, %v2653_v42 }
 0x304   : > { %v2472_v52 = vrot.slane %v2458_v8, %v6570_v17  ;;  %v2473_v62 = vcombine.high %v2465_v33, %v2465_v33  ;;  %v2659_v60 = vsel %vm1163_vm2, %v2465_v33, -inf  ;;  %v2395_v3 = vmax.f32 %v2377_v48, 0.0 }
 0x305   : > { %v2636_v9 = vrot.slane %v2635_v43, 1  ;;  %v2642_v30 = vmax.f32 %v2640_v37, %v2641_v49  ;;  %v2649_v58 = vmax.f32 %v2647_v1, %v2648_v22  ;;  %v2655_v61 = vrot.slane %v2654_v55, 2 }
 0x306   : > { %v2474_v63 = vcombine.high %v2472_v52, %v2472_v52  ;;  %v2660_v0 = vrot.slane %v2659_v60, 4  ;;  %v2666_v50 = vsel %vm1163_vm2, %v2473_v62, -inf  ;;  %v2673_v40 = vsel %vm1163_vm2, %v2472_v52, -inf }
 0x307   : > { %v2637_v10 = vmax.f32 %v2635_v43, %v2636_v9  ;;  %v2643_v54 = vrot.slane %v2642_v30, 1  ;;  %v2650_v26 = vrot.slane %v2649_v58, 1  ;;  %v2656_v16 = vmax.f32 %v2654_v55, %v2655_v61 }
 0x308   : > { %v2661_v5 = vmax.f32 %v2659_v60, %v2660_v0  ;;  %v2667_v6 = vrot.slane %v2666_v50, 4  ;;  %v2674_v7 = vrot.slane %v2673_v40, 4  ;;  %v2680_v57 = vsel %vm1163_vm2, %v2474_v63, -inf }
 0x309   : > { %v2644_v12 = vmax.f32 %v2642_v30, %v2643_v54  ;;  %v2651_v11 = vmax.f32 %v2649_v58, %v2650_v26  ;;  %v2657_v18 = vrot.slane %v2656_v16, 1  ;;  %v2681_v19 = vrot.slane %v2680_v57, 4 }
 0x30a   : > { %v2662_v21 = vrot.slane %v2661_v5, 2  ;;  %v2668_v23 = vmax.f32 %v2666_v50, %v2667_v6  ;;  %v2675_v25 = vmax.f32 %v2673_v40, %v2674_v7  ;;  %v2475_v28 = vcombine.high %v2395_v3, %v2395_v3 }
 0x30b   : > { %v2658_v32 = vmax.f32 %v2656_v16, %v2657_v18  ;;  %v2838_v15 = vsel %vm1676_vm3, %v2644_v12, %v2637_v10  ;;  %v2682_v27 = vmax.f32 %v2680_v57, %v2681_v19  ;;  %v2482_v59 = vrot.slane %v2395_v3, %v6570_v17 }
 0x30c   : > { %v2839_v56 = vsel %vm1678_vm4, %v2651_v11, %v2838_v15  ;;  %v2663_v13 = vmax.f32 %v2661_v5, %v2662_v21  ;;  %v2669_v31 = vrot.slane %v2668_v23, 2  ;;  %v2676_v46 = vrot.slane %v2675_v25, 2 }
 0x30d   : > { %v2683_v51 = vrot.slane %v2682_v27, 2  ;;  %v2840_v34 = vsel %vm1680_vm5, %v2658_v32, %v2839_v56  ;;  %v2489_v35 = vrot.slane %v2475_v28, %v6570_v17  ;;  %v2490_v41 = vcombine.high %v2482_v59, %v2482_v59 }
 0x30e   : > { %v2664_v37 = vrot.slane %v2663_v13, 1  ;;  %v2670_v1 = vmax.f32 %v2668_v23, %v2669_v31  ;;  %v2677_v42 = vmax.f32 %v2675_v25, %v2676_v46  ;;  %v2687_v8 = vsel %vm1163_vm2, %v2482_v59, -inf }
 0x30f   : > { %v2684_v33 = vmax.f32 %v2682_v27, %v2683_v51  ;;  %v2491_v48 = vcombine.high %v2489_v35, %v2489_v35  ;;  %v2688_v43 = vrot.slane %v2687_v8, 4  ;;  %v2694_v49 = vsel %vm1163_vm2, %v2490_v41, -inf }
 0x310   : > { %v2665_v22 = vmax.f32 %v2663_v13, %v2664_v37  ;;  %v2671_v55 = vrot.slane %v2670_v1, 1  ;;  %v2678_v52 = vrot.slane %v2677_v42, 1  ;;  %v2695_v62 = vrot.slane %v2694_v49, 4 }
 0x311   : > { %v2685_v60 = vrot.slane %v2684_v33, 1  ;;  %v2689_v3 = vmax.f32 %v2687_v8, %v2688_v43  ;;  %v2701_v9 = vsel %vm1163_vm2, %v2489_v35, -inf  ;;  %v2708_v30 = vsel %vm1163_vm2, %v2491_v48, -inf }
 0x312   : > { %v2672_v58 = vmax.f32 %v2670_v1, %v2671_v55  ;;  %v2679_v61 = vmax.f32 %v2677_v42, %v2678_v52  ;;  %v2841_v63 = vsel %vm1682_vm6, %v2665_v22, %v2840_v34  ;;  %v2696_v0 = vmax.f32 %v2694_v49, %v2695_v62 }
 0x313   : > { %v2686_v50 = vmax.f32 %v2684_v33, %v2685_v60  ;;  %v2690_v40 = vrot.slane %v2689_v3, 2  ;;  %v2702_v10 = vrot.slane %v2701_v9, 4  ;;  %v2709_v54 = vrot.slane %v2708_v30, 4 }
 0x314   : > { %v2842_v26 = vsel %vm1684_vm7, %v2672_v58, %v2841_v63  ;;  %v2697_v16 = vrot.slane %v2696_v0, 2  ;;  %v5920_v5 = vadd.f32 %v7152_v2, %v7144_v4  ;;  %v5883_v6 = vadd.f32 %v7170_v45, %v7166_v39 }
 0x315   : > { %v2843_v7 = vsel %vm1686_vm8, %v2679_v61, %v2842_v26  ;;  %v2691_v57 = vmax.f32 %v2689_v3, %v2690_v40  ;;  %v2703_v12 = vmax.f32 %v2701_v9, %v2702_v10  ;;  %v2710_v11 = vmax.f32 %v2708_v30, %v2709_v54 }
 0x316   : > { %v2844_v18 = vsel %vm1688_vm9, %v2686_v50, %v2843_v7  ;;  %v2698_v19 = vmax.f32 %v2696_v0, %v2697_v16  ;;  %v2380_v21 = vadd.f32 %v5920_v5, %v7214_v38  ;;  %v2320_v23 = vadd.f32 %v5883_v6, %v7045_v44 }
 0x317   : > { %2864 = vst.msk [vmem:[#allocation2 + $0xb] sm:$0xff] %vm1747_vm10, %v2844_v18  ;;  %v2692_v25 = vrot.slane %v2691_v57, 1  ;;  %v2704_v28 = vrot.slane %v2703_v12, 2  ;;  %v2711_v4 = vrot.slane %v2710_v11, 2  ;;  %v5923_v2 = vadd.f32 %v7176_v53, %v7172_v47 }
 0x318   : > { %v2699_v39 = vrot.slane %v2698_v19, 1  ;;  %v2396_v45 = vmax.f32 %v2380_v21, 0.0  ;;  %v5886_v32 = vadd.f32 %v7184_v29, %v7174_v14  ;;  %v7247_v15 = vadd.f32 %v7189_v20, %v7186_v36 }
 0x319   : > { %v2693_v38 = vmax.f32 %v2691_v57, %v2692_v25  ;;  %v2705_v27 = vmax.f32 %v2703_v12, %v2704_v28  ;;  %v2712_v59 = vmax.f32 %v2710_v11, %v2711_v4  ;;  %v2385_v56 = vadd.f32 %v5923_v2, %v2320_v23 }
 0x31a   : > { %v2700_v13 = vmax.f32 %v2698_v19, %v2699_v39  ;;  %v2492_v31 = vcombine.high %v2396_v45, %v2396_v45  ;;  %v2499_v46 = vrot.slane %v2396_v45, %v6570_v17  ;;  %v7251_v51 = vadd.f32 %v5886_v32, %v7045_v44 }
 0x31b   : > { %v2706_v47 = vrot.slane %v2705_v27, 1  ;;  %v2713_v53 = vrot.slane %v2712_v59, 1  ;;  %v2397_v34 = vmax.f32 %v2385_v56, 0.0 }
 0x31c   : > { %v2845_v14 = vsel %vm1676_vm3, %v2700_v13, %v2693_v38  ;;  %v2506_v29 = vrot.slane %v2492_v31, %v6570_v17  ;;  %v2507_v36 = vcombine.high %v2499_v46, %v2499_v46  ;;  %v2715_v20 = vsel %vm1163_vm2, %v2499_v46, -inf }
 0x31d   : > { %v2707_v35 = vmax.f32 %v2705_v27, %v2706_v47  ;;  %v2714_v41 = vmax.f32 %v2712_v59, %v2713_v53  ;;  %v2716_v37 = vrot.slane %v2715_v20, 4  ;;  %v2509_v1 = vcombine.high %v2397_v34, %v2397_v34 }
 0x31e   : > { %v2508_v42 = vcombine.high %v2506_v29, %v2506_v29  ;;  %v2722_v8 = vsel %vm1163_vm2, %v2507_v36, -inf  ;;  %v2729_v44 = vsel %vm1163_vm2, %v2506_v29, -inf  ;;  %v2516_v33 = vrot.slane %v2397_v34, %v6570_v17 }
 0x31f   : > { %v2846_v48 = vsel %vm1678_vm4, %v2707_v35, %v2845_v14  ;;  %v2717_v43 = vmax.f32 %v2715_v20, %v2716_v37  ;;  %v2723_v49 = vrot.slane %v2722_v8, 4  ;;  %v2730_v22 = vrot.slane %v2729_v44, 4 }
 0x320   : > { %v2736_v55 = vsel %vm1163_vm2, %v2508_v42, -inf  ;;  %v2847_v52 = vsel %vm1680_vm5, %v2714_v41, %v2846_v48  ;;  %v2523_v62 = vrot.slane %v2509_v1, %v6570_v17  ;;  %v2524_v60 = vcombine.high %v2516_v33, %v2516_v33 }
 0x321   : > { %v2718_v3 = vrot.slane %v2717_v43, 2  ;;  %v2724_v9 = vmax.f32 %v2722_v8, %v2723_v49  ;;  %v2731_v30 = vmax.f32 %v2729_v44, %v2730_v22  ;;  %v2737_v58 = vrot.slane %v2736_v55, 4 }
 0x322   : > { %v2525_v61 = vcombine.high %v2523_v62, %v2523_v62  ;;  %v2743_v63 = vsel %vm1163_vm2, %v2516_v33, -inf  ;;  %v2750_v0 = vsel %vm1163_vm2, %v2524_v60, -inf  ;;  %v2757_v50 = vsel %vm1163_vm2, %v2523_v62, -inf }
 0x323   : > { %v2719_v40 = vmax.f32 %v2717_v43, %v2718_v3  ;;  %v2725_v10 = vrot.slane %v2724_v9, 2  ;;  %v2732_v54 = vrot.slane %v2731_v30, 2  ;;  %v2738_v26 = vmax.f32 %v2736_v55, %v2737_v58 }
 0x324   : > { %v2744_v16 = vrot.slane %v2743_v63, 4  ;;  %v2751_v5 = vrot.slane %v2750_v0, 4  ;;  %v2758_v6 = vrot.slane %v2757_v50, 4  ;;  %v2764_v7 = vsel %vm1163_vm2, %v2525_v61, -inf }
 0x325   : > { %v2720_v57 = vrot.slane %v2719_v40, 1  ;;  %v2726_v12 = vmax.f32 %v2724_v9, %v2725_v10  ;;  %v2733_v11 = vmax.f32 %v2731_v30, %v2732_v54  ;;  %v2739_v18 = vrot.slane %v2738_v26, 2 }
 0x326   : > { %v2745_v19 = vmax.f32 %v2743_v63, %v2744_v16  ;;  %v2752_v21 = vmax.f32 %v2750_v0, %v2751_v5  ;;  %v2759_v23 = vmax.f32 %v2757_v50, %v2758_v6  ;;  %v2765_v25 = vrot.slane %v2764_v7, 4 }
 0x327   : > { %v2721_v28 = vmax.f32 %v2719_v40, %v2720_v57  ;;  %v2727_v4 = vrot.slane %v2726_v12, 1  ;;  %v2734_v2 = vrot.slane %v2733_v11, 1  ;;  %v2740_v39 = vmax.f32 %v2738_v26, %v2739_v18 }
 0x328   : > { %v2746_v45 = vrot.slane %v2745_v19, 2  ;;  %v2753_v32 = vrot.slane %v2752_v21, 2  ;;  %v2766_v38 = vmax.f32 %v2764_v7, %v2765_v25  ;;  %v2760_v13 = vrot.slane %v2759_v23, 2 }
 0x329   : > { %v2728_v27 = vmax.f32 %v2726_v12, %v2727_v4  ;;  %v2741_v59 = vrot.slane %v2740_v39, 1  ;;  %v2848_v56 = vsel %vm1682_vm6, %v2721_v28, %v2847_v52  ;;  %v2735_v31 = vmax.f32 %v2733_v11, %v2734_v2 }
 0x32a   : > { %v2754_v46 = vmax.f32 %v2752_v21, %v2753_v32  ;;  %v2388_v34 = vadd.f32 %v7247_v15, %v7251_v51  ;;  %v2747_v29 = vmax.f32 %v2745_v19, %v2746_v45  ;;  %v2767_v36 = vrot.slane %v2766_v38, 2  ;;  %v2869_v45 = vld [vmem:[#allocation2 + $0x8] sm:$0xff] }
 0x32b   : > { %v2742_v47 = vmax.f32 %v2740_v39, %v2741_v59  ;;  %v2849_v53 = vsel %vm1684_vm7, %v2728_v27, %v2848_v56  ;;  %v2761_v35 = vmax.f32 %v2759_v23, %v2760_v13  ;;  %v2868_v56 = vld [vmem:[#allocation2] sm:$0xff] }
 0x32c   : > { %v2850_v14 = vsel %vm1686_vm8, %v2735_v31, %v2849_v53  ;;  %v2398_v41 = vmax.f32 %v2388_v34, 0.0  ;;  %v2755_v37 = vrot.slane %v2754_v46, 1  ;;  %v2748_v8 = vrot.slane %v2747_v29, 1  ;;  %v6285_v53 = vld [vmem:[%s7934_s5 + $0x78] sm:$0xff]   ;;  %v6286_v34 = vld [vmem:[%s7934_s5 + $0xb0] sm:$0xff]  }
 0x32d   : > { %v2851_v20 = vsel %vm1688_vm9, %v2742_v47, %v2850_v14  ;;  %v2768_v44 = vmax.f32 %v2766_v38, %v2767_v36  ;;  %v2762_v33 = vrot.slane %v2761_v35, 1  ;;  %v7288_v31 = vpack.c.bf16 %v2869_v45, %v2868_v56  ;;  %v6287_v14 = vld [vmem:[%s7934_s5 + $0x38] sm:$0xff]   ;;  %5941 = vmatprep.subr.bf16.mxu1 %v6285_v53  ;;  %5968 = vmatpush3.bf16.msra.mxu0 %v6286_v34 }
 0x32e   : > { %2865 = vst.msk [vmem:[#allocation2 + $0x13] sm:$0xff] %vm1747_vm10, %v2851_v20  ;;  %v2526_v1 = vcombine.high %v2398_v41, %v2398_v41  ;;  %v2533_v42 = vrot.slane %v2398_v41, %v6570_v17  ;;  %v2756_v51 = vmax.f32 %v2754_v46, %v2755_v37  ;;  %v2749_v62 = vmax.f32 %v2747_v29, %v2748_v8  ;;  %v6288_v36 = vld [vmem:[%s7934_s5 + $0xf8] sm:$0xff]  }
 0x32f   : > { %v2769_v60 = vrot.slane %v2768_v44, 1  ;;  %v2763_v58 = vmax.f32 %v2761_v35, %v2762_v33  ;;  %v2879_v47 = vshll.u32 %v7288_v31, 16  ;;  %v2877_v29 = vshrl.u32 %v7288_v31, 16  ;;  %5942 = vmatpush3.bf16.msra.mxu1 %v6287_v14  ;;  %v6289_v35 = vld [vmem:[%s7934_s5 + $0xb8] sm:$0xff]   ;;  %5969 = vmatprep.subr.bf16.mxu0 %v6288_v36 }
 0x330   : > { %v2540_v48 = vrot.slane %v2526_v1, %v6570_v17  ;;  %v2541_v15 = vcombine.high %v2533_v42, %v2533_v42  ;;  %v2771_v43 = vsel %vm1163_vm2, %v2533_v42, -inf  ;;  %v2852_v0 = vsel %vm1676_vm3, %v2756_v51, %v2749_v62 }
 0x331   : > { %v2772_v22 = vrot.slane %v2771_v43, 4  ;;  %v2770_v26 = vmax.f32 %v2768_v44, %v2769_v60  ;;  %v2853_v7 = vsel %vm1678_vm4, %v2763_v58, %v2852_v0  ;;  %v2881_v20 = vrot.slane %v2879_v47, 1  ;;  %5970 = vmatpush3.bf16.msra.mxu0 %v6289_v35 }
 0x332   : > { %v2542_v49 = vcombine.high %v2540_v48, %v2540_v48  ;;  %v2778_v55 = vsel %vm1163_vm2, %v2541_v15, -inf  ;;  %v2785_v52 = vsel %vm1163_vm2, %v2540_v48, -inf  ;;  %v2908_v8 = vrot.slane %v2877_v29, 1 }
 0x333   : > { %v2779_v3 = vrot.slane %v2778_v55, 4  ;;  %v2786_v9 = vrot.slane %v2785_v52, 4  ;;  %v2773_v61 = vmax.f32 %v2771_v43, %v2772_v22  ;;  %v2854_v28 = vsel %vm1680_vm5, %v2770_v26, %v2853_v7 }
 0x334   : > { %v2792_v63 = vsel %vm1163_vm2, %v2542_v49, -inf  ;;  %v2909_v44 = vrot.slane %v2879_v47, 2  ;;  %v2882_v33 = vor.u32 %v2881_v20, %v2877_v29  ;;  %v2930_v51 = vrot.slane %v2877_v29, 2 }
 0x335   : > { %v2870_v30 = vld [vmem:[#allocation2 + $0x10] sm:$0xff]  ;;  %v2780_v50 = vmax.f32 %v2778_v55, %v2779_v3  ;;  %v2787_v40 = vmax.f32 %v2785_v52, %v2786_v9  ;;  %v2793_v10 = vrot.slane %v2792_v63, 4  ;;  %v2774_v54 = vrot.slane %v2773_v61, 2 }
 0x336   : > { %3594 = vst.msk [vmem:[#allocation2 + $0x13] sm:$0xf] %vm7952_vm1, %v6436_v24  ;;  %v2931_v43 = vrot.slane %v2879_v47, 3  ;;  %v2950_v49 = vrot.slane %v2877_v29, 3  ;;  %v2910_v0 = vor.u32 %v2909_v44, %v2908_v8  ;;  %vm7965_vm1 = vsmask.f32 4352 }
 0x337   : > { %v2781_v16 = vrot.slane %v2780_v50, 2  ;;  %v2788_v5 = vrot.slane %v2787_v40, 2  ;;  %v2794_v6 = vmax.f32 %v2792_v63, %v2793_v10  ;;  %v2775_v57 = vmax.f32 %v2773_v61, %v2774_v54 }
 0x338   : > { %v2945_v29 = vrot.slane %v7288_v31, 3  ;;  %v2925_v36 = vrot.slane %v7288_v31, 2 }
 0x339   : > { %v2782_v12 = vmax.f32 %v2780_v50, %v2781_v16  ;;  %v2789_v11 = vmax.f32 %v2787_v40, %v2788_v5  ;;  %v2795_v18 = vrot.slane %v2794_v6, 2  ;;  %v2776_v19 = vrot.slane %v2775_v57, 1 }
 0x33a   : > { %v2932_v40 = vor.u32 %v2931_v43, %v2930_v51 }
 0x33b   : > { %v2783_v21 = vrot.slane %v2782_v12, 1  ;;  %v2790_v23 = vrot.slane %v2789_v11, 1  ;;  %v2796_v25 = vmax.f32 %v2794_v6, %v2795_v18  ;;  %v2777_v4 = vmax.f32 %v2775_v57, %v2776_v19 }
 0x33d   : > { %v2784_v2 = vmax.f32 %v2782_v12, %v2783_v21  ;;  %v2797_v39 = vrot.slane %v2796_v25, 1  ;;  %v2791_v32 = vmax.f32 %v2789_v11, %v2790_v23  ;;  %v2855_v38 = vsel %vm1682_vm6, %v2777_v4, %v2854_v28 }
 0x33f   : > { %v2798_v27 = vmax.f32 %v2796_v25, %v2797_v39  ;;  %v2856_v59 = vsel %vm1684_vm7, %v2784_v2, %v2855_v38 }
 0x340   : > { %v2857_v13 = vsel %vm1686_vm8, %v2791_v32, %v2856_v59  ;;  %v2903_v59 = vrot.slane %v7288_v31, 1 }
 0x341   : > { %v2858_v46 = vsel %vm1688_vm9, %v2798_v27, %v2857_v13 }
 0x342   : > { %2866 = vst.msk [vmem:[#allocation2 + $0x1b] sm:$0xff] %vm1747_vm10, %v2858_v46 }
 0x349   : > { %v2871_v41 = vld [vmem:[#allocation2 + $0x18] sm:$0xff]  ;;  %v2872_v37 = vld [vmem:[#allocation2 + $0x20] sm:$0x7f] }
 0x34a   : > { %v7309_v1 = vpack.c.bf16 %v2871_v41, %v2870_v30  ;;  %v7311_v42 = vpack.c.bf16 %v2872_v37, %v2872_v37  ;;  %v2951_v30 = vrot.slane %v2879_v47, 4 }
 0x34c   : > { %v2884_v48 = vshll.u32 %v7309_v1, 16  ;;  %v2888_v15 = vshrl.u32 %v7309_v1, 16  ;;  %v2892_v22 = vshll.u32 %v7311_v42, 16  ;;  %v2915_v55 = vshrl.u32 %v7311_v42, 16 }
 0x34d   : > { %v2952_v6 = vor.u32 %v2951_v30, %v2950_v49  ;;  %v2904_v38 = vrot.slane %v7309_v1, 1  ;;  %v2946_v46 = vrot.slane %v7309_v1, 3  ;;  %v2926_v53 = vrot.slane %v7309_v1, 2  ;;  %v6293_v30 = vld [vmem:[%s7936_s7 + $0xc0] sm:$0xff]  }
 0x34e   : > { %v2886_v52 = vrot.slane %v2884_v48, 1  ;;  %v2911_v62 = vrot.slane %v2888_v15, 1  ;;  %v2912_v60 = vrot.slane %v2884_v48, 2  ;;  %v2933_v3 = vrot.slane %v2888_v15, 2  ;;  %6005 = vmatprep.subr.bf16.mxu0 %v6293_v30 }
 0x34f   : > { %v2934_v9 = vrot.slane %v2884_v48, 3  ;;  %v2953_v58 = vrot.slane %v2888_v15, 3  ;;  %v2954_v61 = vrot.slane %v2884_v48, 4  ;;  %v2917_v16 = vrot.slane %v2915_v55, 1 }
 0x350   : > { %v2887_v63 = vsel %vm1772_vm15, %v2882_v33, %v2886_v52  ;;  %v2913_v50 = vor.u32 %v2912_v60, %v2911_v62  ;;  %v2918_v5 = vrot.slane %v2892_v22, 2  ;;  %v2890_v57 = vor.u32 %v2888_v15, %v2886_v52 }
 0x351   : > { %2896 = vrot.lane.b32.xlu1 %v2887_v63, %s7953_s28  ;;  %v2935_v10 = vor.u32 %v2934_v9, %v2933_v3  ;;  %v2955_v26 = vor.u32 %v2954_v61, %v2953_v58  ;;  %v2937_v12 = vrot.slane %v2915_v55, 2  ;;  %v2938_v11 = vrot.slane %v2892_v22, 3  ;;  %v6292_v9 = vld [vmem:[%s7936_s7 + $0x48] sm:$0xff]   ;;  %v6295_v58 = vld [vmem:[%s7936_s7 + $0x80] sm:$0xff]  }
 0x352   : > { %v2914_v54 = vsel %vm1832_vm13, %v2910_v0, %v2913_v50  ;;  %v2894_v18 = vrot.slane %v2892_v22, 1  ;;  %v2919_v21 = vor.u32 %v2918_v5, %v2917_v16  ;;  %v2957_v23 = vrot.slane %v2915_v55, 3  ;;  %v6297_v61 = vld [vmem:[%s7936_s7 + $0xc8] sm:$0xff]   ;;  %v6296_v0 = vld [vmem:[%s7936_s7 + $0x50] sm:$0xff]   ;;  %v6305_v16 = vld [vmem:[%s7936_s7 + $0xd8] sm:$0xff]  }
 0x353   : > { %2921 = vrot.lane.b32.xlu0 %v2914_v54, %s7953_s28  ;;  %v2936_v7 = vsel %vm1872_vm14, %v2932_v40, %v2935_v10  ;;  %v2956_v19 = vsel %vm7965_vm1, %v2952_v6, %v2955_v26  ;;  %v2958_v25 = vrot.slane %v2892_v22, 4  ;;  %v2939_v4 = vor.u32 %v2938_v11, %v2937_v12  ;;  %v6294_v63 = vld [vmem:[%s7936_s7 + $0x8] sm:$0xff]   ;;  %v6301_v40 = vld [vmem:[%s7936_s7 + $0xd0] sm:$0xff]   ;;  %v6300_v54 = vld [vmem:[%s7936_s7 + $0x58] sm:$0xff]  }
 0x354   : > { %v2895_v28 = vsel %vm1772_vm15, %v2890_v57, %v2894_v18  ;;  %v2920_v2 = vsel %vm1832_vm13, %v2913_v50, %v2919_v21  ;;  %v2905_v13 = vsel %vm1822_vm0, %v2903_v59, %v2904_v38  ;;  %v2947_v35 = vsel %vm1900_vm11, %v2945_v29, %v2946_v46  ;;  %v6299_v50 = vld [vmem:[%s7936_s7 + $0x88] sm:$0xff]   ;;  %v6302_v5 = vld [vmem:[%s7936_s7 + $0x18] sm:$0xff]   ;;  %v6304_v6 = vld [vmem:[%s7936_s7 + $0x60] sm:$0xff]  }
 0x355   : > { %2941 = vrot.lane.b32.xlu1 %v2936_v7, %s7953_s28  ;;  %v2959_v39 = vor.u32 %v2958_v25, %v2957_v23  ;;  %v2940_v45 = vsel %vm1872_vm14, %v2935_v10, %v2939_v4  ;;  %v2906_v41 = vrot.slane %v7311_v42, 1  ;;  %v2927_v37 = vsel %vm1862_vm12, %v2925_v36, %v2926_v53  ;;  %v6298_v10 = vld [vmem:[%s7936_s7 + $0x10] sm:$0xff]   ;;  %v6307_v7 = vld [vmem:[%s7936_s7 + $0x98] sm:$0xff]   ;;  %v6309_v57 = vld [vmem:[%s7936_s7 + $0xe0] sm:$0xff]  }
 0x356   : > { %v2928_v43 = vrot.slane %v7311_v42, 2  ;;  %v6306_v12 = vld [vmem:[%s7936_s7 + $0x20] sm:$0xff]   ;;  %v6308_v11 = vld [vmem:[%s7936_s7 + $0x68] sm:$0xff]   ;;  %v6312_v23 = vld [vmem:[%s7936_s7 + $0x70] sm:$0xff]  }
 0x357   : > { %2961 = vrot.lane.b32.xlu0 %v2956_v19, %s7953_s28  ;;  %v2960_v32 = vsel %vm7965_vm1, %v2955_v26, %v2959_v39  ;;  %v2907_v15 = vsel %vm1822_vm0, %v2904_v38, %v2906_v41  ;;  %v6303_v26 = vld [vmem:[%s7936_s7 + $0x90] sm:$0xff]   ;;  %v6311_v18 = vld [vmem:[%s7936_s7 + $0xa0] sm:$0xff]   ;;  %v6313_v19 = vld [vmem:[%s7936_s7 + $0xe8] sm:$0xff]   ;;  %vm7966_vm1 = vcmask 519168  }
 0x358   : > { %v2929_v60 = vsel %vm1862_vm12, %v2926_v53, %v2928_v43  ;;  %v6310_v21 = vld [vmem:[%s7936_s7 + $0x28] sm:$0xff]   ;;  %v6314_v4 = vld [vmem:[%s7936_s7 + $0x30] sm:$0xff]  }
 0x359   : > { %2898 = vrot.lane.b32.xlu1 %v2895_v28, %s7953_s28  ;;  %v6315_v25 = vld [vmem:[%s7936_s7 + $0xa8] sm:$0xff]   ;;  %v6317_v28 = vld [vmem:[%s7936_s7 + $0xf0] sm:$0xff]  }
 0x35a   : > { %v6319_v39 = vld [vmem:[%s7936_s7 + $0xb0] sm:$0xff]  }
 0x35b   : > { %2923 = vrot.lane.b32.xlu0 %v2920_v2, %s7953_s28  ;;  %v6316_v2 = vld [vmem:[%s7936_s7 + $0x78] sm:$0xff]  }
 0x35d   : > { %2943 = vrot.lane.b32.xlu1 %v2940_v45, %s7953_s28  ;;  %v6318_v45 = vld [vmem:[%s7936_s7 + $0x38] sm:$0xff]  }
 0x35f   : > { %2963 = vrot.lane.b32.xlu0 %v2960_v32, %s7953_s28 }
 0x3c3   : > { %v2897_v27 = vpop.permute.xlu1 %2896 }
 0x3c4   : > { %v2966_v34 = vsel %vm1747_vm10, %v7288_v31, %v2897_v27  ;;  %v2948_v31 = vrot.slane %v7311_v42, 3  ;;  %v6290_v42 = vld [vmem:[%s7936_s7 + $0x40] sm:$0xff]  }
 0x3c5   : > { %v2922_v56 = vpop.permute.xlu0 %2921  ;;  %5983 = vmatprep.subr.bf16.mxu1 %v6290_v42 }
 0x3c6   : > { %v2973_v47 = vsel %vm1747_vm10, %v2905_v13, %v2922_v56  ;;  %v2949_v52 = vsel %vm1900_vm11, %v2946_v46, %v2948_v31  ;;  %v7451_v56 = vld [vmem:[%s7935_s6] ss:$0 sm:$0xff] }
 0x3c7   : > { %3290 = vmatprep.mubr.bf16.mxu1 %v2973_v47  ;;  %v2942_v14 = vpop.permute.xlu1 %2941 }
 0x3c8   : > { %3291 = vmatmul.mubr.bf16.vlgmr.msra.gmra.mrb[16].mxu1 %v2966_v34  ;;  %v2981_v44 = vsel %vm1747_vm10, %v2927_v37, %v2942_v14 }
 0x3c9   : > { %v2962_v20 = vpop.permute.xlu0 %2961 }
 0x3ca   : > { %v2989_v8 = vsel %vm1747_vm10, %v2947_v35, %v2962_v20 }
 0x3cb   : > { %3339 = vmatprep.mubr.bf16.mxu0 %v2989_v8  ;;  %v2899_v33 = vpop.permute.xlu1 %2898 }
 0x3cc   : > { %3340 = vmatmul.mubr.bf16.vlgmr.msra.gmra.mrb[32].mxu0 %v2981_v44  ;;  %v2969_v49 = vsel %vm1747_vm10, %v7309_v1, %v2899_v33  ;;  %v6291_v1 = vld [vmem:[%s7936_s7] sm:$0xff]  }
 0x3cd   : > { %v2924_v48 = vpop.permute.xlu0 %2923  ;;  %5984 = vmatpush3.bf16.msra.mxu1 %v6291_v1  ;;  %6006 = vmatpush3.bf16.msra.mxu0 %v6295_v58 }
 0x3ce   : > { %v2977_v51 = vsel %vm1747_vm10, %v2907_v15, %v2924_v48  ;;  %5985 = vmatprep.subr.bf16.mxu1 %v6292_v9  ;;  %6007 = vmatprep.subr.bf16.mxu0 %v6297_v61 }
 0x3cf   : > { %3298 = vmatprep.mubr.bf16.mxu1 %v2977_v51  ;;  %v2944_v22 = vpop.permute.xlu1 %2943 }
 0x3d0   : > { %3299 = vmatmul.mubr.bf16.gmra.mrb[20].mxu1 %v2969_v49  ;;  %v2985_v3 = vsel %vm1747_vm10, %v2929_v60, %v2944_v22 }
 0x3d1   : > { %v2964_v55 = vpop.permute.xlu0 %2963  ;;  %5986 = vmatpush3.bf16.msra.mxu1 %v6294_v63  ;;  %6008 = vmatpush3.bf16.msra.mxu0 %v6299_v50 }
 0x3d2   : > { %v2993_v62 = vsel %vm1747_vm10, %v2949_v52, %v2964_v55  ;;  %5987 = vmatprep.subr.bf16.mxu1 %v6296_v0  ;;  %6009 = vmatprep.subr.bf16.mxu0 %v6301_v40 }
 0x3d3   : > { %3347 = vmatprep.mubr.bf16.mxu0 %v2993_v62 }
 0x3d4   : > { %3348 = vmatmul.mubr.bf16.gmra.mrb[36].mxu0 %v2985_v3 }
 0x3d5   : > { %5988 = vmatpush3.bf16.msra.mxu1 %v6298_v10  ;;  %6010 = vmatpush3.bf16.msra.mxu0 %v6303_v26 }
 0x3d6   : > { %5989 = vmatprep.subr.bf16.mxu1 %v6300_v54  ;;  %6011 = vmatprep.subr.bf16.mxu0 %v6305_v16 }
 0x3d9   : > { %5990 = vmatpush3.bf16.msra.mxu1 %v6302_v5  ;;  %6012 = vmatpush3.bf16.msra.mxu0 %v6307_v7 }
 0x3da   : > { %5991 = vmatprep.subr.bf16.mxu1 %v6304_v6  ;;  %6013 = vmatprep.subr.bf16.mxu0 %v6309_v57 }
 0x3dd   : > { %5992 = vmatpush3.bf16.msra.mxu1 %v6306_v12  ;;  %6014 = vmatpush3.bf16.msra.mxu0 %v6311_v18 }
 0x3de   : > { %5993 = vmatprep.subr.bf16.mxu1 %v6308_v11  ;;  %6015 = vmatprep.subr.bf16.mxu0 %v6313_v19 }
 0x3e1   : > { %5994 = vmatpush3.bf16.msra.mxu1 %v6310_v21  ;;  %6016 = vmatpush3.bf16.msra.mxu0 %v6315_v25 }
 0x3e2   : > { %5995 = vmatprep.subr.bf16.mxu1 %v6312_v23  ;;  %6017 = vmatprep.subr.bf16.mxu0 %v6317_v28 }
 0x3e5   : > { %5996 = vmatpush3.bf16.msra.mxu1 %v6314_v4  ;;  %6018 = vmatpush3.bf16.msra.mxu0 %v6319_v39 }
 0x3e6   : > { %5997 = vmatprep.subr.bf16.mxu1 %v6316_v2 }
 0x3e9   : > { %5998 = vmatpush3.bf16.msra.mxu1 %v6318_v45 }
 0x49b   : > { %v5943_v32 = vpop.f32.mrb[16].mxu1 }
 0x49c   : > { %v5944_v38 = vpop.f32.mrb[17].mxu1 }
 0x49d   : > { %v5945_v27 = vadd.f32 %v5944_v38, %v5943_v32  ;;  %v5946_v59 = vpop.f32.mrb[18].mxu1 }
 0x49e   : > { %v5947_v13 = vpop.f32.mrb[19].mxu1 }
 0x49f   : > { %v5948_v46 = vadd.f32 %v5947_v13, %v5946_v59  ;;  %v5971_v47 = vpop.f32.mrb[32].mxu0  ;;  %v3293_v34 = vadd.f32 %v5945_v27, %v7451_v56 }
 0x4a0   : > { %v5972_v53 = vpop.f32.mrb[33].mxu0 }
 0x4a1   : > { %v5973_v14 = vadd.f32 %v5972_v53, %v5971_v47  ;;  %v5974_v29 = vpop.f32.mrb[34].mxu0  ;;  %v3296_v20 = vadd.f32 %v5948_v46, %v7451_v56 }
 0x4a2   : > { %v5975_v36 = vpop.f32.mrb[35].mxu0 }
 0x4a3   : > { %v3342_v35 = vadd.f32 %v5973_v14, %v3293_v34  ;;  %v5976_v41 = vadd.f32 %v5975_v36, %v5974_v29  ;;  %v5949_v37 = vpop.f32.mrb[20].mxu1 }
 0x4a4   : > { %v5950_v8 = vpop.f32.mrb[21].mxu1 }
 0x4a5   : > { %v3356_v44 = vmax.f32 %v3342_v35, 0.0  ;;  %v3345_v33 = vadd.f32 %v5976_v41, %v3296_v20  ;;  %v5951_v48 = vadd.f32 %v5950_v8, %v5949_v37  ;;  %v5952_v15 = vpop.f32.mrb[22].mxu1 }
 0x4a6   : > { %v5953_v31 = vpop.f32.mrb[23].mxu1 }
 0x4a7   : > { %v3364_v51 = vcombine.high %v3356_v44, %v3356_v44  ;;  %v3371_v43 = vrot.slane %v3356_v44, %v6570_v17  ;;  %v3357_v49 = vmax.f32 %v3345_v33, 0.0  ;;  %v5977_v22 = vpop.f32.mrb[36].mxu0  ;;  %v7456_v55 = vadd.f32 %v5953_v31, %v5952_v15 }
 0x4a8   : > { %v5978_v52 = vpop.f32.mrb[37].mxu0  ;;  %v3301_v58 = vadd.f32 %v5951_v48, %v7451_v56 }
 0x4a9   : > { %v3378_v62 = vrot.slane %v3364_v51, %v6570_v17  ;;  %v3379_v60 = vcombine.high %v3371_v43, %v3371_v43  ;;  %v3448_v3 = vsel %vm1163_vm2, %v3371_v43, -inf  ;;  %v3381_v42 = vcombine.high %v3357_v49, %v3357_v49  ;;  %v5980_v1 = vpop.f32.mrb[38].mxu0 }
 0x4aa   : > { %v3449_v9 = vrot.slane %v3448_v3, 4  ;;  %v3388_v30 = vrot.slane %v3357_v49, %v6570_v17  ;;  %v5979_v61 = vadd.f32 %v5978_v52, %v5977_v22  ;;  %v5981_v63 = vpop.f32.mrb[39].mxu0 }
 0x4ab   : > { %v3380_v0 = vcombine.high %v3378_v62, %v3378_v62  ;;  %v3455_v50 = vsel %vm1163_vm2, %v3379_v60, -inf  ;;  %v3462_v40 = vsel %vm1163_vm2, %v3378_v62, -inf  ;;  %v3395_v10 = vrot.slane %v3381_v42, %v6570_v17 }
 0x4ac   : > { %v3450_v54 = vmax.f32 %v3448_v3, %v3449_v9  ;;  %v3456_v26 = vrot.slane %v3455_v50, 4  ;;  %v3463_v16 = vrot.slane %v3462_v40, 4  ;;  %v3396_v5 = vcombine.high %v3388_v30, %v3388_v30 }
 0x4ad   : > { %v3469_v6 = vsel %vm1163_vm2, %v3380_v0, -inf  ;;  %v3397_v7 = vcombine.high %v3395_v10, %v3395_v10  ;;  %v3476_v57 = vsel %vm1163_vm2, %v3388_v30, -inf  ;;  %v3490_v12 = vsel %vm1163_vm2, %v3395_v10, -inf }
 0x4ae   : > { %v3451_v11 = vrot.slane %v3450_v54, 2  ;;  %v3457_v18 = vmax.f32 %v3455_v50, %v3456_v26  ;;  %v3464_v19 = vmax.f32 %v3462_v40, %v3463_v16  ;;  %v3470_v21 = vrot.slane %v3469_v6, 4 }
 0x4af   : > { %v3477_v23 = vrot.slane %v3476_v57, 4  ;;  %v3483_v25 = vsel %vm1163_vm2, %v3396_v5, -inf  ;;  %v3491_v28 = vrot.slane %v3490_v12, 4  ;;  %v3497_v4 = vsel %vm1163_vm2, %v3397_v7, -inf }
 0x4b0   : > { %v3452_v2 = vmax.f32 %v3450_v54, %v3451_v11  ;;  %v3458_v39 = vrot.slane %v3457_v18, 2  ;;  %v3465_v45 = vrot.slane %v3464_v19, 2  ;;  %v3471_v32 = vmax.f32 %v3469_v6, %v3470_v21 }
 0x4b1   : > { %v3478_v38 = vmax.f32 %v3476_v57, %v3477_v23  ;;  %v3484_v27 = vrot.slane %v3483_v25, 4  ;;  %v3492_v59 = vmax.f32 %v3490_v12, %v3491_v28  ;;  %v3498_v13 = vrot.slane %v3497_v4, 4 }
 0x4b2   : > { %v3453_v46 = vrot.slane %v3452_v2, 1  ;;  %v3459_v47 = vmax.f32 %v3457_v18, %v3458_v39  ;;  %v3466_v53 = vmax.f32 %v3464_v19, %v3465_v45  ;;  %v3472_v34 = vrot.slane %v3471_v32, 2 }
 0x4b3   : > { %v3479_v14 = vrot.slane %v3478_v38, 2  ;;  %v3485_v29 = vmax.f32 %v3483_v25, %v3484_v27  ;;  %v3493_v36 = vrot.slane %v3492_v59, 2  ;;  %v3499_v20 = vmax.f32 %v3497_v4, %v3498_v13 }
 0x4b4   : > { %v3454_v35 = vmax.f32 %v3452_v2, %v3453_v46  ;;  %v3460_v41 = vrot.slane %v3459_v47, 1  ;;  %v3467_v37 = vrot.slane %v3466_v53, 1  ;;  %v3473_v8 = vmax.f32 %v3471_v32, %v3472_v34 }
 0x4b5   : > { %v3480_v44 = vmax.f32 %v3478_v38, %v3479_v14  ;;  %v3486_v33 = vrot.slane %v3485_v29, 2  ;;  %v3494_v48 = vmax.f32 %v3492_v59, %v3493_v36  ;;  %v3500_v15 = vrot.slane %v3499_v20, 2 }
 0x4b6   : > { %v3461_v31 = vmax.f32 %v3459_v47, %v3460_v41  ;;  %v3468_v51 = vmax.f32 %v3466_v53, %v3467_v37  ;;  %v3474_v43 = vrot.slane %v3473_v8, 1  ;;  %v3350_v49 = vadd.f32 %v5979_v61, %v3301_v58 }
 0x4b7   : > { %v3481_v22 = vrot.slane %v3480_v44, 1  ;;  %v3487_v52 = vmax.f32 %v3485_v29, %v3486_v33  ;;  %v3495_v62 = vrot.slane %v3494_v48, 1  ;;  %v3501_v60 = vmax.f32 %v3499_v20, %v3500_v15 }
 0x4b8   : > { %v3475_v3 = vmax.f32 %v3473_v8, %v3474_v43  ;;  %v3576_v42 = vsel %vm1676_vm3, %v3461_v31, %v3454_v35  ;;  %v3358_v9 = vmax.f32 %v3350_v49, 0.0  ;;  %v5982_v30 = vadd.f32 %v5981_v63, %v5980_v1 }
 0x4b9   : > { %v3577_v0 = vsel %vm1678_vm4, %v3468_v51, %v3576_v42  ;;  %v3482_v50 = vmax.f32 %v3480_v44, %v3481_v22  ;;  %v3488_v40 = vrot.slane %v3487_v52, 1  ;;  %v3304_v10 = vadd.f32 %v7456_v55, %v7451_v56 }
 0x4ba   : > { %v3502_v54 = vrot.slane %v3501_v60, 1  ;;  %v3578_v26 = vsel %vm1680_vm5, %v3475_v3, %v3577_v0  ;;  %v3398_v58 = vcombine.high %v3358_v9, %v3358_v9  ;;  %v3405_v61 = vrot.slane %v3358_v9, %v6570_v17 }
 0x4bb   : > { %v3489_v16 = vmax.f32 %v3487_v52, %v3488_v40  ;;  %v3579_v5 = vsel %vm1682_vm6, %v3482_v50, %v3578_v26  ;;  %v3353_v6 = vadd.f32 %v5982_v30, %v3304_v10  ;;  %v3496_v7 = vmax.f32 %v3494_v48, %v3495_v62 }
 0x4bc   : > { %v3412_v1 = vrot.slane %v3398_v58, %v6570_v17  ;;  %v3413_v63 = vcombine.high %v3405_v61, %v3405_v61  ;;  %v3504_v57 = vsel %vm1163_vm2, %v3405_v61, -inf  ;;  %v3503_v12 = vmax.f32 %v3501_v60, %v3502_v54 }
 0x4bd   : > { %v3580_v11 = vsel %vm1684_vm7, %v3489_v16, %v3579_v5  ;;  %v3505_v56 = vrot.slane %v3504_v57, 4  ;;  %v3359_v55 = vmax.f32 %v3353_v6, 0.0 }
 0x4be   : > { %v3581_v18 = vsel %vm1686_vm8, %v3496_v7, %v3580_v11  ;;  %v3414_v19 = vcombine.high %v3412_v1, %v3412_v1  ;;  %v3511_v21 = vsel %vm1163_vm2, %v3413_v63, -inf  ;;  %v3518_v23 = vsel %vm1163_vm2, %v3412_v1, -inf }
 0x4bf   : > { %v3582_v25 = vsel %vm1688_vm9, %v3503_v12, %v3581_v18  ;;  %v3506_v28 = vmax.f32 %v3504_v57, %v3505_v56  ;;  %v3512_v4 = vrot.slane %v3511_v21, 4  ;;  %v3519_v2 = vrot.slane %v3518_v23, 4 }
 0x4c0   : > { %3592 = vst.msk [vmem:[#allocation2 + $0x3] sm:$0xff] %vm1747_vm10, %v3582_v25  ;;  %v3525_v39 = vsel %vm1163_vm2, %v3414_v19, -inf  ;;  %v3415_v45 = vcombine.high %v3359_v55, %v3359_v55  ;;  %v3422_v32 = vrot.slane %v3359_v55, %v6570_v17 }
 0x4c1   : > { %v3507_v38 = vrot.slane %v3506_v28, 2  ;;  %v3513_v27 = vmax.f32 %v3511_v21, %v3512_v4  ;;  %v3520_v59 = vmax.f32 %v3518_v23, %v3519_v2  ;;  %v3526_v13 = vrot.slane %v3525_v39, 4  ;;  %v6320_v2 = vld [vmem:[%s7936_s7 + $0xf8] sm:$0xff]  }
 0x4c2   : > { %v3429_v46 = vrot.slane %v3415_v45, %v6570_v17  ;;  %v3430_v47 = vcombine.high %v3422_v32, %v3422_v32  ;;  %v3532_v53 = vsel %vm1163_vm2, %v3422_v32, -inf  ;;  %6019 = vmatprep.subr.bf16.mxu0 %v6320_v2  ;;  %v6333_v2 = vld [vmem:[%s7938_s9 + $0xd0] sm:$0xff]  }
 0x4c3   : > { %v3508_v34 = vmax.f32 %v3506_v28, %v3507_v38  ;;  %v3514_v14 = vrot.slane %v3513_v27, 2  ;;  %v3521_v29 = vrot.slane %v3520_v59, 2  ;;  %v3527_v36 = vmax.f32 %v3525_v39, %v3526_v13  ;;  %v6321_v39 = vld [vmem:[%s7936_s7 + $0xb8] sm:$0xff]  }
 0x4c4   : > { %v3431_v20 = vcombine.high %v3429_v46, %v3429_v46  ;;  %v3533_v35 = vrot.slane %v3532_v53, 4  ;;  %v3539_v41 = vsel %vm1163_vm2, %v3430_v47, -inf  ;;  %v3546_v37 = vsel %vm1163_vm2, %v3429_v46, -inf  ;;  %6020 = vmatpush3.bf16.msra.mxu0 %v6321_v39  ;;  %v6330_v39 = vld [vmem:[%s7938_s9 + $0x10] sm:$0xff]  }
 0x4c5   : > { %v3509_v8 = vrot.slane %v3508_v34, 1  ;;  %v3515_v44 = vmax.f32 %v3513_v27, %v3514_v14  ;;  %v3522_v33 = vmax.f32 %v3520_v59, %v3521_v29  ;;  %v3528_v48 = vrot.slane %v3527_v36, 2 }
 0x4c6   : > { %v3534_v15 = vmax.f32 %v3532_v53, %v3533_v35  ;;  %v3540_v31 = vrot.slane %v3539_v41, 4  ;;  %v3547_v51 = vrot.slane %v3546_v37, 4  ;;  %v3553_v43 = vsel %vm1163_vm2, %v3431_v20, -inf }
 0x4c7   : > { %v3516_v49 = vrot.slane %v3515_v44, 1  ;;  %v3523_v22 = vrot.slane %v3522_v33, 1  ;;  %v3529_v52 = vmax.f32 %v3527_v36, %v3528_v48  ;;  %v3554_v42 = vrot.slane %v3553_v43, 4  ;;  %v3595_v45 = vld [vmem:[#allocation2] sm:$0xff] }
 0x4c8   : > { %v3535_v62 = vrot.slane %v3534_v15, 2  ;;  %v3541_v60 = vmax.f32 %v3539_v41, %v3540_v31  ;;  %v3548_v3 = vmax.f32 %v3546_v37, %v3547_v51  ;;  %v3510_v9 = vmax.f32 %v3508_v34, %v3509_v8 }
 0x4c9   : > { %v3517_v30 = vmax.f32 %v3515_v44, %v3516_v49  ;;  %v3524_v0 = vmax.f32 %v3522_v33, %v3523_v22  ;;  %v3530_v50 = vrot.slane %v3529_v52, 1  ;;  %v3555_v26 = vmax.f32 %v3553_v43, %v3554_v42 }
 0x4ca   : > { %v3536_v40 = vmax.f32 %v3534_v15, %v3535_v62  ;;  %v3542_v10 = vrot.slane %v3541_v60, 2  ;;  %v3549_v54 = vrot.slane %v3548_v3, 2 }
 0x4cb   : > { %v3531_v58 = vmax.f32 %v3529_v52, %v3530_v50  ;;  %v3583_v61 = vsel %vm1676_vm3, %v3517_v30, %v3510_v9  ;;  %v3556_v1 = vrot.slane %v3555_v26, 2 }
 0x4cc   : > { %v3584_v16 = vsel %vm1678_vm4, %v3524_v0, %v3583_v61  ;;  %v3537_v5 = vrot.slane %v3536_v40, 1  ;;  %v3543_v6 = vmax.f32 %v3541_v60, %v3542_v10  ;;  %v3550_v7 = vmax.f32 %v3548_v3, %v3549_v54 }
 0x4cd   : > { %v3585_v63 = vsel %vm1680_vm5, %v3531_v58, %v3584_v16  ;;  %v3557_v56 = vmax.f32 %v3555_v26, %v3556_v1 }
 0x4ce   : > { %v3538_v57 = vmax.f32 %v3536_v40, %v3537_v5  ;;  %v3544_v12 = vrot.slane %v3543_v6, 1  ;;  %v3551_v11 = vrot.slane %v3550_v7, 1 }
 0x4cf   : > { %v3558_v21 = vrot.slane %v3557_v56, 1 }
 0x4d0   : > { %v3545_v55 = vmax.f32 %v3543_v6, %v3544_v12  ;;  %v3586_v18 = vsel %vm1682_vm6, %v3538_v57, %v3585_v63  ;;  %v3552_v19 = vmax.f32 %v3550_v7, %v3551_v11 }
 0x4d1   : > { %v3559_v25 = vmax.f32 %v3557_v56, %v3558_v21  ;;  %v6322_v56 = vld [vmem:[%s7938_s9 + $0x40] sm:$0xff]  }
 0x4d2   : > { %v3587_v23 = vsel %vm1684_vm7, %v3545_v55, %v3586_v18  ;;  %v6323_v55 = vld [vmem:[%s7938_s9] sm:$0xff]   ;;  %v6324_v18 = vld [vmem:[%s7938_s9 + $0x48] sm:$0xff]   ;;  %6027 = vmatprep.subr.bf16.mxu1 %v6322_v56 }
 0x4d3   : > { %v3588_v28 = vsel %vm1686_vm8, %v3552_v19, %v3587_v23  ;;  %v6325_v19 = vld [vmem:[%s7938_s9 + $0xc0] sm:$0xff]   ;;  %v6329_v23 = vld [vmem:[%s7938_s9 + $0xc8] sm:$0xff]  }
 0x4d4   : > { %v3589_v4 = vsel %vm1688_vm9, %v3559_v25, %v3588_v28  ;;  %v6327_v21 = vld [vmem:[%s7938_s9 + $0x80] sm:$0xff]   ;;  %6049 = vmatprep.subr.bf16.mxu0 %v6325_v19  ;;  %v6326_v25 = vld [vmem:[%s7938_s9 + $0x8] sm:$0xff]   ;;  %v6328_v28 = vld [vmem:[%s7938_s9 + $0x50] sm:$0xff]  }
 0x4d5   : > { %3593 = vst.msk [vmem:[#allocation2 + $0xb] sm:$0xff] %vm1747_vm10, %v3589_v4  ;;  %v6331_v4 = vld [vmem:[%s7938_s9 + $0x88] sm:$0xff]  }
 0x4dc   : > { %v3596_v32 = vld [vmem:[#allocation2 + $0x8] sm:$0xff]  ;;  %v3597_v38 = vld [vmem:[#allocation2 + $0x10] sm:$0x7f] }
 0x4dd   : > { %v3598_v27 = vpack.c.bf16 %v3596_v32, %v3595_v45  ;;  %v3599_v59 = vpack.c.bf16 %v3597_v38, %v3597_v38  ;;  %4133 = vst.msk [vmem:[#allocation2 + $0xb] sm:$0xf] %vm7966_vm1, %v6436_v24  ;;  %vm7968_vm1 = vsmask.f32 4352  ;;  %v6332_v45 = vld [vmem:[%s7938_s9 + $0x58] sm:$0xff]   ;;  %v6335_v32 = vld [vmem:[%s7938_s9 + $0x90] sm:$0xff]  }
 0x4de   : > { %v6337_v38 = vld [vmem:[%s7938_s9 + $0xd8] sm:$0xff]  }
 0x4df   : > { %v3601_v13 = vshrl.u32 %v3598_v27, 16  ;;  %v3603_v46 = vshll.u32 %v3598_v27, 16  ;;  %v3608_v47 = vshll.u32 %v3599_v59, 16  ;;  %v3622_v53 = vshrl.u32 %v3599_v59, 16 }
 0x4e0   : > { %v3616_v0 = vrot.slane %v3598_v27, 1  ;;  %v3617_v50 = vrot.slane %v3599_v59, 1  ;;  %v3642_v54 = vrot.slane %v3598_v27, 3  ;;  %v3643_v26 = vrot.slane %v3599_v59, 3 }
 0x4e1   : > { %v3619_v34 = vrot.slane %v3601_v13, 1  ;;  %v3620_v14 = vrot.slane %v3603_v46, 2  ;;  %v3624_v29 = vrot.slane %v3622_v53, 1  ;;  %v3625_v36 = vrot.slane %v3608_v47, 2 }
 0x4e2   : > { %v3605_v20 = vrot.slane %v3603_v46, 1  ;;  %v3610_v35 = vrot.slane %v3608_v47, 1  ;;  %v3645_v41 = vrot.slane %v3601_v13, 3  ;;  %v3646_v37 = vrot.slane %v3603_v46, 4 }
 0x4e3   : > { %v3621_v8 = vor.u32 %v3620_v14, %v3619_v34  ;;  %v3626_v44 = vor.u32 %v3625_v36, %v3624_v29  ;;  %v3648_v33 = vrot.slane %v3622_v53, 3  ;;  %v3649_v48 = vrot.slane %v3608_v47, 4  ;;  %v6343_v34 = vld [vmem:[%s7938_s9 + $0xa0] sm:$0xff]   ;;  %v6345_v14 = vld [vmem:[%s7938_s9 + $0xe8] sm:$0xff]   ;;  %v6344_v36 = vld [vmem:[%s7938_s9 + $0x70] sm:$0xff]  }
 0x4e4   : > { %v3606_v15 = vor.u32 %v3605_v20, %v3601_v13  ;;  %v3647_v31 = vor.u32 %v3646_v37, %v3645_v41  ;;  %v3633_v51 = vrot.slane %v3601_v13, 2  ;;  %v3634_v43 = vrot.slane %v3603_v46, 3  ;;  %v6339_v13 = vld [vmem:[%s7938_s9 + $0x98] sm:$0xff]   ;;  %v6341_v46 = vld [vmem:[%s7938_s9 + $0xe0] sm:$0xff]   ;;  %v6342_v29 = vld [vmem:[%s7938_s9 + $0x28] sm:$0xff]  }
 0x4e5   : > { %v3627_v49 = vsel %vm1832_vm13, %v3621_v8, %v3626_v44  ;;  %v3650_v22 = vor.u32 %v3649_v48, %v3648_v33  ;;  %v3636_v52 = vrot.slane %v3622_v53, 2  ;;  %v3637_v62 = vrot.slane %v3608_v47, 3  ;;  %v6338_v47 = vld [vmem:[%s7938_s9 + $0x20] sm:$0xff]   ;;  %v6340_v53 = vld [vmem:[%s7938_s9 + $0x68] sm:$0xff]   ;;  %v6346_v41 = vld [vmem:[%s7938_s9 + $0x30] sm:$0xff]  }
 0x4e6   : > { %3628 = vrot.lane.b32.xlu0 %v3627_v49, %s7967_s24  ;;  %v3611_v60 = vsel %vm1772_vm15, %v3606_v15, %v3610_v35  ;;  %v3635_v3 = vor.u32 %v3634_v43, %v3633_v51  ;;  %v3618_v10 = vsel %vm1822_vm0, %v3616_v0, %v3617_v50  ;;  %v3630_v16 = vrot.slane %v3598_v27, 2  ;;  %v6347_v20 = vld [vmem:[%s7938_s9 + $0xa8] sm:$0xff]   ;;  %v6349_v35 = vld [vmem:[%s7938_s9 + $0xf0] sm:$0xff]   ;;  %v6348_v37 = vld [vmem:[%s7938_s9 + $0x78] sm:$0xff]  }
 0x4e7   : > { %3612 = vrot.lane.b32.xlu1 %v3611_v60, %s7967_s24  ;;  %v3638_v42 = vor.u32 %v3637_v62, %v3636_v52  ;;  %v3651_v9 = vsel %vm7968_vm1, %v3647_v31, %v3650_v22  ;;  %v3631_v5 = vrot.slane %v3599_v59, 2  ;;  %v3644_v1 = vsel %vm1900_vm11, %v3642_v54, %v3643_v26  ;;  %v6336_v59 = vld [vmem:[%s7938_s9 + $0x60] sm:$0xff]   ;;  %v6351_v8 = vld [vmem:[%s7938_s9 + $0xb0] sm:$0xff]   ;;  %v6350_v44 = vld [vmem:[%s7938_s9 + $0x38] sm:$0xff]  }
 0x4e8   : > { %v5694_v51 = vld [vmem:[%s7937_s8] ss:$0 sm:$0xff] }
 0x4e9   : > { %v3639_v30 = vsel %vm1872_vm14, %v3635_v3, %v3638_v42  ;;  %v3632_v63 = vsel %vm1862_vm12, %v3630_v16, %v3631_v5 }
 0x4ea   : > { %3652 = vrot.lane.b32.xlu0 %v3651_v9, %s7967_s24 }
 0x4eb   : > { %3640 = vrot.lane.b32.xlu1 %v3639_v30, %s7967_s24 }
 0x558   : > { %v3629_v40 = vpop.permute.xlu0 %3628 }
 0x559   : > { %v3613_v58 = vpop.permute.xlu1 %3612  ;;  %v3659_v61 = vsel %vm1747_vm10, %v3618_v10, %v3629_v40 }
 0x55a   : > { %v3655_v6 = vsel %vm1747_vm10, %v3598_v27, %v3613_v58  ;;  %3964 = vmatprep.mubr.bf16.mxu1 %v3659_v61  ;;  %v6334_v27 = vld [vmem:[%s7938_s9 + $0x18] sm:$0xff]  }
 0x55b   : > { %3965 = vmatmul.mubr.bf16.vlgmr.msra.gmra.mrb[24].mxu1 %v3655_v6 }
 0x55c   : > { %v3653_v7 = vpop.permute.xlu0 %3652  ;;  %6028 = vmatpush3.bf16.msra.mxu1 %v6323_v55 }
 0x55d   : > { %v3641_v57 = vpop.permute.xlu1 %3640  ;;  %v3667_v12 = vsel %vm1747_vm10, %v3644_v1, %v3653_v7  ;;  %6029 = vmatprep.subr.bf16.mxu1 %v6324_v18 }
 0x55e   : > { %v3663_v11 = vsel %vm1747_vm10, %v3632_v63, %v3641_v57  ;;  %4005 = vmatprep.mubr.bf16.mxu0 %v3667_v12 }
 0x55f   : > { %4006 = vmatmul.mubr.bf16.vlgmr.msra.gmra.mrb[40].mxu0 %v3663_v11 }
 0x560   : > { %6050 = vmatpush3.bf16.msra.mxu0 %v6327_v21  ;;  %6030 = vmatpush3.bf16.msra.mxu1 %v6326_v25 }
 0x561   : > { %6051 = vmatprep.subr.bf16.mxu0 %v6329_v23  ;;  %6031 = vmatprep.subr.bf16.mxu1 %v6328_v28 }
 0x564   : > { %6052 = vmatpush3.bf16.msra.mxu0 %v6331_v4  ;;  %6032 = vmatpush3.bf16.msra.mxu1 %v6330_v39 }
 0x565   : > { %6053 = vmatprep.subr.bf16.mxu0 %v6333_v2  ;;  %6033 = vmatprep.subr.bf16.mxu1 %v6332_v45 }
 0x568   : > { %6054 = vmatpush3.bf16.msra.mxu0 %v6335_v32  ;;  %6034 = vmatpush3.bf16.msra.mxu1 %v6334_v27 }
 0x569   : > { %6055 = vmatprep.subr.bf16.mxu0 %v6337_v38  ;;  %6035 = vmatprep.subr.bf16.mxu1 %v6336_v59 }
 0x56c   : > { %6056 = vmatpush3.bf16.msra.mxu0 %v6339_v13  ;;  %6036 = vmatpush3.bf16.msra.mxu1 %v6338_v47 }
 0x56d   : > { %6057 = vmatprep.subr.bf16.mxu0 %v6341_v46  ;;  %6037 = vmatprep.subr.bf16.mxu1 %v6340_v53 }
 0x570   : > { %6058 = vmatpush3.bf16.msra.mxu0 %v6343_v34  ;;  %6038 = vmatpush3.bf16.msra.mxu1 %v6342_v29 }
 0x571   : > { %6059 = vmatprep.subr.bf16.mxu0 %v6345_v14  ;;  %6039 = vmatprep.subr.bf16.mxu1 %v6344_v36 }
 0x574   : > { %6060 = vmatpush3.bf16.msra.mxu0 %v6347_v20  ;;  %6040 = vmatpush3.bf16.msra.mxu1 %v6346_v41 }
 0x575   : > { %6061 = vmatprep.subr.bf16.mxu0 %v6349_v35  ;;  %6041 = vmatprep.subr.bf16.mxu1 %v6348_v37 }
 0x578   : > { %6062 = vmatpush3.bf16.msra.mxu0 %v6351_v8  ;;  %6042 = vmatpush3.bf16.msra.mxu1 %v6350_v44 }
 0x62e   : > { %v5999_v33 = vpop.f32.mrb[24].mxu1 }
 0x62f   : > { %v6000_v48 = vpop.f32.mrb[25].mxu1 }
 0x630   : > { %v6001_v15 = vadd.f32 %v6000_v48, %v5999_v33  ;;  %v6002_v31 = vpop.f32.mrb[26].mxu1 }
 0x631   : > { %v6003_v43 = vpop.f32.mrb[27].mxu1 }
 0x632   : > { %v6004_v49 = vadd.f32 %v6003_v43, %v6002_v31  ;;  %v6021_v22 = vpop.f32.mrb[40].mxu0  ;;  %v3967_v62 = vadd.f32 %v6001_v15, %v5694_v51 }
 0x633   : > { %v6022_v52 = vpop.f32.mrb[41].mxu0 }
 0x634   : > { %v6023_v60 = vadd.f32 %v6022_v52, %v6021_v22  ;;  %v6024_v3 = vpop.f32.mrb[42].mxu0  ;;  %v3970_v9 = vadd.f32 %v6004_v49, %v5694_v51 }
 0x635   : > { %v6025_v42 = vpop.f32.mrb[43].mxu0 }
 0x636   : > { %v4008_v30 = vadd.f32 %v6023_v60, %v3967_v62  ;;  %v6026_v0 = vadd.f32 %v6025_v42, %v6024_v3 }
 0x638   : > { %v4014_v50 = vmax.f32 %v4008_v30, 0.0  ;;  %v4011_v40 = vadd.f32 %v6026_v0, %v3970_v9 }
 0x63a   : > { %v4018_v10 = vcombine.high %v4014_v50, %v4014_v50  ;;  %v4025_v54 = vrot.slane %v4014_v50, %v6570_v17  ;;  %v4015_v26 = vmax.f32 %v4011_v40, 0.0 }
 0x63c   : > { %v4032_v58 = vrot.slane %v4018_v10, %v6570_v17  ;;  %v4033_v61 = vcombine.high %v4025_v54, %v4025_v54  ;;  %v4060_v16 = vsel %vm1163_vm2, %v4025_v54, -inf  ;;  %v4035_v5 = vcombine.high %v4015_v26, %v4015_v26 }
 0x63d   : > { %v4061_v6 = vrot.slane %v4060_v16, 4  ;;  %v4042_v7 = vrot.slane %v4015_v26, %v6570_v17 }
 0x63e   : > { %v4034_v1 = vcombine.high %v4032_v58, %v4032_v58  ;;  %v4067_v63 = vsel %vm1163_vm2, %v4033_v61, -inf  ;;  %v4074_v57 = vsel %vm1163_vm2, %v4032_v58, -inf  ;;  %v4049_v12 = vrot.slane %v4035_v5, %v6570_v17 }
 0x63f   : > { %v4062_v11 = vmax.f32 %v4060_v16, %v4061_v6  ;;  %v4068_v56 = vrot.slane %v4067_v63, 4  ;;  %v4075_v55 = vrot.slane %v4074_v57, 4  ;;  %v4050_v18 = vcombine.high %v4042_v7, %v4042_v7 }
 0x640   : > { %v4081_v19 = vsel %vm1163_vm2, %v4034_v1, -inf  ;;  %v4051_v21 = vcombine.high %v4049_v12, %v4049_v12  ;;  %v4088_v23 = vsel %vm1163_vm2, %v4042_v7, -inf  ;;  %v4102_v25 = vsel %vm1163_vm2, %v4049_v12, -inf  ;;  %v6352_v12 = vld [vmem:[%s7938_s9 + $0xf8] sm:$0xff]  }
 0x641   : > { %v4063_v28 = vrot.slane %v4062_v11, 2  ;;  %v4069_v4 = vmax.f32 %v4067_v63, %v4068_v56  ;;  %v4076_v2 = vmax.f32 %v4074_v57, %v4075_v55  ;;  %v4082_v39 = vrot.slane %v4081_v19, 4  ;;  %6063 = vmatprep.subr.bf16.mxu0 %v6352_v12 }
 0x642   : > { %v4089_v45 = vrot.slane %v4088_v23, 4  ;;  %v4095_v32 = vsel %vm1163_vm2, %v4050_v18, -inf  ;;  %v4103_v38 = vrot.slane %v4102_v25, 4  ;;  %v4109_v27 = vsel %vm1163_vm2, %v4051_v21, -inf }
 0x643   : > { %v4064_v59 = vmax.f32 %v4062_v11, %v4063_v28  ;;  %v4070_v13 = vrot.slane %v4069_v4, 2  ;;  %v4077_v46 = vrot.slane %v4076_v2, 2  ;;  %v4083_v47 = vmax.f32 %v4081_v19, %v4082_v39  ;;  %v6353_v11 = vld [vmem:[%s7938_s9 + $0xb8] sm:$0xff]  }
 0x644   : > { %v4090_v53 = vmax.f32 %v4088_v23, %v4089_v45  ;;  %v4096_v34 = vrot.slane %v4095_v32, 4  ;;  %v4104_v14 = vmax.f32 %v4102_v25, %v4103_v38  ;;  %v4110_v29 = vrot.slane %v4109_v27, 4  ;;  %6064 = vmatpush3.bf16.msra.mxu0 %v6353_v11  ;;  %v5727_v11 = vld [vmem:[%s7939_s10] ss:$0 sm:$0xff] }
 0x645   : > { %v4065_v36 = vrot.slane %v4064_v59, 1  ;;  %v4071_v20 = vmax.f32 %v4069_v4, %v4070_v13  ;;  %v4078_v35 = vmax.f32 %v4076_v2, %v4077_v46  ;;  %v4084_v41 = vrot.slane %v4083_v47, 2 }
 0x646   : > { %v4091_v37 = vrot.slane %v4090_v53, 2  ;;  %v4097_v8 = vmax.f32 %v4095_v32, %v4096_v34  ;;  %v4105_v44 = vrot.slane %v4104_v14, 2  ;;  %v4111_v33 = vmax.f32 %v4109_v27, %v4110_v29 }
 0x647   : > { %v4072_v48 = vrot.slane %v4071_v20, 1  ;;  %v4079_v15 = vrot.slane %v4078_v35, 1  ;;  %v4085_v31 = vmax.f32 %v4083_v47, %v4084_v41  ;;  %v4066_v52 = vmax.f32 %v4064_v59, %v4065_v36 }
 0x648   : > { %v4092_v51 = vmax.f32 %v4090_v53, %v4091_v37  ;;  %v4098_v43 = vrot.slane %v4097_v8, 2  ;;  %v4106_v49 = vmax.f32 %v4104_v14, %v4105_v44  ;;  %v4112_v22 = vrot.slane %v4111_v33, 2  ;;  %v6354_v37 = vld [vmem:[%s7940_s11 + $0x40] sm:$0xff]   ;;  %v6356_v44 = vld [vmem:[%s7940_s11 + $0x48] sm:$0xff]  }
 0x649   : > { %v4073_v62 = vmax.f32 %v4071_v20, %v4072_v48  ;;  %v4080_v60 = vmax.f32 %v4078_v35, %v4079_v15  ;;  %v4086_v3 = vrot.slane %v4085_v31, 1  ;;  %v6359_v48 = vld [vmem:[%s7940_s11 + $0x80] sm:$0xff]   ;;  %6071 = vmatprep.subr.bf16.mxu1 %v6354_v37  ;;  %v6361_v15 = vld [vmem:[%s7940_s11 + $0xc8] sm:$0xff]  }
 0x64a   : > { %v4093_v42 = vrot.slane %v4092_v51, 1  ;;  %v4099_v9 = vmax.f32 %v4097_v8, %v4098_v43  ;;  %v4113_v30 = vmax.f32 %v4111_v33, %v4112_v22  ;;  %v4107_v40 = vrot.slane %v4106_v49, 1  ;;  %v6355_v8 = vld [vmem:[%s7940_s11] sm:$0xff]   ;;  %v6363_v43 = vld [vmem:[%s7940_s11 + $0x88] sm:$0xff]   ;;  %v6362_v22 = vld [vmem:[%s7940_s11 + $0x10] sm:$0xff]  }
 0x64b   : > { %v4087_v0 = vmax.f32 %v4085_v31, %v4086_v3  ;;  %v4124_v50 = vsel %vm1676_vm3, %v4073_v62, %v4066_v52  ;;  %v6357_v33 = vld [vmem:[%s7940_s11 + $0xc0] sm:$0xff]   ;;  %v6358_v31 = vld [vmem:[%s7940_s11 + $0x8] sm:$0xff]   ;;  %v6364_v52 = vld [vmem:[%s7940_s11 + $0x58] sm:$0xff]  }
 0x64c   : > { %v4125_v10 = vsel %vm1678_vm4, %v4080_v60, %v4124_v50  ;;  %v4094_v54 = vmax.f32 %v4092_v51, %v4093_v42  ;;  %v4100_v26 = vrot.slane %v4099_v9, 1  ;;  %v4114_v58 = vrot.slane %v4113_v30, 1  ;;  %6093 = vmatprep.subr.bf16.mxu0 %v6357_v33  ;;  %v6360_v51 = vld [vmem:[%s7940_s11 + $0x50] sm:$0xff]   ;;  %v6369_v60 = vld [vmem:[%s7940_s11 + $0xd8] sm:$0xff]   ;;  %v6368_v42 = vld [vmem:[%s7940_s11 + $0x60] sm:$0xff]  }
 0x64d   : > { %v4126_v61 = vsel %vm1680_vm5, %v4087_v0, %v4125_v10  ;;  %v4108_v6 = vmax.f32 %v4106_v49, %v4107_v40  ;;  %v6365_v49 = vld [vmem:[%s7940_s11 + $0xd0] sm:$0xff]   ;;  %v6366_v3 = vld [vmem:[%s7940_s11 + $0x18] sm:$0xff]   ;;  %v6370_v0 = vld [vmem:[%s7940_s11 + $0x20] sm:$0xff]  }
 0x64e   : > { %v4101_v16 = vmax.f32 %v4099_v9, %v4100_v26  ;;  %v4127_v5 = vsel %vm1682_vm6, %v4094_v54, %v4126_v61  ;;  %v4115_v7 = vmax.f32 %v4113_v30, %v4114_v58  ;;  %vm7969_vm6 = vcmask 519168   ;;  %v6367_v62 = vld [vmem:[%s7940_s11 + $0x90] sm:$0xff]   ;;  %v6371_v9 = vld [vmem:[%s7940_s11 + $0x98] sm:$0xff]   ;;  %v6373_v30 = vld [vmem:[%s7940_s11 + $0xe0] sm:$0xff]  }
 0x64f   : > { %v6372_v50 = vld [vmem:[%s7940_s11 + $0x68] sm:$0xff]   ;;  %v6375_v40 = vld [vmem:[%s7940_s11 + $0xa0] sm:$0xff]   ;;  %v6376_v26 = vld [vmem:[%s7940_s11 + $0x70] sm:$0xff]  }
 0x650   : > { %v4128_v1 = vsel %vm1684_vm7, %v4101_v16, %v4127_v5  ;;  %v6377_v10 = vld [vmem:[%s7940_s11 + $0xe8] sm:$0xff]   ;;  %v6381_v61 = vld [vmem:[%s7940_s11 + $0xf0] sm:$0xff]   ;;  %v6380_v5 = vld [vmem:[%s7940_s11 + $0x78] sm:$0xff]  }
 0x651   : > { %v4129_v63 = vsel %vm1686_vm8, %v4108_v6, %v4128_v1  ;;  %v6374_v54 = vld [vmem:[%s7940_s11 + $0x28] sm:$0xff]   ;;  %v6378_v16 = vld [vmem:[%s7940_s11 + $0x30] sm:$0xff]   ;;  %vm7970_vm7 = vmmov %vm7969_vm6 }
 0x652   : > { %v4130_v57 = vsel %vm1688_vm9, %v4115_v7, %v4129_v63  ;;  %v6379_v58 = vld [vmem:[%s7940_s11 + $0xa8] sm:$0xff]   ;;  %v6383_v6 = vld [vmem:[%s7940_s11 + $0xb0] sm:$0xff]   ;;  %v6382_v7 = vld [vmem:[%s7940_s11 + $0x38] sm:$0xff]  }
 0x653   : > { %4132 = vst.msk [vmem:[#allocation2 + $0x3] sm:$0xff] %vm1747_vm10, %v4130_v57  ;;  %vm7971_vm8 = vmmov %vm7969_vm6 }
 0x65a   : > { %v4134_v56 = vld [vmem:[#allocation2] sm:$0xff]  ;;  %v4135_v55 = vld [vmem:[#allocation2 + $0x8] sm:$0x7f] }
 0x65b   : > { %v4136_v18 = vpack.c.bf16 %v4135_v55, %v4134_v56  ;;  %4583 = vst.msk [vmem:[#allocation2 + $0x7] sm:$0xf] %vm7969_vm6, %v6436_v24 }
 0x65d   : > { %v4138_v19 = vshrl.u32 %v4136_v18, 16  ;;  %v4140_v21 = vshll.u32 %v4136_v18, 16  ;;  %v4147_v13 = vrot.slane %v4136_v18, 1  ;;  %v4153_v14 = vrot.slane %v4136_v18, 2 }
 0x65e   : > { %v4159_v29 = vrot.slane %v4136_v18, 3 }
 0x65f   : > { %v4148_v23 = vrot.slane %v4138_v19, 1  ;;  %v4149_v25 = vrot.slane %v4140_v21, 2  ;;  %v4142_v28 = vrot.slane %v4140_v21, 1  ;;  %v4160_v4 = vrot.slane %v4138_v19, 3 }
 0x660   : > { %v4161_v2 = vrot.slane %v4140_v21, 4  ;;  %v4154_v32 = vrot.slane %v4138_v19, 2  ;;  %v4155_v38 = vrot.slane %v4140_v21, 3 }
 0x661   : > { %v4150_v39 = vor.u32 %v4149_v25, %v4148_v23  ;;  %v4143_v45 = vor.u32 %v4142_v28, %v4138_v19 }
 0x662   : > { %v4162_v27 = vor.u32 %v4161_v2, %v4160_v4  ;;  %v4156_v59 = vor.u32 %v4155_v38, %v4154_v32 }
 0x663   : > { %4151 = vrot.lane.b32.xlu0 %v4150_v39, %s7967_s24  ;;  %4144 = vrot.lane.b32.xlu1 %v4143_v45, %s7967_s24 }
 0x667   : > { %4163 = vrot.lane.b32.xlu0 %v4162_v27, %s7967_s24  ;;  %4157 = vrot.lane.b32.xlu1 %v4156_v59, %s7967_s24 }
 0x6d5   : > { %v4152_v46 = vpop.permute.xlu0 %4151  ;;  %v4145_v47 = vpop.permute.xlu1 %4144 }
 0x6d6   : > { %v4166_v53 = vsel %vm1747_vm10, %v4136_v18, %v4145_v47  ;;  %v4170_v34 = vsel %vm1747_vm10, %v4147_v13, %v4152_v46 }
 0x6d7   : > { %4475 = vmatprep.mubr.bf16.mxu1 %v4170_v34 }
 0x6d8   : > { %4476 = vmatmul.mubr.bf16.vlgmr.msra.gmra.mrb[28].mxu1 %v4166_v53 }
 0x6d9   : > { %v4164_v36 = vpop.permute.xlu0 %4163  ;;  %v4158_v20 = vpop.permute.xlu1 %4157  ;;  %6072 = vmatpush3.bf16.msra.mxu1 %v6355_v8 }
 0x6da   : > { %v4174_v35 = vsel %vm1747_vm10, %v4153_v14, %v4158_v20  ;;  %v4178_v41 = vsel %vm1747_vm10, %v4159_v29, %v4164_v36  ;;  %6073 = vmatprep.subr.bf16.mxu1 %v6356_v44 }
 0x6db   : > { %4515 = vmatprep.mubr.bf16.mxu0 %v4178_v41 }
 0x6dc   : > { %4516 = vmatmul.mubr.bf16.vlgmr.msra.gmra.mrb[44].mxu0 %v4174_v35 }
 0x6dd   : > { %6094 = vmatpush3.bf16.msra.mxu0 %v6359_v48  ;;  %6074 = vmatpush3.bf16.msra.mxu1 %v6358_v31 }
 0x6de   : > { %6095 = vmatprep.subr.bf16.mxu0 %v6361_v15  ;;  %6075 = vmatprep.subr.bf16.mxu1 %v6360_v51 }
 0x6e1   : > { %6096 = vmatpush3.bf16.msra.mxu0 %v6363_v43  ;;  %6076 = vmatpush3.bf16.msra.mxu1 %v6362_v22 }
 0x6e2   : > { %6097 = vmatprep.subr.bf16.mxu0 %v6365_v49  ;;  %6077 = vmatprep.subr.bf16.mxu1 %v6364_v52 }
 0x6e5   : > { %6098 = vmatpush3.bf16.msra.mxu0 %v6367_v62  ;;  %6078 = vmatpush3.bf16.msra.mxu1 %v6366_v3 }
 0x6e6   : > { %6099 = vmatprep.subr.bf16.mxu0 %v6369_v60  ;;  %6079 = vmatprep.subr.bf16.mxu1 %v6368_v42 }
 0x6e9   : > { %6100 = vmatpush3.bf16.msra.mxu0 %v6371_v9  ;;  %6080 = vmatpush3.bf16.msra.mxu1 %v6370_v0  ;;  %v4585_v0 = vld [vmem:[#allocation2 + $0x8] sm:$0x7] }
 0x6ea   : > { %6101 = vmatprep.subr.bf16.mxu0 %v6373_v30  ;;  %6081 = vmatprep.subr.bf16.mxu1 %v6372_v50  ;;  %v6384_v50 = vld [vmem:[%s7940_s11 + $0xf8] sm:$0xff]  }
 0x6ed   : > { %6102 = vmatpush3.bf16.msra.mxu0 %v6375_v40  ;;  %6082 = vmatpush3.bf16.msra.mxu1 %v6374_v54  ;;  %v6385_v40 = vld [vmem:[%s7940_s11 + $0xb8] sm:$0xff]  }
 0x6ee   : > { %6103 = vmatprep.subr.bf16.mxu0 %v6377_v10  ;;  %6083 = vmatprep.subr.bf16.mxu1 %v6376_v26 }
 0x6f1   : > { %6104 = vmatpush3.bf16.msra.mxu0 %v6379_v58  ;;  %6084 = vmatpush3.bf16.msra.mxu1 %v6378_v16 }
 0x6f2   : > { %6105 = vmatprep.subr.bf16.mxu0 %v6381_v61  ;;  %6085 = vmatprep.subr.bf16.mxu1 %v6380_v5 }
 0x6f5   : > { %6106 = vmatpush3.bf16.msra.mxu0 %v6383_v6  ;;  %6086 = vmatpush3.bf16.msra.mxu1 %v6382_v7 }
 0x6f6   : > { %6107 = vmatprep.subr.bf16.mxu0 %v6384_v50  ;;  %v5760_v50 = vld [vmem:[%s7941_s12] ss:$0 sm:$0xff] }
 0x6f9   : > { %6108 = vmatpush3.bf16.msra.mxu0 %v6385_v40 }
 0x7ab   : > { %v6043_v1 = vpop.f32.mrb[28].mxu1 }
 0x7ac   : > { %v6044_v63 = vpop.f32.mrb[29].mxu1 }
 0x7ad   : > { %v6045_v57 = vadd.f32 %v6044_v63, %v6043_v1  ;;  %v6046_v12 = vpop.f32.mrb[30].mxu1 }
 0x7ae   : > { %v6047_v56 = vpop.f32.mrb[31].mxu1 }
 0x7af   : > { %v6065_v55 = vpop.f32.mrb[44].mxu0  ;;  %v4478_v19 = vadd.f32 %v6045_v57, %v5727_v11 }
 0x7b0   : > { %v6066_v18 = vpop.f32.mrb[45].mxu0 }
 0x7b1   : > { %v6067_v21 = vadd.f32 %v6066_v18, %v6065_v55  ;;  %v6068_v23 = vpop.f32.mrb[46].mxu0 }
 0x7b2   : > { %v6069_v25 = vpop.f32.mrb[47].mxu0 }
 0x7b3   : > { %v4518_v28 = vadd.f32 %v6067_v21, %v4478_v19 }
 0x7b5   : > { %v4523_v4 = vmax.f32 %v4518_v28, 0.0 }
 0x7b7   : > { %v4525_v2 = vcombine.high %v4523_v4, %v4523_v4  ;;  %v4532_v39 = vrot.slane %v4523_v4, %v6570_v17 }
 0x7b9   : > { %v4539_v45 = vrot.slane %v4525_v2, %v6570_v17  ;;  %v4540_v32 = vcombine.high %v4532_v39, %v4532_v39  ;;  %v4546_v38 = vsel %vm1163_vm2, %v4532_v39, -inf }
 0x7ba   : > { %v4547_v27 = vrot.slane %v4546_v38, 4 }
 0x7bb   : > { %v4541_v59 = vcombine.high %v4539_v45, %v4539_v45  ;;  %v4553_v13 = vsel %vm1163_vm2, %v4540_v32, -inf  ;;  %v4560_v46 = vsel %vm1163_vm2, %v4539_v45, -inf  ;;  %v6386_v32 = vld [vmem:[%s7942_s13 + $0x40] sm:$0xff]  }
 0x7bc   : > { %v4548_v47 = vmax.f32 %v4546_v38, %v4547_v27  ;;  %v4554_v53 = vrot.slane %v4553_v13, 4  ;;  %v4561_v34 = vrot.slane %v4560_v46, 4  ;;  %v6387_v38 = vld [vmem:[%s7942_s13] sm:$0xff]   ;;  %v6388_v27 = vld [vmem:[%s7942_s13 + $0x48] sm:$0xff]   ;;  %6115 = vmatprep.subr.bf16.mxu1 %v6386_v32  ;;  %v6417_v32 = vld [vmem:[%s7942_s13 + $0xb8] sm:$0xff]  }
 0x7bd   : > { %v4567_v14 = vsel %vm1163_vm2, %v4541_v59, -inf  ;;  %v6389_v59 = vld [vmem:[%s7942_s13 + $0xc0] sm:$0xff]  }
 0x7be   : > { %v4549_v29 = vrot.slane %v4548_v47, 2  ;;  %v4555_v36 = vmax.f32 %v4553_v13, %v4554_v53  ;;  %v4562_v20 = vmax.f32 %v4560_v46, %v4561_v34  ;;  %v4568_v35 = vrot.slane %v4567_v14, 4  ;;  %v6391_v13 = vld [vmem:[%s7942_s13 + $0x80] sm:$0xff]   ;;  %v6393_v46 = vld [vmem:[%s7942_s13 + $0xc8] sm:$0xff]   ;;  %6137 = vmatprep.subr.bf16.mxu0 %v6389_v59  ;;  %v6392_v53 = vld [vmem:[%s7942_s13 + $0x50] sm:$0xff]  }
 0x7bf   : > { %v6395_v34 = vld [vmem:[%s7942_s13 + $0x88] sm:$0xff]  }
 0x7c0   : > { %v4550_v41 = vmax.f32 %v4548_v47, %v4549_v29  ;;  %v4556_v37 = vrot.slane %v4555_v36, 2  ;;  %v4563_v8 = vrot.slane %v4562_v20, 2  ;;  %v4569_v44 = vmax.f32 %v4567_v14, %v4568_v35  ;;  %v6390_v47 = vld [vmem:[%s7942_s13 + $0x8] sm:$0xff]   ;;  %v6397_v14 = vld [vmem:[%s7942_s13 + $0xd0] sm:$0xff]   ;;  %v6401_v35 = vld [vmem:[%s7942_s13 + $0xd8] sm:$0xff]  }
 0x7c1   : > { %v6394_v29 = vld [vmem:[%s7942_s13 + $0x10] sm:$0xff]  }
 0x7c2   : > { %v4551_v33 = vrot.slane %v4550_v41, 1  ;;  %v4557_v48 = vmax.f32 %v4555_v36, %v4556_v37  ;;  %v4564_v15 = vmax.f32 %v4562_v20, %v4563_v8  ;;  %v4570_v31 = vrot.slane %v4569_v44, 2  ;;  %v6396_v36 = vld [vmem:[%s7942_s13 + $0x58] sm:$0xff]   ;;  %v6399_v20 = vld [vmem:[%s7942_s13 + $0x90] sm:$0xff]   ;;  %v6400_v37 = vld [vmem:[%s7942_s13 + $0x60] sm:$0xff]  }
 0x7c3   : > { %v6403_v8 = vld [vmem:[%s7942_s13 + $0x98] sm:$0xff]  }
 0x7c4   : > { %v4558_v51 = vrot.slane %v4557_v48, 1  ;;  %v4565_v43 = vrot.slane %v4564_v15, 1  ;;  %v4571_v49 = vmax.f32 %v4569_v44, %v4570_v31  ;;  %v4552_v22 = vmax.f32 %v4550_v41, %v4551_v33  ;;  %v6398_v41 = vld [vmem:[%s7942_s13 + $0x18] sm:$0xff]   ;;  %v6405_v44 = vld [vmem:[%s7942_s13 + $0xe0] sm:$0xff]   ;;  %v6409_v31 = vld [vmem:[%s7942_s13 + $0xe8] sm:$0xff]  }
 0x7c5   : > { %v6402_v33 = vld [vmem:[%s7942_s13 + $0x20] sm:$0xff]  }
 0x7c6   : > { %v4559_v52 = vmax.f32 %v4557_v48, %v4558_v51  ;;  %v4566_v62 = vmax.f32 %v4564_v15, %v4565_v43  ;;  %v4572_v60 = vrot.slane %v4571_v49, 1  ;;  %v6404_v48 = vld [vmem:[%s7942_s13 + $0x68] sm:$0xff]   ;;  %v6407_v15 = vld [vmem:[%s7942_s13 + $0xa0] sm:$0xff]   ;;  %v6408_v43 = vld [vmem:[%s7942_s13 + $0x70] sm:$0xff]  }
 0x7c7   : > { %v6406_v51 = vld [vmem:[%s7942_s13 + $0x28] sm:$0xff]  }
 0x7c8   : > { %v4573_v3 = vmax.f32 %v4571_v49, %v4572_v60  ;;  %v4578_v42 = vsel %vm1676_vm3, %v4559_v52, %v4552_v22  ;;  %v6411_v49 = vld [vmem:[%s7942_s13 + $0xa8] sm:$0xff]   ;;  %v6413_v22 = vld [vmem:[%s7942_s13 + $0xf0] sm:$0xff]  }
 0x7c9   : > { %v4579_v9 = vsel %vm1678_vm4, %v4566_v62, %v4578_v42  ;;  %v6410_v52 = vld [vmem:[%s7942_s13 + $0x30] sm:$0xff]   ;;  %v6412_v62 = vld [vmem:[%s7942_s13 + $0x78] sm:$0xff]   ;;  %vm5504_vm4 = vcmask 261120  }
 0x7ca   : > { %v4580_v30 = vsel %vm1680_vm5, %v4573_v3, %v4579_v9  ;;  %v6415_v60 = vld [vmem:[%s7942_s13 + $0xb0] sm:$0xff]   ;;  %v6414_v3 = vld [vmem:[%s7942_s13 + $0x38] sm:$0xff]   ;;  %vm5553_vm5 = vcmask 613376  }
 0x7cb   : > { %4582 = vst.msk [vmem:[#allocation2 + $0x3] sm:$0xf] %vm7970_vm7, %v4580_v30 }
 0x7d2   : > { %v4584_v10 = vld [vmem:[#allocation2] sm:$0xff] }
 0x7d3   : > { %v4586_v54 = vpack.c.bf16 %v4585_v0, %v4584_v10  ;;  %5004 = vst.msk [vmem:[#allocation2 + $0x5] sm:$0xf] %vm7971_vm8, %v6436_v24 }
 0x7d5   : > { %v4588_v26 = vshrl.u32 %v4586_v54, 16  ;;  %v4590_v58 = vshll.u32 %v4586_v54, 16  ;;  %v4597_v55 = vrot.slane %v4586_v54, 1  ;;  %v4603_v25 = vrot.slane %v4586_v54, 2 }
 0x7d6   : > { %v4609_v28 = vrot.slane %v4586_v54, 3 }
 0x7d7   : > { %v4598_v61 = vrot.slane %v4588_v26, 1  ;;  %v4599_v16 = vrot.slane %v4590_v58, 2  ;;  %v4592_v5 = vrot.slane %v4590_v58, 1  ;;  %v4610_v6 = vrot.slane %v4588_v26, 3 }
 0x7d8   : > { %v4611_v7 = vrot.slane %v4590_v58, 4  ;;  %v4604_v57 = vrot.slane %v4588_v26, 2  ;;  %v4605_v12 = vrot.slane %v4590_v58, 3 }
 0x7d9   : > { %v4600_v1 = vor.u32 %v4599_v16, %v4598_v61  ;;  %v4593_v63 = vor.u32 %v4592_v5, %v4588_v26 }
 0x7da   : > { %v4612_v11 = vor.u32 %v4611_v7, %v4610_v6  ;;  %v4606_v56 = vor.u32 %v4605_v12, %v4604_v57 }
 0x7db   : > { %4601 = vrot.lane.b32.xlu0 %v4600_v1, %s7967_s24  ;;  %4594 = vrot.lane.b32.xlu1 %v4593_v63, %s7967_s24 }
 0x7df   : > { %4613 = vrot.lane.b32.xlu0 %v4612_v11, %s7967_s24  ;;  %4607 = vrot.lane.b32.xlu1 %v4606_v56, %s7967_s24 }
 0x84d   : > { %v4602_v18 = vpop.permute.xlu0 %4601  ;;  %v4595_v19 = vpop.permute.xlu1 %4594 }
 0x84e   : > { %v4616_v21 = vsel %vm1747_vm10, %v4586_v54, %v4595_v19  ;;  %v4620_v23 = vsel %vm1747_vm10, %v4597_v55, %v4602_v18 }
 0x84f   : > { %4925 = vmatprep.mubr.bf16.mxu1 %v4620_v23 }
 0x850   : > { %4926 = vmatmul.mubr.bf16.vlgmr.msra.gmra.mrb[32].mxu1 %v4616_v21 }
 0x851   : > { %v4614_v4 = vpop.permute.xlu0 %4613  ;;  %v4608_v2 = vpop.permute.xlu1 %4607  ;;  %6116 = vmatpush3.bf16.msra.mxu1 %v6387_v38 }
 0x852   : > { %v4624_v39 = vsel %vm1747_vm10, %v4603_v25, %v4608_v2  ;;  %v4628_v45 = vsel %vm1747_vm10, %v4609_v28, %v4614_v4  ;;  %6117 = vmatprep.subr.bf16.mxu1 %v6388_v27 }
 0x853   : > { %4965 = vmatprep.mubr.bf16.mxu0 %v4628_v45  ;;  %v6416_v45 = vld [vmem:[%s7942_s13 + $0xf8] sm:$0xff]  }
 0x854   : > { %4966 = vmatmul.mubr.bf16.vlgmr.msra.gmra.mrb[48].mxu0 %v4624_v39 }
 0x855   : > { %6138 = vmatpush3.bf16.msra.mxu0 %v6391_v13  ;;  %6118 = vmatpush3.bf16.msra.mxu1 %v6390_v47 }
 0x856   : > { %6139 = vmatprep.subr.bf16.mxu0 %v6393_v46  ;;  %6119 = vmatprep.subr.bf16.mxu1 %v6392_v53 }
 0x859   : > { %6140 = vmatpush3.bf16.msra.mxu0 %v6395_v34  ;;  %6120 = vmatpush3.bf16.msra.mxu1 %v6394_v29 }
 0x85a   : > { %6141 = vmatprep.subr.bf16.mxu0 %v6397_v14  ;;  %6121 = vmatprep.subr.bf16.mxu1 %v6396_v36 }
 0x85d   : > { %6142 = vmatpush3.bf16.msra.mxu0 %v6399_v20  ;;  %6122 = vmatpush3.bf16.msra.mxu1 %v6398_v41 }
 0x85e   : > { %6143 = vmatprep.subr.bf16.mxu0 %v6401_v35  ;;  %6123 = vmatprep.subr.bf16.mxu1 %v6400_v37 }
 0x861   : > { %6144 = vmatpush3.bf16.msra.mxu0 %v6403_v8  ;;  %6124 = vmatpush3.bf16.msra.mxu1 %v6402_v33 }
 0x862   : > { %6145 = vmatprep.subr.bf16.mxu0 %v6405_v44  ;;  %6125 = vmatprep.subr.bf16.mxu1 %v6404_v48 }
 0x865   : > { %6146 = vmatpush3.bf16.msra.mxu0 %v6407_v15  ;;  %6126 = vmatpush3.bf16.msra.mxu1 %v6406_v51 }
 0x866   : > { %6147 = vmatprep.subr.bf16.mxu0 %v6409_v31  ;;  %6127 = vmatprep.subr.bf16.mxu1 %v6408_v43 }
 0x869   : > { %6148 = vmatpush3.bf16.msra.mxu0 %v6411_v49  ;;  %6128 = vmatpush3.bf16.msra.mxu1 %v6410_v52 }
 0x86a   : > { %6149 = vmatprep.subr.bf16.mxu0 %v6413_v22  ;;  %6129 = vmatprep.subr.bf16.mxu1 %v6412_v62  ;;  %v6418_v62 = vld [vmem:[%s7944_s15] sm:$0xff]  }
 0x86d   : > { %6150 = vmatpush3.bf16.msra.mxu0 %v6415_v60  ;;  %6130 = vmatpush3.bf16.msra.mxu1 %v6414_v3  ;;  %v6419_v60 = vld [vmem:[%s7944_s15 + $0x8] sm:$0xff]   ;;  %v6420_v3 = vld [vmem:[%s7944_s15 + $0x10] sm:$0xff]  }
 0x86e   : > { %6185 = vmatprep.subr.bf16.mxu1 %v6436_v24  ;;  %6151 = vmatprep.subr.bf16.mxu0 %v6416_v45 }
 0x871   : > { %6152 = vmatpush3.bf16.msra.mxu0 %v6417_v32 }
 0x872   : > { %6197 = vmatprep.subr.bf16.mxu0 %v6436_v24 }
 0x923   : > { %v6087_v42 = vpop.f32.mrb[32].mxu1 }
 0x924   : > { %v6088_v9 = vpop.f32.mrb[33].mxu1 }
 0x925   : > { %v6089_v30 = vadd.f32 %v6088_v9, %v6087_v42  ;;  %v6090_v0 = vpop.f32.mrb[34].mxu1  ;;  %v6421_v42 = vld [vmem:[%s7944_s15 + $0x18] sm:$0xff]  }
 0x926   : > { %v6091_v40 = vpop.f32.mrb[35].mxu1 }
 0x927   : > { %v6109_v10 = vpop.f32.mrb[48].mxu0  ;;  %v4928_v26 = vadd.f32 %v6089_v30, %v5760_v50  ;;  %v5793_v40 = vld [vmem:[%s7943_s14] ss:$0 sm:$0xff] }
 0x928   : > { %v6110_v54 = vpop.f32.mrb[49].mxu0 }
 0x929   : > { %v6111_v58 = vadd.f32 %v6110_v54, %v6109_v10  ;;  %v6112_v61 = vpop.f32.mrb[50].mxu0 }
 0x92a   : > { %v6113_v16 = vpop.f32.mrb[51].mxu0 }
 0x92b   : > { %v4968_v5 = vadd.f32 %v6111_v58, %v4928_v26 }
 0x92d   : > { %v4973_v6 = vmax.f32 %v4968_v5, 0.0 }
 0x92f   : > { %v4981_v7 = vrot.slane %v4973_v6, %v6570_v17  ;;  %v5006_v17 = vld [vmem:[#allocation2 + $0x8] sm:$0x1] }
 0x931   : > { %v4982_v1 = vcombine.high %v4981_v7, %v4981_v7  ;;  %v4985_v63 = vsel %vm1163_vm2, %v4981_v7, -inf }
 0x932   : > { %v4986_v57 = vrot.slane %v4985_v63, 4 }
 0x933   : > { %v4992_v12 = vsel %vm1163_vm2, %v4982_v1, -inf }
 0x934   : > { %v4987_v11 = vmax.f32 %v4985_v63, %v4986_v57  ;;  %v4993_v56 = vrot.slane %v4992_v12, 4 }
 0x936   : > { %v4988_v55 = vrot.slane %v4987_v11, 2  ;;  %v4994_v18 = vmax.f32 %v4992_v12, %v4993_v56 }
 0x938   : > { %v4989_v19 = vmax.f32 %v4987_v11, %v4988_v55  ;;  %v4995_v21 = vrot.slane %v4994_v18, 2 }
 0x93a   : > { %v4990_v23 = vrot.slane %v4989_v19, 1  ;;  %v4996_v25 = vmax.f32 %v4994_v18, %v4995_v21  ;;  %v6423_v21 = vld [vmem:[%s7946_s17 + $0x8] sm:$0xff]  }
 0x93c   : > { %v4997_v28 = vrot.slane %v4996_v25, 1  ;;  %v4991_v4 = vmax.f32 %v4989_v19, %v4990_v23  ;;  %v6422_v19 = vld [vmem:[%s7946_s17] sm:$0xff]  }
 0x93d   : > { %v5411_v23 = vld [vmem:[%s7945_s16] sm:$0x1] }
 0x93e   : > { %v4998_v2 = vmax.f32 %v4996_v25, %v4997_v28 }
 0x940   : > { %v5001_v39 = vsel %vm1676_vm3, %v4998_v2, %v4991_v4  ;;  %vm6438_vm3 = vmmov 0  }
 0x941   : > { %5003 = vst.msk [vmem:[#allocation2 + $0x3] sm:$0x3] %vm1163_vm2, %v5001_v39 }
 0x948   : > { %v5005_v38 = vld [vmem:[#allocation2] sm:$0xff] }
 0x949   : > { %v5007_v27 = vpack.c.bf16 %v5006_v17, %v5005_v38 }
 0x94b   : > { %v5009_v59 = vshrl.u32 %v5007_v27, 16  ;;  %v5011_v13 = vshll.u32 %v5007_v27, 16  ;;  %v5018_v8 = vrot.slane %v5007_v27, 1  ;;  %v5024_v31 = vrot.slane %v5007_v27, 2 }
 0x94c   : > { %v5030_v51 = vrot.slane %v5007_v27, 3 }
 0x94d   : > { %v5019_v46 = vrot.slane %v5009_v59, 1  ;;  %v5020_v47 = vrot.slane %v5011_v13, 2  ;;  %v5013_v53 = vrot.slane %v5011_v13, 1  ;;  %v5031_v34 = vrot.slane %v5009_v59, 3 }
 0x94e   : > { %v5032_v14 = vrot.slane %v5011_v13, 4  ;;  %v5025_v20 = vrot.slane %v5009_v59, 2  ;;  %v5026_v35 = vrot.slane %v5011_v13, 3  ;;  %v5491_v13 = vld [vmem:[%s7947_s18] sm:$0x1] }
 0x94f   : > { %v5021_v29 = vor.u32 %v5020_v47, %v5019_v46  ;;  %v5014_v36 = vor.u32 %v5013_v53, %v5009_v59 }
 0x950   : > { %v5033_v41 = vor.u32 %v5032_v14, %v5031_v34  ;;  %v5027_v37 = vor.u32 %v5026_v35, %v5025_v20 }
 0x951   : > { %5022 = vrot.lane.b32.xlu0 %v5021_v29, %s7967_s24  ;;  %5015 = vrot.lane.b32.xlu1 %v5014_v36, %s7967_s24 }
 0x955   : > { %5034 = vrot.lane.b32.xlu0 %v5033_v41, %s7967_s24  ;;  %5028 = vrot.lane.b32.xlu1 %v5027_v37, %s7967_s24 }
 0x9c3   : > { %v5023_v44 = vpop.permute.xlu0 %5022  ;;  %v5016_v33 = vpop.permute.xlu1 %5015 }
 0x9c4   : > { %v5037_v48 = vsel %vm1747_vm10, %v5007_v27, %v5016_v33  ;;  %v5041_v15 = vsel %vm1747_vm10, %v5018_v8, %v5023_v44 }
 0x9c5   : > { %5346 = vmatprep.mubr.bf16.mxu1 %v5041_v15 }
 0x9c6   : > { %5347 = vmatmul.mubr.bf16.vlgmr.msra.gmra.mrb[36].mxu1 %v5037_v48 }
 0x9c7   : > { %v5035_v43 = vpop.permute.xlu0 %5034  ;;  %v5029_v49 = vpop.permute.xlu1 %5028  ;;  %6186 = vmatpush3.bf16.msra.mxu1 %v6418_v62  ;;  %6193 = vmatprep.mubr.msk.bf16.mxu1 %vm6438_vm3, %v6436_v24 }
 0x9c8   : > { %v5045_v22 = vsel %vm1747_vm10, %v5024_v31, %v5029_v49  ;;  %v5049_v52 = vsel %vm1747_vm10, %v5030_v51, %v5035_v43  ;;  %6187 = vmatprep.subr.bf16.mxu1 %v6436_v24 }
 0x9c9   : > { %5386 = vmatprep.mubr.bf16.mxu0 %v5049_v52 }
 0x9ca   : > { %5387 = vmatmul.mubr.bf16.vlgmr.msra.gmra.mrb[52].mxu0 %v5045_v22 }
 0x9cb   : > { %6188 = vmatpush3.bf16.msra.mxu1 %v6419_v60  ;;  %6201 = vmatprep.mubr.msk.bf16.mxu0 %vm6438_vm3, %v6436_v24 }
 0x9cc   : > { %6189 = vmatprep.subr.bf16.mxu1 %v6436_v24  ;;  %6198 = vmatpush3.bf16.msra.mxu0 %v6422_v19 }
 0x9cd   : > { %6199 = vmatprep.subr.bf16.mxu0 %v6436_v24 }
 0x9cf   : > { %6190 = vmatpush3.bf16.msra.mxu1 %v6420_v3 }
 0x9d0   : > { %6191 = vmatprep.subr.bf16.mxu1 %v6436_v24  ;;  %6200 = vmatpush3.bf16.msra.mxu0 %v6423_v21 }
 0x9d3   : > { %6192 = vmatpush3.bf16.msra.mxu1 %v6421_v42 }
 0xa99   : > { %v6131_v9 = vpop.f32.mrb[36].mxu1 }
 0xa9a   : > { %v6132_v30 = vpop.f32.mrb[37].mxu1 }
 0xa9b   : > { %v6133_v0 = vadd.f32 %v6132_v30, %v6131_v9  ;;  %v6134_v50 = vpop.f32.mrb[38].mxu1 }
 0xa9c   : > { %v6135_v10 = vpop.f32.mrb[39].mxu1 }
 0xa9d   : > { %v6153_v54 = vpop.f32.mrb[52].mxu0  ;;  %v5349_v58 = vadd.f32 %v6133_v0, %v5793_v40 }
 0xa9e   : > { %v6154_v26 = vpop.f32.mrb[53].mxu0 }
 0xa9f   : > { %v6155_v61 = vadd.f32 %v6154_v26, %v6153_v54  ;;  %v6156_v16 = vpop.f32.mrb[54].mxu0 }
 0xaa0   : > { %v6157_v5 = vpop.f32.mrb[55].mxu0 }
 0xaa1   : > { %v5389_v6 = vadd.f32 %v6155_v61, %v5349_v58 }
 0xaa3   : > { %v5394_v7 = vmax.f32 %v5389_v6, 0.0 }
 0xaa5   : > { %v5395_v1 = vsel %vm1163_vm2, %v5394_v7, -inf }
 0xaa6   : > { %v5396_v63 = vrot.slane %v5395_v1, 4 }
 0xaa8   : > { %v5397_v57 = vmax.f32 %v5395_v1, %v5396_v63 }
 0xaaa   : > { %v5398_v12 = vrot.slane %v5397_v57, 2 }
 0xaac   : > { %v5399_v11 = vmax.f32 %v5397_v57, %v5398_v12 }
 0xaae   : > { %v5400_v56 = vrot.slane %v5399_v11, 1 }
 0xab0   : > { %v5401_v55 = vmax.f32 %v5399_v11, %v5400_v56 }
 0xab2   : > { %v5402_v18 = vpack.c.bf16 %v5401_v55, %v5401_v55 }
 0xab4   : > { %6194 = vmatmul.mubr.msk.bf16.vlgmr.msra.gmra.mrb[40].mxu1 %vm1747_vm10, %v5402_v18 }
 0xb87   : > { %v5473_v25 = vpop.f32.mrb[40].mxu1 }
 0xb88   : > { %v5474_v28 = vadd.f32 %v5473_v25, %v5411_v23  ;;  %v6195_v4 = vpop.f32.mrb[41].mxu1 }
 0xb89   : > { %v5476_v2 = vpop.f32.mrb[42].mxu1 }
 0xb8a   : > { %v5480_v39 = vmul.f32 1.442695, %v5474_v28  ;;  %v6196_v17 = vpop.f32.mrb[43].mxu1  ;;  %vm5479_vm2 = vcmp.gt.f32.partialorder %v5474_v28, 0.0 }
 0xb8c   : > { %6424 = vpow2.f32 %v5480_v39 }
 0xb96   : > { %v6425_v45 = vpop.eup %6424 }
 0xb97   : > { %v5831_v32 = vadd.f32 -1.0, %v6425_v45 }
 0xb99   : > { %v5483_v38 = vmul.f32 1.6732632, %v5831_v32 }
 0xb9b   : > { %v5484_v27 = vsel %vm5479_vm2, %v5474_v28, %v5483_v38 }
 0xb9c   : > { %v5485_v59 = vmul.f32 1.050701, %v5484_v27 }
 0xb9e   : > { %v5486_v24 = vpack.c.bf16 %v5485_v59, %v5485_v59 }
 0xba0   : > { %6202 = vmatmul.mubr.msk.bf16.vlgmr.msra.gmra.mrb[56].mxu0 %vm5504_vm4, %v5486_v24 }
 0xc73   : > { %v5542_v46 = vpop.f32.mrb[56].mxu0 }
 0xc74   : > { %v5543_v47 = vadd.f32 %v5542_v46, %v5491_v13  ;;  %v6203_v53 = vpop.f32.mrb[57].mxu0 }
 0xc75   : > { %v5545_v34 = vpop.f32.mrb[58].mxu0 }
 0xc76   : > { %5549 = vrot.lane.b32.xlu0 %v5543_v47, %s7967_s24  ;;  %v6204_v14 = vpop.f32.mrb[59].mxu0 }
 0xce8   : > { %v5550_v29 = vpop.permute.xlu0 %5549 }
 0xce9   : > { %v5552_v36 = vsel %vm1747_vm10, %v5401_v55, %v5550_v29 }
 0xcea   : > { %v5554_v20 = vsel %vm5553_vm5, %v5552_v36, 0.0 }
 0xceb   : > { %5555 = vst [vmem:[%s598_s2] sm:$0x1] %v5554_v20 }
 0xcec PF: > { %s29_s0 = sadd.s32 1, %s6433_s0  }
 0xced   : > { %p26_p4 = scmp.ge.s32.totalorder %s29_s0, 4  }
 0xcef   :  { %28 = sbr.rel (!%p26_p4) target bundleno = 6 (0x6), region = 126 }

</bundles_post_ra>
